<compile_context>
chip_gen: v7x
topology: tpu7x:2x2x1
jax: 0.10.0
libtpu: 0.0.40
codegen_flags: <defaults>
</compile_context>

<pallas_src>
import numpy as np
import jax
import jax.numpy as jnp
from jax.experimental import pallas as pl
from jax.experimental.pallas import tpu as pltpu


# ---------------------------------------------------------------------------
# Permutation helpers (host-side, compile-time constants)
# ---------------------------------------------------------------------------
def _single_shuffle_perm(channels: int, groups: int) -> np.ndarray:
    """perm[oc] = input channel feeding output channel oc after ChannelShuffle(groups)."""
    cpg = channels // groups
    oc = np.arange(channels)
    return (oc % groups) * cpg + (oc // groups)


def _composed_perm(channels: int, g0: int, g1: int) -> np.ndarray:
    """Composition shuffle(g1)(shuffle(g0)(x)): out[oc] = in[p0[p1[oc]]]."""
    p0 = _single_shuffle_perm(channels, g0)
    p1 = _single_shuffle_perm(channels, g1)
    return p0[p1].astype(np.int32)


# ---------------------------------------------------------------------------
# Generation-aware VMEM budgeting
# ---------------------------------------------------------------------------
_VMEM_LIMIT_BYTES = 32 * 1024 * 1024   # raised scoped limit (v5e default is 16 MiB)
_MIN_PALLAS_HW = 512                   # below this, XLA's gather already wins


def _vmem_budget_bytes() -> int:
    """Budget for the double-buffered output slab (input stays in HBM)."""
    try:
        cap = pltpu.get_tpu_info().vmem_capacity_bytes
    except Exception:
        cap = 64 * 1024 * 1024  # conservative (v7x-like) if query unavailable
    # ~1/4 of physical VMEM, capped so we stay well inside the scoped limit.
    return max(4 * 1024 * 1024, min(cap // 4, 24 * 1024 * 1024))


def _choose_hw_tile(c: int, hw: int, itemsize: int, n: int, budget_bytes: int) -> int:
    """Largest divisor of hw that is a multiple of 128 and fits the VMEM budget.

    Only called when hw % 128 == 0.  Only the (double-buffered) output block
    lives in VMEM: cost = 2 * C * hw_tile * itemsize.  When N == 1 the tile is
    capped to hw/2 so the grid has >= 2 steps (keeps both v7x TensorCores busy).
    """
    per_lane_cost = 2 * c * itemsize
    max_tile = (budget_bytes // per_lane_cost) // 128 * 128
    max_tile = min(hw, max(128, max_tile))
    if n == 1 and hw >= 2 * 128:
        max_tile = min(max_tile, max(128, (hw // 2) // 128 * 128))
    for k in range(max_tile // 128, 0, -1):
        t = 128 * k
        if hw % t == 0:
            return t
    return 128  # unreachable (hw % 128 == 0 guarantees k == 1 works)


# ---------------------------------------------------------------------------
# Kernel: per-channel gather DMAs HBM -> pipelined VMEM output block
# ---------------------------------------------------------------------------
def _make_gather_dma_kernel(perm, hw_tile: int):
    perm = tuple(int(p) for p in perm)

    def kernel(x_hbm, o_ref, copy_sem):
        # x_hbm: full (N, C, HW) array left in HBM (memory_space=pl.ANY).
        # o_ref: (1, C, hw_tile) VMEM output block (auto-pipelined writeback).
        n = pl.program_id(0)
        off = pl.multiple_of(pl.program_id(1) * hw_tile, 128)

        copies = []
        for oc, ic in enumerate(perm):
            cp = pltpu.make_async_copy(
                x_hbm.at[n, pl.ds(ic, 1), pl.ds(off, hw_tile)],   # (1, hw_tile) in HBM
                o_ref.at[0, pl.ds(oc, 1), :],                     # (1, hw_tile) in VMEM
                copy_sem,
            )
            cp.start()
            copies.append(cp)
        # All copies are the same size and share one DMA semaphore; one matched
        # wait per copy guarantees every gather has landed before the block
        # retires to the pipelined HBM writeback.
        for cp in copies:
            cp.wait()

    return kernel


# ---------------------------------------------------------------------------
# Wrapper
# ---------------------------------------------------------------------------
def channel_shuffle_2_then_16(x: jax.Array, *, g0: int = 2, g1: int = 16) -> jax.Array:
    n, c, h, w = x.shape
    assert c % g0 == 0 and c % g1 == 0, "channels must be divisible by both group counts"

    perm = _composed_perm(c, g0, g1)
    if np.array_equal(perm, np.arange(c)):
        # e.g. C == 32: shuffle(2) then shuffle(16) is the identity permutation.
        return x

    hw = h * w
    itemsize = jnp.dtype(x.dtype).itemsize
    budget = _vmem_budget_bytes()

    # Small / lane-unfriendly spatial extents (or pathological channel counts):
    # XLA's gather is already at HBM roofline; Pallas would only add per-step
    # overhead and masked partial-lane stores.
    if hw % 128 != 0 or hw < _MIN_PALLAS_HW or 2 * c * 128 * itemsize > budget:
        return jnp.take(x, jnp.asarray(perm, dtype=jnp.int32), axis=1)

    x3 = x.reshape(n, c, hw)
    hw_tile = _choose_hw_tile(c, hw, itemsize, n, budget)
    grid = (n, hw // hw_tile)

    out3 = pl.pallas_call(
        _make_gather_dma_kernel(perm, hw_tile),
        out_shape=jax.ShapeDtypeStruct((n, c, hw), x.dtype),
        grid_spec=pltpu.PrefetchScalarGridSpec(
            num_scalar_prefetch=0,
            grid=grid,
            in_specs=[pl.BlockSpec(memory_space=pl.ANY)],   # input stays in HBM
            out_specs=pl.BlockSpec((1, c, hw_tile), lambda ni, hi: (ni, 0, hi)),
            scratch_shapes=[pltpu.SemaphoreType.DMA(())],
        ),
        compiler_params=pltpu.CompilerParams(
            # Every output block is written exactly once -> both axes parallel
            # (lets v7x shard the grid across its 2 TensorCores).
            dimension_semantics=("parallel", "parallel"),
            vmem_limit_bytes=_VMEM_LIMIT_BYTES,
        ),
    )(x3)
    return out3.reshape(n, c, h, w)


def model_forward(x: jax.Array, y: jax.Array):
    # Two independent permutation copies; XLA dispatches them asynchronously.
    return channel_shuffle_2_then_16(x), channel_shuffle_2_then_16(y)


# ---------------------------------------------------------------------------
# Reference + self-test
# ---------------------------------------------------------------------------
def _ref_channel_shuffle(x: np.ndarray, groups: int) -> np.ndarray:
    n, c, h, w = x.shape
    return (
        x.reshape(n, groups, c // groups, h, w)
        .transpose(0, 2, 1, 3, 4)
        .reshape(n, c, h, w)
    )


def _ref_forward(x: np.ndarray, y: np.ndarray):
    xr = _ref_channel_shuffle(_ref_channel_shuffle(x, 2), 16)
    yr = _ref_channel_shuffle(_ref_channel_shuffle(y, 2), 16)
    return xr, yr


if __name__ == "__main__":
    key = jax.random.PRNGKey(0)
    kx, ky, ks, kz = jax.random.split(key, 4)

    # Pallas DMA-gather path: lane-friendly H*W (multiple of 128, >= 512),
    # channel counts where the composed permutation is NOT the identity.
    x = jax.random.normal(kx, (2, 64, 16, 32), dtype=jnp.float32)   # hw = 512, N = 2
    y = jax.random.normal(ky, (1, 48, 16, 32), dtype=jnp.float32)   # hw = 512, N = 1 -> 2 hw tiles

    out_x, out_y = model_forward(x, y)
    jax.block_until_ready((out_x, out_y))

    ref_x, ref_y = _ref_forward(np.asarray(x), np.asarray(y))
    assert np.allclose(np.asarray(out_x), ref_x), "x mismatch"
    assert np.allclose(np.asarray(out_y), ref_y), "y mismatch"

    # XLA fallback path: small, lane-unfriendly spatial extent (6x8).
    s = jax.random.normal(ks, (2, 64, 6, 8), dtype=jnp.float32)
    out_s = channel_shuffle_2_then_16(s)
    jax.block_until_ready(out_s)
    ref_s = _ref_channel_shuffle(_ref_channel_shuffle(np.asarray(s), 2), 16)
    assert np.allclose(np.asarray(out_s), ref_s), "s (fallback path) mismatch"

    # Identity fast-path (C = 32: shuffle(2) then shuffle(16) is a no-op).
    z = jax.random.normal(kz, (1, 32, 4, 4), dtype=jnp.float32)
    out_z = channel_shuffle_2_then_16(z)
    jax.block_until_ready(out_z)
    ref_z = _ref_channel_shuffle(_ref_channel_shuffle(np.asarray(z), 2), 16)
    assert np.allclose(np.asarray(out_z), ref_z), "z (identity path) mismatch"

    print("KERNEL_OK")
</pallas_src>

<mosaic_0001>
module attributes {stable_mosaic.version = 11 : i64} {
  func.func @kernel(%arg0: i32, %arg1: i32, %arg2: memref<2x64x512xf32, #tpu.memory_space<any>>, %arg3: memref<1x64x512xf32, #tpu.memory_space<vmem>>, %arg4: memref<!tpu.dma_semaphore, #tpu.memory_space<semaphore_mem>>) attributes {dimension_semantics = [#tpu.dimension_semantics<parallel>, #tpu.dimension_semantics<parallel>], iteration_bounds = array<i64: 2, 1>, scalar_prefetch = 0 : i64, scratch_operands = 1 : i64, tpu.core_type = #tpu.core_type<tc>, window_params = [{}, {transform_indices = @transform_1, window_bounds = array<i64: 1, 64, 512>}]} {
    %c512_i32 = arith.constant 512 : i32
    %0 = arith.muli %arg1, %c512_i32 : i32
    %1 = tpu.assume_multiple %0, 128 : i32
    %c0_i32 = arith.constant 0 : i32
    %c0_i32_0 = arith.constant 0 : i32
    %2 = tpu.memref_slice %arg2[%arg0, %c0_i32_0, %1] : memref<2x64x512xf32, #tpu.memory_space<any>> -> memref<1x1x512xf32, #tpu.memory_space<any>>
    %3 = tpu.memref_squeeze %2 : memref<1x1x512xf32, #tpu.memory_space<any>> -> memref<1x512xf32, #tpu.memory_space<any>>
    %c0_i32_1 = arith.constant 0 : i32
    %c0_i32_2 = arith.constant 0 : i32
    %4 = tpu.memref_slice %arg3[%c0_i32, %c0_i32_1, %c0_i32_2] : memref<1x64x512xf32, #tpu.memory_space<vmem>> -> memref<1x1x512xf32, #tpu.memory_space<vmem>>
    %5 = tpu.memref_squeeze %4 : memref<1x1x512xf32, #tpu.memory_space<vmem>> -> memref<1x512xf32, #tpu.memory_space<vmem>>
    tpu.enqueue_dma source(%3 : memref<1x512xf32, #tpu.memory_space<any>>) target(%5 : memref<1x512xf32, #tpu.memory_space<vmem>>) target_semaphore(%arg4 : memref<!tpu.dma_semaphore, #tpu.memory_space<semaphore_mem>>)
    %c0_i32_3 = arith.constant 0 : i32
    %c2_i32 = arith.constant 2 : i32
    %6 = tpu.memref_slice %arg2[%arg0, %c2_i32, %1] : memref<2x64x512xf32, #tpu.memory_space<any>> -> memref<1x1x512xf32, #tpu.memory_space<any>>
    %7 = tpu.memref_squeeze %6 : memref<1x1x512xf32, #tpu.memory_space<any>> -> memref<1x512xf32, #tpu.memory_space<any>>
    %c1_i32 = arith.constant 1 : i32
    %c0_i32_4 = arith.constant 0 : i32
    %8 = tpu.memref_slice %arg3[%c0_i32_3, %c1_i32, %c0_i32_4] : memref<1x64x512xf32, #tpu.memory_space<vmem>> -> memref<1x1x512xf32, #tpu.memory_space<vmem>>
    %9 = tpu.memref_squeeze %8 : memref<1x1x512xf32, #tpu.memory_space<vmem>> -> memref<1x512xf32, #tpu.memory_space<vmem>>
    tpu.enqueue_dma source(%7 : memref<1x512xf32, #tpu.memory_space<any>>) target(%9 : memref<1x512xf32, #tpu.memory_space<vmem>>) target_semaphore(%arg4 : memref<!tpu.dma_semaphore, #tpu.memory_space<semaphore_mem>>)
    %c0_i32_5 = arith.constant 0 : i32
    %c4_i32 = arith.constant 4 : i32
    %10 = tpu.memref_slice %arg2[%arg0, %c4_i32, %1] : memref<2x64x512xf32, #tpu.memory_space<any>> -> memref<1x1x512xf32, #tpu.memory_space<any>>
    %11 = tpu.memref_squeeze %10 : memref<1x1x512xf32, #tpu.memory_space<any>> -> memref<1x512xf32, #tpu.memory_space<any>>
    %c2_i32_6 = arith.constant 2 : i32
    %c0_i32_7 = arith.constant 0 : i32
    %12 = tpu.memref_slice %arg3[%c0_i32_5, %c2_i32_6, %c0_i32_7] : memref<1x64x512xf32, #tpu.memory_space<vmem>> -> memref<1x1x512xf32, #tpu.memory_space<vmem>>
    %13 = tpu.memref_squeeze %12 : memref<1x1x512xf32, #tpu.memory_space<vmem>> -> memref<1x512xf32, #tpu.memory_space<vmem>>
    tpu.enqueue_dma source(%11 : memref<1x512xf32, #tpu.memory_space<any>>) target(%13 : memref<1x512xf32, #tpu.memory_space<vmem>>) target_semaphore(%arg4 : memref<!tpu.dma_semaphore, #tpu.memory_space<semaphore_mem>>)
    %c0_i32_8 = arith.constant 0 : i32
    %c6_i32 = arith.constant 6 : i32
    %14 = tpu.memref_slice %arg2[%arg0, %c6_i32, %1] : memref<2x64x512xf32, #tpu.memory_space<any>> -> memref<1x1x512xf32, #tpu.memory_space<any>>
    %15 = tpu.memref_squeeze %14 : memref<1x1x512xf32, #tpu.memory_space<any>> -> memref<1x512xf32, #tpu.memory_space<any>>
    %c3_i32 = arith.constant 3 : i32
    %c0_i32_9 = arith.constant 0 : i32
    %16 = tpu.memref_slice %arg3[%c0_i32_8, %c3_i32, %c0_i32_9] : memref<1x64x512xf32, #tpu.memory_space<vmem>> -> memref<1x1x512xf32, #tpu.memory_space<vmem>>
    %17 = tpu.memref_squeeze %16 : memref<1x1x512xf32, #tpu.memory_space<vmem>> -> memref<1x512xf32, #tpu.memory_space<vmem>>
    tpu.enqueue_dma source(%15 : memref<1x512xf32, #tpu.memory_space<any>>) target(%17 : memref<1x512xf32, #tpu.memory_space<vmem>>) target_semaphore(%arg4 : memref<!tpu.dma_semaphore, #tpu.memory_space<semaphore_mem>>)
    %c0_i32_10 = arith.constant 0 : i32
    %c8_i32 = arith.constant 8 : i32
    %18 = tpu.memref_slice %arg2[%arg0, %c8_i32, %1] : memref<2x64x512xf32, #tpu.memory_space<any>> -> memref<1x1x512xf32, #tpu.memory_space<any>>
    %19 = tpu.memref_squeeze %18 : memref<1x1x512xf32, #tpu.memory_space<any>> -> memref<1x512xf32, #tpu.memory_space<any>>
    %c4_i32_11 = arith.constant 4 : i32
    %c0_i32_12 = arith.constant 0 : i32
    %20 = tpu.memref_slice %arg3[%c0_i32_10, %c4_i32_11, %c0_i32_12] : memref<1x64x512xf32, #tpu.memory_space<vmem>> -> memref<1x1x512xf32, #tpu.memory_space<vmem>>
    %21 = tpu.memref_squeeze %20 : memref<1x1x512xf32, #tpu.memory_space<vmem>> -> memref<1x512xf32, #tpu.memory_space<vmem>>
    tpu.enqueue_dma source(%19 : memref<1x512xf32, #tpu.memory_space<any>>) target(%21 : memref<1x512xf32, #tpu.memory_space<vmem>>) target_semaphore(%arg4 : memref<!tpu.dma_semaphore, #tpu.memory_space<semaphore_mem>>)
    %c0_i32_13 = arith.constant 0 : i32
    %c10_i32 = arith.constant 10 : i32
    %22 = tpu.memref_slice %arg2[%arg0, %c10_i32, %1] : memref<2x64x512xf32, #tpu.memory_space<any>> -> memref<1x1x512xf32, #tpu.memory_space<any>>
    %23 = tpu.memref_squeeze %22 : memref<1x1x512xf32, #tpu.memory_space<any>> -> memref<1x512xf32, #tpu.memory_space<any>>
    %c5_i32 = arith.constant 5 : i32
    %c0_i32_14 = arith.constant 0 : i32
    %24 = tpu.memref_slice %arg3[%c0_i32_13, %c5_i32, %c0_i32_14] : memref<1x64x512xf32, #tpu.memory_space<vmem>> -> memref<1x1x512xf32, #tpu.memory_space<vmem>>
    %25 = tpu.memref_squeeze %24 : memref<1x1x512xf32, #tpu.memory_space<vmem>> -> memref<1x512xf32, #tpu.memory_space<vmem>>
    tpu.enqueue_dma source(%23 : memref<1x512xf32, #tpu.memory_space<any>>) target(%25 : memref<1x512xf32, #tpu.memory_space<vmem>>) target_semaphore(%arg4 : memref<!tpu.dma_semaphore, #tpu.memory_space<semaphore_mem>>)
    %c0_i32_15 = arith.constant 0 : i32
    %c12_i32 = arith.constant 12 : i32
    %26 = tpu.memref_slice %arg2[%arg0, %c12_i32, %1] : memref<2x64x512xf32, #tpu.memory_space<any>> -> memref<1x1x512xf32, #tpu.memory_space<any>>
    %27 = tpu.memref_squeeze %26 : memref<1x1x512xf32, #tpu.memory_space<any>> -> memref<1x512xf32, #tpu.memory_space<any>>
    %c6_i32_16 = arith.constant 6 : i32
    %c0_i32_17 = arith.constant 0 : i32
    %28 = tpu.memref_slice %arg3[%c0_i32_15, %c6_i32_16, %c0_i32_17] : memref<1x64x512xf32, #tpu.memory_space<vmem>> -> memref<1x1x512xf32, #tpu.memory_space<vmem>>
    %29 = tpu.memref_squeeze %28 : memref<1x1x512xf32, #tpu.memory_space<vmem>> -> memref<1x512xf32, #tpu.memory_space<vmem>>
    tpu.enqueue_dma source(%27 : memref<1x512xf32, #tpu.memory_space<any>>) target(%29 : memref<1x512xf32, #tpu.memory_space<vmem>>) target_semaphore(%arg4 : memref<!tpu.dma_semaphore, #tpu.memory_space<semaphore_mem>>)
    %c0_i32_18 = arith.constant 0 : i32
    %c14_i32 = arith.constant 14 : i32
    %30 = tpu.memref_slice %arg2[%arg0, %c14_i32, %1] : memref<2x64x512xf32, #tpu.memory_space<any>> -> memref<1x1x512xf32, #tpu.memory_space<any>>
    %31 = tpu.memref_squeeze %30 : memref<1x1x512xf32, #tpu.memory_space<any>> -> memref<1x512xf32, #tpu.memory_space<any>>
    %c7_i32 = arith.constant 7 : i32
    %c0_i32_19 = arith.constant 0 : i32
    %32 = tpu.memref_slice %arg3[%c0_i32_18, %c7_i32, %c0_i32_19] : memref<1x64x512xf32, #tpu.memory_space<vmem>> -> memref<1x1x512xf32, #tpu.memory_space<vmem>>
    %33 = tpu.memref_squeeze %32 : memref<1x1x512xf32, #tpu.memory_space<vmem>> -> memref<1x512xf32, #tpu.memory_space<vmem>>
    tpu.enqueue_dma source(%31 : memref<1x512xf32, #tpu.memory_space<any>>) target(%33 : memref<1x512xf32, #tpu.memory_space<vmem>>) target_semaphore(%arg4 : memref<!tpu.dma_semaphore, #tpu.memory_space<semaphore_mem>>)
    %c0_i32_20 = arith.constant 0 : i32
    %c16_i32 = arith.constant 16 : i32
    %34 = tpu.memref_slice %arg2[%arg0, %c16_i32, %1] : memref<2x64x512xf32, #tpu.memory_space<any>> -> memref<1x1x512xf32, #tpu.memory_space<any>>
    %35 = tpu.memref_squeeze %34 : memref<1x1x512xf32, #tpu.memory_space<any>> -> memref<1x512xf32, #tpu.memory_space<any>>
    %c8_i32_21 = arith.constant 8 : i32
    %c0_i32_22 = arith.constant 0 : i32
    %36 = tpu.memref_slice %arg3[%c0_i32_20, %c8_i32_21, %c0_i32_22] : memref<1x64x512xf32, #tpu.memory_space<vmem>> -> memref<1x1x512xf32, #tpu.memory_space<vmem>>
    %37 = tpu.memref_squeeze %36 : memref<1x1x512xf32, #tpu.memory_space<vmem>> -> memref<1x512xf32, #tpu.memory_space<vmem>>
    tpu.enqueue_dma source(%35 : memref<1x512xf32, #tpu.memory_space<any>>) target(%37 : memref<1x512xf32, #tpu.memory_space<vmem>>) target_semaphore(%arg4 : memref<!tpu.dma_semaphore, #tpu.memory_space<semaphore_mem>>)
    %c0_i32_23 = arith.constant 0 : i32
    %c18_i32 = arith.constant 18 : i32
    %38 = tpu.memref_slice %arg2[%arg0, %c18_i32, %1] : memref<2x64x512xf32, #tpu.memory_space<any>> -> memref<1x1x512xf32, #tpu.memory_space<any>>
    %39 = tpu.memref_squeeze %38 : memref<1x1x512xf32, #tpu.memory_space<any>> -> memref<1x512xf32, #tpu.memory_space<any>>
    %c9_i32 = arith.constant 9 : i32
    %c0_i32_24 = arith.constant 0 : i32
    %40 = tpu.memref_slice %arg3[%c0_i32_23, %c9_i32, %c0_i32_24] : memref<1x64x512xf32, #tpu.memory_space<vmem>> -> memref<1x1x512xf32, #tpu.memory_space<vmem>>
    %41 = tpu.memref_squeeze %40 : memref<1x1x512xf32, #tpu.memory_space<vmem>> -> memref<1x512xf32, #tpu.memory_space<vmem>>
    tpu.enqueue_dma source(%39 : memref<1x512xf32, #tpu.memory_space<any>>) target(%41 : memref<1x512xf32, #tpu.memory_space<vmem>>) target_semaphore(%arg4 : memref<!tpu.dma_semaphore, #tpu.memory_space<semaphore_mem>>)
    %c0_i32_25 = arith.constant 0 : i32
    %c20_i32 = arith.constant 20 : i32
    %42 = tpu.memref_slice %arg2[%arg0, %c20_i32, %1] : memref<2x64x512xf32, #tpu.memory_space<any>> -> memref<1x1x512xf32, #tpu.memory_space<any>>
    %43 = tpu.memref_squeeze %42 : memref<1x1x512xf32, #tpu.memory_space<any>> -> memref<1x512xf32, #tpu.memory_space<any>>
    %c10_i32_26 = arith.constant 10 : i32
    %c0_i32_27 = arith.constant 0 : i32
    %44 = tpu.memref_slice %arg3[%c0_i32_25, %c10_i32_26, %c0_i32_27] : memref<1x64x512xf32, #tpu.memory_space<vmem>> -> memref<1x1x512xf32, #tpu.memory_space<vmem>>
    %45 = tpu.memref_squeeze %44 : memref<1x1x512xf32, #tpu.memory_space<vmem>> -> memref<1x512xf32, #tpu.memory_space<vmem>>
    tpu.enqueue_dma source(%43 : memref<1x512xf32, #tpu.memory_space<any>>) target(%45 : memref<1x512xf32, #tpu.memory_space<vmem>>) target_semaphore(%arg4 : memref<!tpu.dma_semaphore, #tpu.memory_space<semaphore_mem>>)
    %c0_i32_28 = arith.constant 0 : i32
    %c22_i32 = arith.constant 22 : i32
    %46 = tpu.memref_slice %arg2[%arg0, %c22_i32, %1] : memref<2x64x512xf32, #tpu.memory_space<any>> -> memref<1x1x512xf32, #tpu.memory_space<any>>
    %47 = tpu.memref_squeeze %46 : memref<1x1x512xf32, #tpu.memory_space<any>> -> memref<1x512xf32, #tpu.memory_space<any>>
    %c11_i32 = arith.constant 11 : i32
    %c0_i32_29 = arith.constant 0 : i32
    %48 = tpu.memref_slice %arg3[%c0_i32_28, %c11_i32, %c0_i32_29] : memref<1x64x512xf32, #tpu.memory_space<vmem>> -> memref<1x1x512xf32, #tpu.memory_space<vmem>>
    %49 = tpu.memref_squeeze %48 : memref<1x1x512xf32, #tpu.memory_space<vmem>> -> memref<1x512xf32, #tpu.memory_space<vmem>>
    tpu.enqueue_dma source(%47 : memref<1x512xf32, #tpu.memory_space<any>>) target(%49 : memref<1x512xf32, #tpu.memory_space<vmem>>) target_semaphore(%arg4 : memref<!tpu.dma_semaphore, #tpu.memory_space<semaphore_mem>>)
    %c0_i32_30 = arith.constant 0 : i32
    %c24_i32 = arith.constant 24 : i32
    %50 = tpu.memref_slice %arg2[%arg0, %c24_i32, %1] : memref<2x64x512xf32, #tpu.memory_space<any>> -> memref<1x1x512xf32, #tpu.memory_space<any>>
    %51 = tpu.memref_squeeze %50 : memref<1x1x512xf32, #tpu.memory_space<any>> -> memref<1x512xf32, #tpu.memory_space<any>>
    %c12_i32_31 = arith.constant 12 : i32
    %c0_i32_32 = arith.constant 0 : i32
    %52 = tpu.memref_slice %arg3[%c0_i32_30, %c12_i32_31, %c0_i32_32] : memref<1x64x512xf32, #tpu.memory_space<vmem>> -> memref<1x1x512xf32, #tpu.memory_space<vmem>>
    %53 = tpu.memref_squeeze %52 : memref<1x1x512xf32, #tpu.memory_space<vmem>> -> memref<1x512xf32, #tpu.memory_space<vmem>>
    tpu.enqueue_dma source(%51 : memref<1x512xf32, #tpu.memory_space<any>>) target(%53 : memref<1x512xf32, #tpu.memory_space<vmem>>) target_semaphore(%arg4 : memref<!tpu.dma_semaphore, #tpu.memory_space<semaphore_mem>>)
    %c0_i32_33 = arith.constant 0 : i32
    %c26_i32 = arith.constant 26 : i32
    %54 = tpu.memref_slice %arg2[%arg0, %c26_i32, %1] : memref<2x64x512xf32, #tpu.memory_space<any>> -> memref<1x1x512xf32, #tpu.memory_space<any>>
    %55 = tpu.memref_squeeze %54 : memref<1x1x512xf32, #tpu.memory_space<any>> -> memref<1x512xf32, #tpu.memory_space<any>>
    %c13_i32 = arith.constant 13 : i32
    %c0_i32_34 = arith.constant 0 : i32
    %56 = tpu.memref_slice %arg3[%c0_i32_33, %c13_i32, %c0_i32_34] : memref<1x64x512xf32, #tpu.memory_space<vmem>> -> memref<1x1x512xf32, #tpu.memory_space<vmem>>
    %57 = tpu.memref_squeeze %56 : memref<1x1x512xf32, #tpu.memory_space<vmem>> -> memref<1x512xf32, #tpu.memory_space<vmem>>
    tpu.enqueue_dma source(%55 : memref<1x512xf32, #tpu.memory_space<any>>) target(%57 : memref<1x512xf32, #tpu.memory_space<vmem>>) target_semaphore(%arg4 : memref<!tpu.dma_semaphore, #tpu.memory_space<semaphore_mem>>)
    %c0_i32_35 = arith.constant 0 : i32
    %c28_i32 = arith.constant 28 : i32
    %58 = tpu.memref_slice %arg2[%arg0, %c28_i32, %1] : memref<2x64x512xf32, #tpu.memory_space<any>> -> memref<1x1x512xf32, #tpu.memory_space<any>>
    %59 = tpu.memref_squeeze %58 : memref<1x1x512xf32, #tpu.memory_space<any>> -> memref<1x512xf32, #tpu.memory_space<any>>
    %c14_i32_36 = arith.constant 14 : i32
    %c0_i32_37 = arith.constant 0 : i32
    %60 = tpu.memref_slice %arg3[%c0_i32_35, %c14_i32_36, %c0_i32_37] : memref<1x64x512xf32, #tpu.memory_space<vmem>> -> memref<1x1x512xf32, #tpu.memory_space<vmem>>
    %61 = tpu.memref_squeeze %60 : memref<1x1x512xf32, #tpu.memory_space<vmem>> -> memref<1x512xf32, #tpu.memory_space<vmem>>
    tpu.enqueue_dma source(%59 : memref<1x512xf32, #tpu.memory_space<any>>) target(%61 : memref<1x512xf32, #tpu.memory_space<vmem>>) target_semaphore(%arg4 : memref<!tpu.dma_semaphore, #tpu.memory_space<semaphore_mem>>)
    %c0_i32_38 = arith.constant 0 : i32
    %c30_i32 = arith.constant 30 : i32
    %62 = tpu.memref_slice %arg2[%arg0, %c30_i32, %1] : memref<2x64x512xf32, #tpu.memory_space<any>> -> memref<1x1x512xf32, #tpu.memory_space<any>>
    %63 = tpu.memref_squeeze %62 : memref<1x1x512xf32, #tpu.memory_space<any>> -> memref<1x512xf32, #tpu.memory_space<any>>
    %c15_i32 = arith.constant 15 : i32
    %c0_i32_39 = arith.constant 0 : i32
    %64 = tpu.memref_slice %arg3[%c0_i32_38, %c15_i32, %c0_i32_39] : memref<1x64x512xf32, #tpu.memory_space<vmem>> -> memref<1x1x512xf32, #tpu.memory_space<vmem>>
    %65 = tpu.memref_squeeze %64 : memref<1x1x512xf32, #tpu.memory_space<vmem>> -> memref<1x512xf32, #tpu.memory_space<vmem>>
    tpu.enqueue_dma source(%63 : memref<1x512xf32, #tpu.memory_space<any>>) target(%65 : memref<1x512xf32, #tpu.memory_space<vmem>>) target_semaphore(%arg4 : memref<!tpu.dma_semaphore, #tpu.memory_space<semaphore_mem>>)
    %c0_i32_40 = arith.constant 0 : i32
    %c32_i32 = arith.constant 32 : i32
    %66 = tpu.memref_slice %arg2[%arg0, %c32_i32, %1] : memref<2x64x512xf32, #tpu.memory_space<any>> -> memref<1x1x512xf32, #tpu.memory_space<any>>
    %67 = tpu.memref_squeeze %66 : memref<1x1x512xf32, #tpu.memory_space<any>> -> memref<1x512xf32, #tpu.memory_space<any>>
    %c16_i32_41 = arith.constant 16 : i32
    %c0_i32_42 = arith.constant 0 : i32
    %68 = tpu.memref_slice %arg3[%c0_i32_40, %c16_i32_41, %c0_i32_42] : memref<1x64x512xf32, #tpu.memory_space<vmem>> -> memref<1x1x512xf32, #tpu.memory_space<vmem>>
    %69 = tpu.memref_squeeze %68 : memref<1x1x512xf32, #tpu.memory_space<vmem>> -> memref<1x512xf32, #tpu.memory_space<vmem>>
    tpu.enqueue_dma source(%67 : memref<1x512xf32, #tpu.memory_space<any>>) target(%69 : memref<1x512xf32, #tpu.memory_space<vmem>>) target_semaphore(%arg4 : memref<!tpu.dma_semaphore, #tpu.memory_space<semaphore_mem>>)
    %c0_i32_43 = arith.constant 0 : i32
    %c34_i32 = arith.constant 34 : i32
    %70 = tpu.memref_slice %arg2[%arg0, %c34_i32, %1] : memref<2x64x512xf32, #tpu.memory_space<any>> -> memref<1x1x512xf32, #tpu.memory_space<any>>
    %71 = tpu.memref_squeeze %70 : memref<1x1x512xf32, #tpu.memory_space<any>> -> memref<1x512xf32, #tpu.memory_space<any>>
    %c17_i32 = arith.constant 17 : i32
    %c0_i32_44 = arith.constant 0 : i32
    %72 = tpu.memref_slice %arg3[%c0_i32_43, %c17_i32, %c0_i32_44] : memref<1x64x512xf32, #tpu.memory_space<vmem>> -> memref<1x1x512xf32, #tpu.memory_space<vmem>>
    %73 = tpu.memref_squeeze %72 : memref<1x1x512xf32, #tpu.memory_space<vmem>> -> memref<1x512xf32, #tpu.memory_space<vmem>>
    tpu.enqueue_dma source(%71 : memref<1x512xf32, #tpu.memory_space<any>>) target(%73 : memref<1x512xf32, #tpu.memory_space<vmem>>) target_semaphore(%arg4 : memref<!tpu.dma_semaphore, #tpu.memory_space<semaphore_mem>>)
    %c0_i32_45 = arith.constant 0 : i32
    %c36_i32 = arith.constant 36 : i32
    %74 = tpu.memref_slice %arg2[%arg0, %c36_i32, %1] : memref<2x64x512xf32, #tpu.memory_space<any>> -> memref<1x1x512xf32, #tpu.memory_space<any>>
    %75 = tpu.memref_squeeze %74 : memref<1x1x512xf32, #tpu.memory_space<any>> -> memref<1x512xf32, #tpu.memory_space<any>>
    %c18_i32_46 = arith.constant 18 : i32
    %c0_i32_47 = arith.constant 0 : i32
    %76 = tpu.memref_slice %arg3[%c0_i32_45, %c18_i32_46, %c0_i32_47] : memref<1x64x512xf32, #tpu.memory_space<vmem>> -> memref<1x1x512xf32, #tpu.memory_space<vmem>>
    %77 = tpu.memref_squeeze %76 : memref<1x1x512xf32, #tpu.memory_space<vmem>> -> memref<1x512xf32, #tpu.memory_space<vmem>>
    tpu.enqueue_dma source(%75 : memref<1x512xf32, #tpu.memory_space<any>>) target(%77 : memref<1x512xf32, #tpu.memory_space<vmem>>) target_semaphore(%arg4 : memref<!tpu.dma_semaphore, #tpu.memory_space<semaphore_mem>>)
    %c0_i32_48 = arith.constant 0 : i32
    %c38_i32 = arith.constant 38 : i32
    %78 = tpu.memref_slice %arg2[%arg0, %c38_i32, %1] : memref<2x64x512xf32, #tpu.memory_space<any>> -> memref<1x1x512xf32, #tpu.memory_space<any>>
    %79 = tpu.memref_squeeze %78 : memref<1x1x512xf32, #tpu.memory_space<any>> -> memref<1x512xf32, #tpu.memory_space<any>>
    %c19_i32 = arith.constant 19 : i32
    %c0_i32_49 = arith.constant 0 : i32
    %80 = tpu.memref_slice %arg3[%c0_i32_48, %c19_i32, %c0_i32_49] : memref<1x64x512xf32, #tpu.memory_space<vmem>> -> memref<1x1x512xf32, #tpu.memory_space<vmem>>
    %81 = tpu.memref_squeeze %80 : memref<1x1x512xf32, #tpu.memory_space<vmem>> -> memref<1x512xf32, #tpu.memory_space<vmem>>
    tpu.enqueue_dma source(%79 : memref<1x512xf32, #tpu.memory_space<any>>) target(%81 : memref<1x512xf32, #tpu.memory_space<vmem>>) target_semaphore(%arg4 : memref<!tpu.dma_semaphore, #tpu.memory_space<semaphore_mem>>)
    %c0_i32_50 = arith.constant 0 : i32
    %c40_i32 = arith.constant 40 : i32
    %82 = tpu.memref_slice %arg2[%arg0, %c40_i32, %1] : memref<2x64x512xf32, #tpu.memory_space<any>> -> memref<1x1x512xf32, #tpu.memory_space<any>>
    %83 = tpu.memref_squeeze %82 : memref<1x1x512xf32, #tpu.memory_space<any>> -> memref<1x512xf32, #tpu.memory_space<any>>
    %c20_i32_51 = arith.constant 20 : i32
    %c0_i32_52 = arith.constant 0 : i32
    %84 = tpu.memref_slice %arg3[%c0_i32_50, %c20_i32_51, %c0_i32_52] : memref<1x64x512xf32, #tpu.memory_space<vmem>> -> memref<1x1x512xf32, #tpu.memory_space<vmem>>
    %85 = tpu.memref_squeeze %84 : memref<1x1x512xf32, #tpu.memory_space<vmem>> -> memref<1x512xf32, #tpu.memory_space<vmem>>
    tpu.enqueue_dma source(%83 : memref<1x512xf32, #tpu.memory_space<any>>) target(%85 : memref<1x512xf32, #tpu.memory_space<vmem>>) target_semaphore(%arg4 : memref<!tpu.dma_semaphore, #tpu.memory_space<semaphore_mem>>)
    %c0_i32_53 = arith.constant 0 : i32
    %c42_i32 = arith.constant 42 : i32
    %86 = tpu.memref_slice %arg2[%arg0, %c42_i32, %1] : memref<2x64x512xf32, #tpu.memory_space<any>> -> memref<1x1x512xf32, #tpu.memory_space<any>>
    %87 = tpu.memref_squeeze %86 : memref<1x1x512xf32, #tpu.memory_space<any>> -> memref<1x512xf32, #tpu.memory_space<any>>
    %c21_i32 = arith.constant 21 : i32
    %c0_i32_54 = arith.constant 0 : i32
    %88 = tpu.memref_slice %arg3[%c0_i32_53, %c21_i32, %c0_i32_54] : memref<1x64x512xf32, #tpu.memory_space<vmem>> -> memref<1x1x512xf32, #tpu.memory_space<vmem>>
    %89 = tpu.memref_squeeze %88 : memref<1x1x512xf32, #tpu.memory_space<vmem>> -> memref<1x512xf32, #tpu.memory_space<vmem>>
    tpu.enqueue_dma source(%87 : memref<1x512xf32, #tpu.memory_space<any>>) target(%89 : memref<1x512xf32, #tpu.memory_space<vmem>>) target_semaphore(%arg4 : memref<!tpu.dma_semaphore, #tpu.memory_space<semaphore_mem>>)
    %c0_i32_55 = arith.constant 0 : i32
    %c44_i32 = arith.constant 44 : i32
    %90 = tpu.memref_slice %arg2[%arg0, %c44_i32, %1] : memref<2x64x512xf32, #tpu.memory_space<any>> -> memref<1x1x512xf32, #tpu.memory_space<any>>
    %91 = tpu.memref_squeeze %90 : memref<1x1x512xf32, #tpu.memory_space<any>> -> memref<1x512xf32, #tpu.memory_space<any>>
    %c22_i32_56 = arith.constant 22 : i32
    %c0_i32_57 = arith.constant 0 : i32
    %92 = tpu.memref_slice %arg3[%c0_i32_55, %c22_i32_56, %c0_i32_57] : memref<1x64x512xf32, #tpu.memory_space<vmem>> -> memref<1x1x512xf32, #tpu.memory_space<vmem>>
    %93 = tpu.memref_squeeze %92 : memref<1x1x512xf32, #tpu.memory_space<vmem>> -> memref<1x512xf32, #tpu.memory_space<vmem>>
    tpu.enqueue_dma source(%91 : memref<1x512xf32, #tpu.memory_space<any>>) target(%93 : memref<1x512xf32, #tpu.memory_space<vmem>>) target_semaphore(%arg4 : memref<!tpu.dma_semaphore, #tpu.memory_space<semaphore_mem>>)
    %c0_i32_58 = arith.constant 0 : i32
    %c46_i32 = arith.constant 46 : i32
    %94 = tpu.memref_slice %arg2[%arg0, %c46_i32, %1] : memref<2x64x512xf32, #tpu.memory_space<any>> -> memref<1x1x512xf32, #tpu.memory_space<any>>
    %95 = tpu.memref_squeeze %94 : memref<1x1x512xf32, #tpu.memory_space<any>> -> memref<1x512xf32, #tpu.memory_space<any>>
    %c23_i32 = arith.constant 23 : i32
    %c0_i32_59 = arith.constant 0 : i32
    %96 = tpu.memref_slice %arg3[%c0_i32_58, %c23_i32, %c0_i32_59] : memref<1x64x512xf32, #tpu.memory_space<vmem>> -> memref<1x1x512xf32, #tpu.memory_space<vmem>>
    %97 = tpu.memref_squeeze %96 : memref<1x1x512xf32, #tpu.memory_space<vmem>> -> memref<1x512xf32, #tpu.memory_space<vmem>>
    tpu.enqueue_dma source(%95 : memref<1x512xf32, #tpu.memory_space<any>>) target(%97 : memref<1x512xf32, #tpu.memory_space<vmem>>) target_semaphore(%arg4 : memref<!tpu.dma_semaphore, #tpu.memory_space<semaphore_mem>>)
    %c0_i32_60 = arith.constant 0 : i32
    %c48_i32 = arith.constant 48 : i32
    %98 = tpu.memref_slice %arg2[%arg0, %c48_i32, %1] : memref<2x64x512xf32, #tpu.memory_space<any>> -> memref<1x1x512xf32, #tpu.memory_space<any>>
    %99 = tpu.memref_squeeze %98 : memref<1x1x512xf32, #tpu.memory_space<any>> -> memref<1x512xf32, #tpu.memory_space<any>>
    %c24_i32_61 = arith.constant 24 : i32
    %c0_i32_62 = arith.constant 0 : i32
    %100 = tpu.memref_slice %arg3[%c0_i32_60, %c24_i32_61, %c0_i32_62] : memref<1x64x512xf32, #tpu.memory_space<vmem>> -> memref<1x1x512xf32, #tpu.memory_space<vmem>>
    %101 = tpu.memref_squeeze %100 : memref<1x1x512xf32, #tpu.memory_space<vmem>> -> memref<1x512xf32, #tpu.memory_space<vmem>>
    tpu.enqueue_dma source(%99 : memref<1x512xf32, #tpu.memory_space<any>>) target(%101 : memref<1x512xf32, #tpu.memory_space<vmem>>) target_semaphore(%arg4 : memref<!tpu.dma_semaphore, #tpu.memory_space<semaphore_mem>>)
    %c0_i32_63 = arith.constant 0 : i32
    %c50_i32 = arith.constant 50 : i32
    %102 = tpu.memref_slice %arg2[%arg0, %c50_i32, %1] : memref<2x64x512xf32, #tpu.memory_space<any>> -> memref<1x1x512xf32, #tpu.memory_space<any>>
    %103 = tpu.memref_squeeze %102 : memref<1x1x512xf32, #tpu.memory_space<any>> -> memref<1x512xf32, #tpu.memory_space<any>>
    %c25_i32 = arith.constant 25 : i32
    %c0_i32_64 = arith.constant 0 : i32
    %104 = tpu.memref_slice %arg3[%c0_i32_63, %c25_i32, %c0_i32_64] : memref<1x64x512xf32, #tpu.memory_space<vmem>> -> memref<1x1x512xf32, #tpu.memory_space<vmem>>
    %105 = tpu.memref_squeeze %104 : memref<1x1x512xf32, #tpu.memory_space<vmem>> -> memref<1x512xf32, #tpu.memory_space<vmem>>
    tpu.enqueue_dma source(%103 : memref<1x512xf32, #tpu.memory_space<any>>) target(%105 : memref<1x512xf32, #tpu.memory_space<vmem>>) target_semaphore(%arg4 : memref<!tpu.dma_semaphore, #tpu.memory_space<semaphore_mem>>)
    %c0_i32_65 = arith.constant 0 : i32
    %c52_i32 = arith.constant 52 : i32
    %106 = tpu.memref_slice %arg2[%arg0, %c52_i32, %1] : memref<2x64x512xf32, #tpu.memory_space<any>> -> memref<1x1x512xf32, #tpu.memory_space<any>>
    %107 = tpu.memref_squeeze %106 : memref<1x1x512xf32, #tpu.memory_space<any>> -> memref<1x512xf32, #tpu.memory_space<any>>
    %c26_i32_66 = arith.constant 26 : i32
    %c0_i32_67 = arith.constant 0 : i32
    %108 = tpu.memref_slice %arg3[%c0_i32_65, %c26_i32_66, %c0_i32_67] : memref<1x64x512xf32, #tpu.memory_space<vmem>> -> memref<1x1x512xf32, #tpu.memory_space<vmem>>
    %109 = tpu.memref_squeeze %108 : memref<1x1x512xf32, #tpu.memory_space<vmem>> -> memref<1x512xf32, #tpu.memory_space<vmem>>
    tpu.enqueue_dma source(%107 : memref<1x512xf32, #tpu.memory_space<any>>) target(%109 : memref<1x512xf32, #tpu.memory_space<vmem>>) target_semaphore(%arg4 : memref<!tpu.dma_semaphore, #tpu.memory_space<semaphore_mem>>)
    %c0_i32_68 = arith.constant 0 : i32
    %c54_i32 = arith.constant 54 : i32
    %110 = tpu.memref_slice %arg2[%arg0, %c54_i32, %1] : memref<2x64x512xf32, #tpu.memory_space<any>> -> memref<1x1x512xf32, #tpu.memory_space<any>>
    %111 = tpu.memref_squeeze %110 : memref<1x1x512xf32, #tpu.memory_space<any>> -> memref<1x512xf32, #tpu.memory_space<any>>
    %c27_i32 = arith.constant 27 : i32
    %c0_i32_69 = arith.constant 0 : i32
    %112 = tpu.memref_slice %arg3[%c0_i32_68, %c27_i32, %c0_i32_69] : memref<1x64x512xf32, #tpu.memory_space<vmem>> -> memref<1x1x512xf32, #tpu.memory_space<vmem>>
    %113 = tpu.memref_squeeze %112 : memref<1x1x512xf32, #tpu.memory_space<vmem>> -> memref<1x512xf32, #tpu.memory_space<vmem>>
    tpu.enqueue_dma source(%111 : memref<1x512xf32, #tpu.memory_space<any>>) target(%113 : memref<1x512xf32, #tpu.memory_space<vmem>>) target_semaphore(%arg4 : memref<!tpu.dma_semaphore, #tpu.memory_space<semaphore_mem>>)
    %c0_i32_70 = arith.constant 0 : i32
    %c56_i32 = arith.constant 56 : i32
    %114 = tpu.memref_slice %arg2[%arg0, %c56_i32, %1] : memref<2x64x512xf32, #tpu.memory_space<any>> -> memref<1x1x512xf32, #tpu.memory_space<any>>
    %115 = tpu.memref_squeeze %114 : memref<1x1x512xf32, #tpu.memory_space<any>> -> memref<1x512xf32, #tpu.memory_space<any>>
    %c28_i32_71 = arith.constant 28 : i32
    %c0_i32_72 = arith.constant 0 : i32
    %116 = tpu.memref_slice %arg3[%c0_i32_70, %c28_i32_71, %c0_i32_72] : memref<1x64x512xf32, #tpu.memory_space<vmem>> -> memref<1x1x512xf32, #tpu.memory_space<vmem>>
    %117 = tpu.memref_squeeze %116 : memref<1x1x512xf32, #tpu.memory_space<vmem>> -> memref<1x512xf32, #tpu.memory_space<vmem>>
    tpu.enqueue_dma source(%115 : memref<1x512xf32, #tpu.memory_space<any>>) target(%117 : memref<1x512xf32, #tpu.memory_space<vmem>>) target_semaphore(%arg4 : memref<!tpu.dma_semaphore, #tpu.memory_space<semaphore_mem>>)
    %c0_i32_73 = arith.constant 0 : i32
    %c58_i32 = arith.constant 58 : i32
    %118 = tpu.memref_slice %arg2[%arg0, %c58_i32, %1] : memref<2x64x512xf32, #tpu.memory_space<any>> -> memref<1x1x512xf32, #tpu.memory_space<any>>
    %119 = tpu.memref_squeeze %118 : memref<1x1x512xf32, #tpu.memory_space<any>> -> memref<1x512xf32, #tpu.memory_space<any>>
    %c29_i32 = arith.constant 29 : i32
    %c0_i32_74 = arith.constant 0 : i32
    %120 = tpu.memref_slice %arg3[%c0_i32_73, %c29_i32, %c0_i32_74] : memref<1x64x512xf32, #tpu.memory_space<vmem>> -> memref<1x1x512xf32, #tpu.memory_space<vmem>>
    %121 = tpu.memref_squeeze %120 : memref<1x1x512xf32, #tpu.memory_space<vmem>> -> memref<1x512xf32, #tpu.memory_space<vmem>>
    tpu.enqueue_dma source(%119 : memref<1x512xf32, #tpu.memory_space<any>>) target(%121 : memref<1x512xf32, #tpu.memory_space<vmem>>) target_semaphore(%arg4 : memref<!tpu.dma_semaphore, #tpu.memory_space<semaphore_mem>>)
    %c0_i32_75 = arith.constant 0 : i32
    %c60_i32 = arith.constant 60 : i32
    %122 = tpu.memref_slice %arg2[%arg0, %c60_i32, %1] : memref<2x64x512xf32, #tpu.memory_space<any>> -> memref<1x1x512xf32, #tpu.memory_space<any>>
    %123 = tpu.memref_squeeze %122 : memref<1x1x512xf32, #tpu.memory_space<any>> -> memref<1x512xf32, #tpu.memory_space<any>>
    %c30_i32_76 = arith.constant 30 : i32
    %c0_i32_77 = arith.constant 0 : i32
    %124 = tpu.memref_slice %arg3[%c0_i32_75, %c30_i32_76, %c0_i32_77] : memref<1x64x512xf32, #tpu.memory_space<vmem>> -> memref<1x1x512xf32, #tpu.memory_space<vmem>>
    %125 = tpu.memref_squeeze %124 : memref<1x1x512xf32, #tpu.memory_space<vmem>> -> memref<1x512xf32, #tpu.memory_space<vmem>>
    tpu.enqueue_dma source(%123 : memref<1x512xf32, #tpu.memory_space<any>>) target(%125 : memref<1x512xf32, #tpu.memory_space<vmem>>) target_semaphore(%arg4 : memref<!tpu.dma_semaphore, #tpu.memory_space<semaphore_mem>>)
    %c0_i32_78 = arith.constant 0 : i32
    %c62_i32 = arith.constant 62 : i32
    %126 = tpu.memref_slice %arg2[%arg0, %c62_i32, %1] : memref<2x64x512xf32, #tpu.memory_space<any>> -> memref<1x1x512xf32, #tpu.memory_space<any>>
    %127 = tpu.memref_squeeze %126 : memref<1x1x512xf32, #tpu.memory_space<any>> -> memref<1x512xf32, #tpu.memory_space<any>>
    %c31_i32 = arith.constant 31 : i32
    %c0_i32_79 = arith.constant 0 : i32
    %128 = tpu.memref_slice %arg3[%c0_i32_78, %c31_i32, %c0_i32_79] : memref<1x64x512xf32, #tpu.memory_space<vmem>> -> memref<1x1x512xf32, #tpu.memory_space<vmem>>
    %129 = tpu.memref_squeeze %128 : memref<1x1x512xf32, #tpu.memory_space<vmem>> -> memref<1x512xf32, #tpu.memory_space<vmem>>
    tpu.enqueue_dma source(%127 : memref<1x512xf32, #tpu.memory_space<any>>) target(%129 : memref<1x512xf32, #tpu.memory_space<vmem>>) target_semaphore(%arg4 : memref<!tpu.dma_semaphore, #tpu.memory_space<semaphore_mem>>)
    %c0_i32_80 = arith.constant 0 : i32
    %c1_i32_81 = arith.constant 1 : i32
    %130 = tpu.memref_slice %arg2[%arg0, %c1_i32_81, %1] : memref<2x64x512xf32, #tpu.memory_space<any>> -> memref<1x1x512xf32, #tpu.memory_space<any>>
    %131 = tpu.memref_squeeze %130 : memref<1x1x512xf32, #tpu.memory_space<any>> -> memref<1x512xf32, #tpu.memory_space<any>>
    %c32_i32_82 = arith.constant 32 : i32
    %c0_i32_83 = arith.constant 0 : i32
    %132 = tpu.memref_slice %arg3[%c0_i32_80, %c32_i32_82, %c0_i32_83] : memref<1x64x512xf32, #tpu.memory_space<vmem>> -> memref<1x1x512xf32, #tpu.memory_space<vmem>>
    %133 = tpu.memref_squeeze %132 : memref<1x1x512xf32, #tpu.memory_space<vmem>> -> memref<1x512xf32, #tpu.memory_space<vmem>>
    tpu.enqueue_dma source(%131 : memref<1x512xf32, #tpu.memory_space<any>>) target(%133 : memref<1x512xf32, #tpu.memory_space<vmem>>) target_semaphore(%arg4 : memref<!tpu.dma_semaphore, #tpu.memory_space<semaphore_mem>>)
    %c0_i32_84 = arith.constant 0 : i32
    %c3_i32_85 = arith.constant 3 : i32
    %134 = tpu.memref_slice %arg2[%arg0, %c3_i32_85, %1] : memref<2x64x512xf32, #tpu.memory_space<any>> -> memref<1x1x512xf32, #tpu.memory_space<any>>
    %135 = tpu.memref_squeeze %134 : memref<1x1x512xf32, #tpu.memory_space<any>> -> memref<1x512xf32, #tpu.memory_space<any>>
    %c33_i32 = arith.constant 33 : i32
    %c0_i32_86 = arith.constant 0 : i32
    %136 = tpu.memref_slice %arg3[%c0_i32_84, %c33_i32, %c0_i32_86] : memref<1x64x512xf32, #tpu.memory_space<vmem>> -> memref<1x1x512xf32, #tpu.memory_space<vmem>>
    %137 = tpu.memref_squeeze %136 : memref<1x1x512xf32, #tpu.memory_space<vmem>> -> memref<1x512xf32, #tpu.memory_space<vmem>>
    tpu.enqueue_dma source(%135 : memref<1x512xf32, #tpu.memory_space<any>>) target(%137 : memref<1x512xf32, #tpu.memory_space<vmem>>) target_semaphore(%arg4 : memref<!tpu.dma_semaphore, #tpu.memory_space<semaphore_mem>>)
    %c0_i32_87 = arith.constant 0 : i32
    %c5_i32_88 = arith.constant 5 : i32
    %138 = tpu.memref_slice %arg2[%arg0, %c5_i32_88, %1] : memref<2x64x512xf32, #tpu.memory_space<any>> -> memref<1x1x512xf32, #tpu.memory_space<any>>
    %139 = tpu.memref_squeeze %138 : memref<1x1x512xf32, #tpu.memory_space<any>> -> memref<1x512xf32, #tpu.memory_space<any>>
    %c34_i32_89 = arith.constant 34 : i32
    %c0_i32_90 = arith.constant 0 : i32
    %140 = tpu.memref_slice %arg3[%c0_i32_87, %c34_i32_89, %c0_i32_90] : memref<1x64x512xf32, #tpu.memory_space<vmem>> -> memref<1x1x512xf32, #tpu.memory_space<vmem>>
    %141 = tpu.memref_squeeze %140 : memref<1x1x512xf32, #tpu.memory_space<vmem>> -> memref<1x512xf32, #tpu.memory_space<vmem>>
    tpu.enqueue_dma source(%139 : memref<1x512xf32, #tpu.memory_space<any>>) target(%141 : memref<1x512xf32, #tpu.memory_space<vmem>>) target_semaphore(%arg4 : memref<!tpu.dma_semaphore, #tpu.memory_space<semaphore_mem>>)
    %c0_i32_91 = arith.constant 0 : i32
    %c7_i32_92 = arith.constant 7 : i32
    %142 = tpu.memref_slice %arg2[%arg0, %c7_i32_92, %1] : memref<2x64x512xf32, #tpu.memory_space<any>> -> memref<1x1x512xf32, #tpu.memory_space<any>>
    %143 = tpu.memref_squeeze %142 : memref<1x1x512xf32, #tpu.memory_space<any>> -> memref<1x512xf32, #tpu.memory_space<any>>
    %c35_i32 = arith.constant 35 : i32
    %c0_i32_93 = arith.constant 0 : i32
    %144 = tpu.memref_slice %arg3[%c0_i32_91, %c35_i32, %c0_i32_93] : memref<1x64x512xf32, #tpu.memory_space<vmem>> -> memref<1x1x512xf32, #tpu.memory_space<vmem>>
    %145 = tpu.memref_squeeze %144 : memref<1x1x512xf32, #tpu.memory_space<vmem>> -> memref<1x512xf32, #tpu.memory_space<vmem>>
    tpu.enqueue_dma source(%143 : memref<1x512xf32, #tpu.memory_space<any>>) target(%145 : memref<1x512xf32, #tpu.memory_space<vmem>>) target_semaphore(%arg4 : memref<!tpu.dma_semaphore, #tpu.memory_space<semaphore_mem>>)
    %c0_i32_94 = arith.constant 0 : i32
    %c9_i32_95 = arith.constant 9 : i32
    %146 = tpu.memref_slice %arg2[%arg0, %c9_i32_95, %1] : memref<2x64x512xf32, #tpu.memory_space<any>> -> memref<1x1x512xf32, #tpu.memory_space<any>>
    %147 = tpu.memref_squeeze %146 : memref<1x1x512xf32, #tpu.memory_space<any>> -> memref<1x512xf32, #tpu.memory_space<any>>
    %c36_i32_96 = arith.constant 36 : i32
    %c0_i32_97 = arith.constant 0 : i32
    %148 = tpu.memref_slice %arg3[%c0_i32_94, %c36_i32_96, %c0_i32_97] : memref<1x64x512xf32, #tpu.memory_space<vmem>> -> memref<1x1x512xf32, #tpu.memory_space<vmem>>
    %149 = tpu.memref_squeeze %148 : memref<1x1x512xf32, #tpu.memory_space<vmem>> -> memref<1x512xf32, #tpu.memory_space<vmem>>
    tpu.enqueue_dma source(%147 : memref<1x512xf32, #tpu.memory_space<any>>) target(%149 : memref<1x512xf32, #tpu.memory_space<vmem>>) target_semaphore(%arg4 : memref<!tpu.dma_semaphore, #tpu.memory_space<semaphore_mem>>)
    %c0_i32_98 = arith.constant 0 : i32
    %c11_i32_99 = arith.constant 11 : i32
    %150 = tpu.memref_slice %arg2[%arg0, %c11_i32_99, %1] : memref<2x64x512xf32, #tpu.memory_space<any>> -> memref<1x1x512xf32, #tpu.memory_space<any>>
    %151 = tpu.memref_squeeze %150 : memref<1x1x512xf32, #tpu.memory_space<any>> -> memref<1x512xf32, #tpu.memory_space<any>>
    %c37_i32 = arith.constant 37 : i32
    %c0_i32_100 = arith.constant 0 : i32
    %152 = tpu.memref_slice %arg3[%c0_i32_98, %c37_i32, %c0_i32_100] : memref<1x64x512xf32, #tpu.memory_space<vmem>> -> memref<1x1x512xf32, #tpu.memory_space<vmem>>
    %153 = tpu.memref_squeeze %152 : memref<1x1x512xf32, #tpu.memory_space<vmem>> -> memref<1x512xf32, #tpu.memory_space<vmem>>
    tpu.enqueue_dma source(%151 : memref<1x512xf32, #tpu.memory_space<any>>) target(%153 : memref<1x512xf32, #tpu.memory_space<vmem>>) target_semaphore(%arg4 : memref<!tpu.dma_semaphore, #tpu.memory_space<semaphore_mem>>)
    %c0_i32_101 = arith.constant 0 : i32
    %c13_i32_102 = arith.constant 13 : i32
    %154 = tpu.memref_slice %arg2[%arg0, %c13_i32_102, %1] : memref<2x64x512xf32, #tpu.memory_space<any>> -> memref<1x1x512xf32, #tpu.memory_space<any>>
    %155 = tpu.memref_squeeze %154 : memref<1x1x512xf32, #tpu.memory_space<any>> -> memref<1x512xf32, #tpu.memory_space<any>>
    %c38_i32_103 = arith.constant 38 : i32
    %c0_i32_104 = arith.constant 0 : i32
    %156 = tpu.memref_slice %arg3[%c0_i32_101, %c38_i32_103, %c0_i32_104] : memref<1x64x512xf32, #tpu.memory_space<vmem>> -> memref<1x1x512xf32, #tpu.memory_space<vmem>>
    %157 = tpu.memref_squeeze %156 : memref<1x1x512xf32, #tpu.memory_space<vmem>> -> memref<1x512xf32, #tpu.memory_space<vmem>>
    tpu.enqueue_dma source(%155 : memref<1x512xf32, #tpu.memory_space<any>>) target(%157 : memref<1x512xf32, #tpu.memory_space<vmem>>) target_semaphore(%arg4 : memref<!tpu.dma_semaphore, #tpu.memory_space<semaphore_mem>>)
    %c0_i32_105 = arith.constant 0 : i32
    %c15_i32_106 = arith.constant 15 : i32
    %158 = tpu.memref_slice %arg2[%arg0, %c15_i32_106, %1] : memref<2x64x512xf32, #tpu.memory_space<any>> -> memref<1x1x512xf32, #tpu.memory_space<any>>
    %159 = tpu.memref_squeeze %158 : memref<1x1x512xf32, #tpu.memory_space<any>> -> memref<1x512xf32, #tpu.memory_space<any>>
    %c39_i32 = arith.constant 39 : i32
    %c0_i32_107 = arith.constant 0 : i32
    %160 = tpu.memref_slice %arg3[%c0_i32_105, %c39_i32, %c0_i32_107] : memref<1x64x512xf32, #tpu.memory_space<vmem>> -> memref<1x1x512xf32, #tpu.memory_space<vmem>>
    %161 = tpu.memref_squeeze %160 : memref<1x1x512xf32, #tpu.memory_space<vmem>> -> memref<1x512xf32, #tpu.memory_space<vmem>>
    tpu.enqueue_dma source(%159 : memref<1x512xf32, #tpu.memory_space<any>>) target(%161 : memref<1x512xf32, #tpu.memory_space<vmem>>) target_semaphore(%arg4 : memref<!tpu.dma_semaphore, #tpu.memory_space<semaphore_mem>>)
    %c0_i32_108 = arith.constant 0 : i32
    %c17_i32_109 = arith.constant 17 : i32
    %162 = tpu.memref_slice %arg2[%arg0, %c17_i32_109, %1] : memref<2x64x512xf32, #tpu.memory_space<any>> -> memref<1x1x512xf32, #tpu.memory_space<any>>
    %163 = tpu.memref_squeeze %162 : memref<1x1x512xf32, #tpu.memory_space<any>> -> memref<1x512xf32, #tpu.memory_space<any>>
    %c40_i32_110 = arith.constant 40 : i32
    %c0_i32_111 = arith.constant 0 : i32
    %164 = tpu.memref_slice %arg3[%c0_i32_108, %c40_i32_110, %c0_i32_111] : memref<1x64x512xf32, #tpu.memory_space<vmem>> -> memref<1x1x512xf32, #tpu.memory_space<vmem>>
    %165 = tpu.memref_squeeze %164 : memref<1x1x512xf32, #tpu.memory_space<vmem>> -> memref<1x512xf32, #tpu.memory_space<vmem>>
    tpu.enqueue_dma source(%163 : memref<1x512xf32, #tpu.memory_space<any>>) target(%165 : memref<1x512xf32, #tpu.memory_space<vmem>>) target_semaphore(%arg4 : memref<!tpu.dma_semaphore, #tpu.memory_space<semaphore_mem>>)
    %c0_i32_112 = arith.constant 0 : i32
    %c19_i32_113 = arith.constant 19 : i32
    %166 = tpu.memref_slice %arg2[%arg0, %c19_i32_113, %1] : memref<2x64x512xf32, #tpu.memory_space<any>> -> memref<1x1x512xf32, #tpu.memory_space<any>>
    %167 = tpu.memref_squeeze %166 : memref<1x1x512xf32, #tpu.memory_space<any>> -> memref<1x512xf32, #tpu.memory_space<any>>
    %c41_i32 = arith.constant 41 : i32
    %c0_i32_114 = arith.constant 0 : i32
    %168 = tpu.memref_slice %arg3[%c0_i32_112, %c41_i32, %c0_i32_114] : memref<1x64x512xf32, #tpu.memory_space<vmem>> -> memref<1x1x512xf32, #tpu.memory_space<vmem>>
    %169 = tpu.memref_squeeze %168 : memref<1x1x512xf32, #tpu.memory_space<vmem>> -> memref<1x512xf32, #tpu.memory_space<vmem>>
    tpu.enqueue_dma source(%167 : memref<1x512xf32, #tpu.memory_space<any>>) target(%169 : memref<1x512xf32, #tpu.memory_space<vmem>>) target_semaphore(%arg4 : memref<!tpu.dma_semaphore, #tpu.memory_space<semaphore_mem>>)
    %c0_i32_115 = arith.constant 0 : i32
    %c21_i32_116 = arith.constant 21 : i32
    %170 = tpu.memref_slice %arg2[%arg0, %c21_i32_116, %1] : memref<2x64x512xf32, #tpu.memory_space<any>> -> memref<1x1x512xf32, #tpu.memory_space<any>>
    %171 = tpu.memref_squeeze %170 : memref<1x1x512xf32, #tpu.memory_space<any>> -> memref<1x512xf32, #tpu.memory_space<any>>
    %c42_i32_117 = arith.constant 42 : i32
    %c0_i32_118 = arith.constant 0 : i32
    %172 = tpu.memref_slice %arg3[%c0_i32_115, %c42_i32_117, %c0_i32_118] : memref<1x64x512xf32, #tpu.memory_space<vmem>> -> memref<1x1x512xf32, #tpu.memory_space<vmem>>
    %173 = tpu.memref_squeeze %172 : memref<1x1x512xf32, #tpu.memory_space<vmem>> -> memref<1x512xf32, #tpu.memory_space<vmem>>
    tpu.enqueue_dma source(%171 : memref<1x512xf32, #tpu.memory_space<any>>) target(%173 : memref<1x512xf32, #tpu.memory_space<vmem>>) target_semaphore(%arg4 : memref<!tpu.dma_semaphore, #tpu.memory_space<semaphore_mem>>)
    %c0_i32_119 = arith.constant 0 : i32
    %c23_i32_120 = arith.constant 23 : i32
    %174 = tpu.memref_slice %arg2[%arg0, %c23_i32_120, %1] : memref<2x64x512xf32, #tpu.memory_space<any>> -> memref<1x1x512xf32, #tpu.memory_space<any>>
    %175 = tpu.memref_squeeze %174 : memref<1x1x512xf32, #tpu.memory_space<any>> -> memref<1x512xf32, #tpu.memory_space<any>>
    %c43_i32 = arith.constant 43 : i32
    %c0_i32_121 = arith.constant 0 : i32
    %176 = tpu.memref_slice %arg3[%c0_i32_119, %c43_i32, %c0_i32_121] : memref<1x64x512xf32, #tpu.memory_space<vmem>> -> memref<1x1x512xf32, #tpu.memory_space<vmem>>
    %177 = tpu.memref_squeeze %176 : memref<1x1x512xf32, #tpu.memory_space<vmem>> -> memref<1x512xf32, #tpu.memory_space<vmem>>
    tpu.enqueue_dma source(%175 : memref<1x512xf32, #tpu.memory_space<any>>) target(%177 : memref<1x512xf32, #tpu.memory_space<vmem>>) target_semaphore(%arg4 : memref<!tpu.dma_semaphore, #tpu.memory_space<semaphore_mem>>)
    %c0_i32_122 = arith.constant 0 : i32
    %c25_i32_123 = arith.constant 25 : i32
    %178 = tpu.memref_slice %arg2[%arg0, %c25_i32_123, %1] : memref<2x64x512xf32, #tpu.memory_space<any>> -> memref<1x1x512xf32, #tpu.memory_space<any>>
    %179 = tpu.memref_squeeze %178 : memref<1x1x512xf32, #tpu.memory_space<any>> -> memref<1x512xf32, #tpu.memory_space<any>>
    %c44_i32_124 = arith.constant 44 : i32
    %c0_i32_125 = arith.constant 0 : i32
    %180 = tpu.memref_slice %arg3[%c0_i32_122, %c44_i32_124, %c0_i32_125] : memref<1x64x512xf32, #tpu.memory_space<vmem>> -> memref<1x1x512xf32, #tpu.memory_space<vmem>>
    %181 = tpu.memref_squeeze %180 : memref<1x1x512xf32, #tpu.memory_space<vmem>> -> memref<1x512xf32, #tpu.memory_space<vmem>>
    tpu.enqueue_dma source(%179 : memref<1x512xf32, #tpu.memory_space<any>>) target(%181 : memref<1x512xf32, #tpu.memory_space<vmem>>) target_semaphore(%arg4 : memref<!tpu.dma_semaphore, #tpu.memory_space<semaphore_mem>>)
    %c0_i32_126 = arith.constant 0 : i32
    %c27_i32_127 = arith.constant 27 : i32
    %182 = tpu.memref_slice %arg2[%arg0, %c27_i32_127, %1] : memref<2x64x512xf32, #tpu.memory_space<any>> -> memref<1x1x512xf32, #tpu.memory_space<any>>
    %183 = tpu.memref_squeeze %182 : memref<1x1x512xf32, #tpu.memory_space<any>> -> memref<1x512xf32, #tpu.memory_space<any>>
    %c45_i32 = arith.constant 45 : i32
    %c0_i32_128 = arith.constant 0 : i32
    %184 = tpu.memref_slice %arg3[%c0_i32_126, %c45_i32, %c0_i32_128] : memref<1x64x512xf32, #tpu.memory_space<vmem>> -> memref<1x1x512xf32, #tpu.memory_space<vmem>>
    %185 = tpu.memref_squeeze %184 : memref<1x1x512xf32, #tpu.memory_space<vmem>> -> memref<1x512xf32, #tpu.memory_space<vmem>>
    tpu.enqueue_dma source(%183 : memref<1x512xf32, #tpu.memory_space<any>>) target(%185 : memref<1x512xf32, #tpu.memory_space<vmem>>) target_semaphore(%arg4 : memref<!tpu.dma_semaphore, #tpu.memory_space<semaphore_mem>>)
    %c0_i32_129 = arith.constant 0 : i32
    %c29_i32_130 = arith.constant 29 : i32
    %186 = tpu.memref_slice %arg2[%arg0, %c29_i32_130, %1] : memref<2x64x512xf32, #tpu.memory_space<any>> -> memref<1x1x512xf32, #tpu.memory_space<any>>
    %187 = tpu.memref_squeeze %186 : memref<1x1x512xf32, #tpu.memory_space<any>> -> memref<1x512xf32, #tpu.memory_space<any>>
    %c46_i32_131 = arith.constant 46 : i32
    %c0_i32_132 = arith.constant 0 : i32
    %188 = tpu.memref_slice %arg3[%c0_i32_129, %c46_i32_131, %c0_i32_132] : memref<1x64x512xf32, #tpu.memory_space<vmem>> -> memref<1x1x512xf32, #tpu.memory_space<vmem>>
    %189 = tpu.memref_squeeze %188 : memref<1x1x512xf32, #tpu.memory_space<vmem>> -> memref<1x512xf32, #tpu.memory_space<vmem>>
    tpu.enqueue_dma source(%187 : memref<1x512xf32, #tpu.memory_space<any>>) target(%189 : memref<1x512xf32, #tpu.memory_space<vmem>>) target_semaphore(%arg4 : memref<!tpu.dma_semaphore, #tpu.memory_space<semaphore_mem>>)
    %c0_i32_133 = arith.constant 0 : i32
    %c31_i32_134 = arith.constant 31 : i32
    %190 = tpu.memref_slice %arg2[%arg0, %c31_i32_134, %1] : memref<2x64x512xf32, #tpu.memory_space<any>> -> memref<1x1x512xf32, #tpu.memory_space<any>>
    %191 = tpu.memref_squeeze %190 : memref<1x1x512xf32, #tpu.memory_space<any>> -> memref<1x512xf32, #tpu.memory_space<any>>
    %c47_i32 = arith.constant 47 : i32
    %c0_i32_135 = arith.constant 0 : i32
    %192 = tpu.memref_slice %arg3[%c0_i32_133, %c47_i32, %c0_i32_135] : memref<1x64x512xf32, #tpu.memory_space<vmem>> -> memref<1x1x512xf32, #tpu.memory_space<vmem>>
    %193 = tpu.memref_squeeze %192 : memref<1x1x512xf32, #tpu.memory_space<vmem>> -> memref<1x512xf32, #tpu.memory_space<vmem>>
    tpu.enqueue_dma source(%191 : memref<1x512xf32, #tpu.memory_space<any>>) target(%193 : memref<1x512xf32, #tpu.memory_space<vmem>>) target_semaphore(%arg4 : memref<!tpu.dma_semaphore, #tpu.memory_space<semaphore_mem>>)
    %c0_i32_136 = arith.constant 0 : i32
    %c33_i32_137 = arith.constant 33 : i32
    %194 = tpu.memref_slice %arg2[%arg0, %c33_i32_137, %1] : memref<2x64x512xf32, #tpu.memory_space<any>> -> memref<1x1x512xf32, #tpu.memory_space<any>>
    %195 = tpu.memref_squeeze %194 : memref<1x1x512xf32, #tpu.memory_space<any>> -> memref<1x512xf32, #tpu.memory_space<any>>
    %c48_i32_138 = arith.constant 48 : i32
    %c0_i32_139 = arith.constant 0 : i32
    %196 = tpu.memref_slice %arg3[%c0_i32_136, %c48_i32_138, %c0_i32_139] : memref<1x64x512xf32, #tpu.memory_space<vmem>> -> memref<1x1x512xf32, #tpu.memory_space<vmem>>
    %197 = tpu.memref_squeeze %196 : memref<1x1x512xf32, #tpu.memory_space<vmem>> -> memref<1x512xf32, #tpu.memory_space<vmem>>
    tpu.enqueue_dma source(%195 : memref<1x512xf32, #tpu.memory_space<any>>) target(%197 : memref<1x512xf32, #tpu.memory_space<vmem>>) target_semaphore(%arg4 : memref<!tpu.dma_semaphore, #tpu.memory_space<semaphore_mem>>)
    %c0_i32_140 = arith.constant 0 : i32
    %c35_i32_141 = arith.constant 35 : i32
    %198 = tpu.memref_slice %arg2[%arg0, %c35_i32_141, %1] : memref<2x64x512xf32, #tpu.memory_space<any>> -> memref<1x1x512xf32, #tpu.memory_space<any>>
    %199 = tpu.memref_squeeze %198 : memref<1x1x512xf32, #tpu.memory_space<any>> -> memref<1x512xf32, #tpu.memory_space<any>>
    %c49_i32 = arith.constant 49 : i32
    %c0_i32_142 = arith.constant 0 : i32
    %200 = tpu.memref_slice %arg3[%c0_i32_140, %c49_i32, %c0_i32_142] : memref<1x64x512xf32, #tpu.memory_space<vmem>> -> memref<1x1x512xf32, #tpu.memory_space<vmem>>
    %201 = tpu.memref_squeeze %200 : memref<1x1x512xf32, #tpu.memory_space<vmem>> -> memref<1x512xf32, #tpu.memory_space<vmem>>
    tpu.enqueue_dma source(%199 : memref<1x512xf32, #tpu.memory_space<any>>) target(%201 : memref<1x512xf32, #tpu.memory_space<vmem>>) target_semaphore(%arg4 : memref<!tpu.dma_semaphore, #tpu.memory_space<semaphore_mem>>)
    %c0_i32_143 = arith.constant 0 : i32
    %c37_i32_144 = arith.constant 37 : i32
    %202 = tpu.memref_slice %arg2[%arg0, %c37_i32_144, %1] : memref<2x64x512xf32, #tpu.memory_space<any>> -> memref<1x1x512xf32, #tpu.memory_space<any>>
    %203 = tpu.memref_squeeze %202 : memref<1x1x512xf32, #tpu.memory_space<any>> -> memref<1x512xf32, #tpu.memory_space<any>>
    %c50_i32_145 = arith.constant 50 : i32
    %c0_i32_146 = arith.constant 0 : i32
    %204 = tpu.memref_slice %arg3[%c0_i32_143, %c50_i32_145, %c0_i32_146] : memref<1x64x512xf32, #tpu.memory_space<vmem>> -> memref<1x1x512xf32, #tpu.memory_space<vmem>>
    %205 = tpu.memref_squeeze %204 : memref<1x1x512xf32, #tpu.memory_space<vmem>> -> memref<1x512xf32, #tpu.memory_space<vmem>>
    tpu.enqueue_dma source(%203 : memref<1x512xf32, #tpu.memory_space<any>>) target(%205 : memref<1x512xf32, #tpu.memory_space<vmem>>) target_semaphore(%arg4 : memref<!tpu.dma_semaphore, #tpu.memory_space<semaphore_mem>>)
    %c0_i32_147 = arith.constant 0 : i32
    %c39_i32_148 = arith.constant 39 : i32
    %206 = tpu.memref_slice %arg2[%arg0, %c39_i32_148, %1] : memref<2x64x512xf32, #tpu.memory_space<any>> -> memref<1x1x512xf32, #tpu.memory_space<any>>
    %207 = tpu.memref_squeeze %206 : memref<1x1x512xf32, #tpu.memory_space<any>> -> memref<1x512xf32, #tpu.memory_space<any>>
    %c51_i32 = arith.constant 51 : i32
    %c0_i32_149 = arith.constant 0 : i32
    %208 = tpu.memref_slice %arg3[%c0_i32_147, %c51_i32, %c0_i32_149] : memref<1x64x512xf32, #tpu.memory_space<vmem>> -> memref<1x1x512xf32, #tpu.memory_space<vmem>>
    %209 = tpu.memref_squeeze %208 : memref<1x1x512xf32, #tpu.memory_space<vmem>> -> memref<1x512xf32, #tpu.memory_space<vmem>>
    tpu.enqueue_dma source(%207 : memref<1x512xf32, #tpu.memory_space<any>>) target(%209 : memref<1x512xf32, #tpu.memory_space<vmem>>) target_semaphore(%arg4 : memref<!tpu.dma_semaphore, #tpu.memory_space<semaphore_mem>>)
    %c0_i32_150 = arith.constant 0 : i32
    %c41_i32_151 = arith.constant 41 : i32
    %210 = tpu.memref_slice %arg2[%arg0, %c41_i32_151, %1] : memref<2x64x512xf32, #tpu.memory_space<any>> -> memref<1x1x512xf32, #tpu.memory_space<any>>
    %211 = tpu.memref_squeeze %210 : memref<1x1x512xf32, #tpu.memory_space<any>> -> memref<1x512xf32, #tpu.memory_space<any>>
    %c52_i32_152 = arith.constant 52 : i32
    %c0_i32_153 = arith.constant 0 : i32
    %212 = tpu.memref_slice %arg3[%c0_i32_150, %c52_i32_152, %c0_i32_153] : memref<1x64x512xf32, #tpu.memory_space<vmem>> -> memref<1x1x512xf32, #tpu.memory_space<vmem>>
    %213 = tpu.memref_squeeze %212 : memref<1x1x512xf32, #tpu.memory_space<vmem>> -> memref<1x512xf32, #tpu.memory_space<vmem>>
    tpu.enqueue_dma source(%211 : memref<1x512xf32, #tpu.memory_space<any>>) target(%213 : memref<1x512xf32, #tpu.memory_space<vmem>>) target_semaphore(%arg4 : memref<!tpu.dma_semaphore, #tpu.memory_space<semaphore_mem>>)
    %c0_i32_154 = arith.constant 0 : i32
    %c43_i32_155 = arith.constant 43 : i32
    %214 = tpu.memref_slice %arg2[%arg0, %c43_i32_155, %1] : memref<2x64x512xf32, #tpu.memory_space<any>> -> memref<1x1x512xf32, #tpu.memory_space<any>>
    %215 = tpu.memref_squeeze %214 : memref<1x1x512xf32, #tpu.memory_space<any>> -> memref<1x512xf32, #tpu.memory_space<any>>
    %c53_i32 = arith.constant 53 : i32
    %c0_i32_156 = arith.constant 0 : i32
    %216 = tpu.memref_slice %arg3[%c0_i32_154, %c53_i32, %c0_i32_156] : memref<1x64x512xf32, #tpu.memory_space<vmem>> -> memref<1x1x512xf32, #tpu.memory_space<vmem>>
    %217 = tpu.memref_squeeze %216 : memref<1x1x512xf32, #tpu.memory_space<vmem>> -> memref<1x512xf32, #tpu.memory_space<vmem>>
    tpu.enqueue_dma source(%215 : memref<1x512xf32, #tpu.memory_space<any>>) target(%217 : memref<1x512xf32, #tpu.memory_space<vmem>>) target_semaphore(%arg4 : memref<!tpu.dma_semaphore, #tpu.memory_space<semaphore_mem>>)
    %c0_i32_157 = arith.constant 0 : i32
    %c45_i32_158 = arith.constant 45 : i32
    %218 = tpu.memref_slice %arg2[%arg0, %c45_i32_158, %1] : memref<2x64x512xf32, #tpu.memory_space<any>> -> memref<1x1x512xf32, #tpu.memory_space<any>>
    %219 = tpu.memref_squeeze %218 : memref<1x1x512xf32, #tpu.memory_space<any>> -> memref<1x512xf32, #tpu.memory_space<any>>
    %c54_i32_159 = arith.constant 54 : i32
    %c0_i32_160 = arith.constant 0 : i32
    %220 = tpu.memref_slice %arg3[%c0_i32_157, %c54_i32_159, %c0_i32_160] : memref<1x64x512xf32, #tpu.memory_space<vmem>> -> memref<1x1x512xf32, #tpu.memory_space<vmem>>
    %221 = tpu.memref_squeeze %220 : memref<1x1x512xf32, #tpu.memory_space<vmem>> -> memref<1x512xf32, #tpu.memory_space<vmem>>
    tpu.enqueue_dma source(%219 : memref<1x512xf32, #tpu.memory_space<any>>) target(%221 : memref<1x512xf32, #tpu.memory_space<vmem>>) target_semaphore(%arg4 : memref<!tpu.dma_semaphore, #tpu.memory_space<semaphore_mem>>)
    %c0_i32_161 = arith.constant 0 : i32
    %c47_i32_162 = arith.constant 47 : i32
    %222 = tpu.memref_slice %arg2[%arg0, %c47_i32_162, %1] : memref<2x64x512xf32, #tpu.memory_space<any>> -> memref<1x1x512xf32, #tpu.memory_space<any>>
    %223 = tpu.memref_squeeze %222 : memref<1x1x512xf32, #tpu.memory_space<any>> -> memref<1x512xf32, #tpu.memory_space<any>>
    %c55_i32 = arith.constant 55 : i32
    %c0_i32_163 = arith.constant 0 : i32
    %224 = tpu.memref_slice %arg3[%c0_i32_161, %c55_i32, %c0_i32_163] : memref<1x64x512xf32, #tpu.memory_space<vmem>> -> memref<1x1x512xf32, #tpu.memory_space<vmem>>
    %225 = tpu.memref_squeeze %224 : memref<1x1x512xf32, #tpu.memory_space<vmem>> -> memref<1x512xf32, #tpu.memory_space<vmem>>
    tpu.enqueue_dma source(%223 : memref<1x512xf32, #tpu.memory_space<any>>) target(%225 : memref<1x512xf32, #tpu.memory_space<vmem>>) target_semaphore(%arg4 : memref<!tpu.dma_semaphore, #tpu.memory_space<semaphore_mem>>)
    %c0_i32_164 = arith.constant 0 : i32
    %c49_i32_165 = arith.constant 49 : i32
    %226 = tpu.memref_slice %arg2[%arg0, %c49_i32_165, %1] : memref<2x64x512xf32, #tpu.memory_space<any>> -> memref<1x1x512xf32, #tpu.memory_space<any>>
    %227 = tpu.memref_squeeze %226 : memref<1x1x512xf32, #tpu.memory_space<any>> -> memref<1x512xf32, #tpu.memory_space<any>>
    %c56_i32_166 = arith.constant 56 : i32
    %c0_i32_167 = arith.constant 0 : i32
    %228 = tpu.memref_slice %arg3[%c0_i32_164, %c56_i32_166, %c0_i32_167] : memref<1x64x512xf32, #tpu.memory_space<vmem>> -> memref<1x1x512xf32, #tpu.memory_space<vmem>>
    %229 = tpu.memref_squeeze %228 : memref<1x1x512xf32, #tpu.memory_space<vmem>> -> memref<1x512xf32, #tpu.memory_space<vmem>>
    tpu.enqueue_dma source(%227 : memref<1x512xf32, #tpu.memory_space<any>>) target(%229 : memref<1x512xf32, #tpu.memory_space<vmem>>) target_semaphore(%arg4 : memref<!tpu.dma_semaphore, #tpu.memory_space<semaphore_mem>>)
    %c0_i32_168 = arith.constant 0 : i32
    %c51_i32_169 = arith.constant 51 : i32
    %230 = tpu.memref_slice %arg2[%arg0, %c51_i32_169, %1] : memref<2x64x512xf32, #tpu.memory_space<any>> -> memref<1x1x512xf32, #tpu.memory_space<any>>
    %231 = tpu.memref_squeeze %230 : memref<1x1x512xf32, #tpu.memory_space<any>> -> memref<1x512xf32, #tpu.memory_space<any>>
    %c57_i32 = arith.constant 57 : i32
    %c0_i32_170 = arith.constant 0 : i32
    %232 = tpu.memref_slice %arg3[%c0_i32_168, %c57_i32, %c0_i32_170] : memref<1x64x512xf32, #tpu.memory_space<vmem>> -> memref<1x1x512xf32, #tpu.memory_space<vmem>>
    %233 = tpu.memref_squeeze %232 : memref<1x1x512xf32, #tpu.memory_space<vmem>> -> memref<1x512xf32, #tpu.memory_space<vmem>>
    tpu.enqueue_dma source(%231 : memref<1x512xf32, #tpu.memory_space<any>>) target(%233 : memref<1x512xf32, #tpu.memory_space<vmem>>) target_semaphore(%arg4 : memref<!tpu.dma_semaphore, #tpu.memory_space<semaphore_mem>>)
    %c0_i32_171 = arith.constant 0 : i32
    %c53_i32_172 = arith.constant 53 : i32
    %234 = tpu.memref_slice %arg2[%arg0, %c53_i32_172, %1] : memref<2x64x512xf32, #tpu.memory_space<any>> -> memref<1x1x512xf32, #tpu.memory_space<any>>
    %235 = tpu.memref_squeeze %234 : memref<1x1x512xf32, #tpu.memory_space<any>> -> memref<1x512xf32, #tpu.memory_space<any>>
    %c58_i32_173 = arith.constant 58 : i32
    %c0_i32_174 = arith.constant 0 : i32
    %236 = tpu.memref_slice %arg3[%c0_i32_171, %c58_i32_173, %c0_i32_174] : memref<1x64x512xf32, #tpu.memory_space<vmem>> -> memref<1x1x512xf32, #tpu.memory_space<vmem>>
    %237 = tpu.memref_squeeze %236 : memref<1x1x512xf32, #tpu.memory_space<vmem>> -> memref<1x512xf32, #tpu.memory_space<vmem>>
    tpu.enqueue_dma source(%235 : memref<1x512xf32, #tpu.memory_space<any>>) target(%237 : memref<1x512xf32, #tpu.memory_space<vmem>>) target_semaphore(%arg4 : memref<!tpu.dma_semaphore, #tpu.memory_space<semaphore_mem>>)
    %c0_i32_175 = arith.constant 0 : i32
    %c55_i32_176 = arith.constant 55 : i32
    %238 = tpu.memref_slice %arg2[%arg0, %c55_i32_176, %1] : memref<2x64x512xf32, #tpu.memory_space<any>> -> memref<1x1x512xf32, #tpu.memory_space<any>>
    %239 = tpu.memref_squeeze %238 : memref<1x1x512xf32, #tpu.memory_space<any>> -> memref<1x512xf32, #tpu.memory_space<any>>
    %c59_i32 = arith.constant 59 : i32
    %c0_i32_177 = arith.constant 0 : i32
    %240 = tpu.memref_slice %arg3[%c0_i32_175, %c59_i32, %c0_i32_177] : memref<1x64x512xf32, #tpu.memory_space<vmem>> -> memref<1x1x512xf32, #tpu.memory_space<vmem>>
    %241 = tpu.memref_squeeze %240 : memref<1x1x512xf32, #tpu.memory_space<vmem>> -> memref<1x512xf32, #tpu.memory_space<vmem>>
    tpu.enqueue_dma source(%239 : memref<1x512xf32, #tpu.memory_space<any>>) target(%241 : memref<1x512xf32, #tpu.memory_space<vmem>>) target_semaphore(%arg4 : memref<!tpu.dma_semaphore, #tpu.memory_space<semaphore_mem>>)
    %c0_i32_178 = arith.constant 0 : i32
    %c57_i32_179 = arith.constant 57 : i32
    %242 = tpu.memref_slice %arg2[%arg0, %c57_i32_179, %1] : memref<2x64x512xf32, #tpu.memory_space<any>> -> memref<1x1x512xf32, #tpu.memory_space<any>>
    %243 = tpu.memref_squeeze %242 : memref<1x1x512xf32, #tpu.memory_space<any>> -> memref<1x512xf32, #tpu.memory_space<any>>
    %c60_i32_180 = arith.constant 60 : i32
    %c0_i32_181 = arith.constant 0 : i32
    %244 = tpu.memref_slice %arg3[%c0_i32_178, %c60_i32_180, %c0_i32_181] : memref<1x64x512xf32, #tpu.memory_space<vmem>> -> memref<1x1x512xf32, #tpu.memory_space<vmem>>
    %245 = tpu.memref_squeeze %244 : memref<1x1x512xf32, #tpu.memory_space<vmem>> -> memref<1x512xf32, #tpu.memory_space<vmem>>
    tpu.enqueue_dma source(%243 : memref<1x512xf32, #tpu.memory_space<any>>) target(%245 : memref<1x512xf32, #tpu.memory_space<vmem>>) target_semaphore(%arg4 : memref<!tpu.dma_semaphore, #tpu.memory_space<semaphore_mem>>)
    %c0_i32_182 = arith.constant 0 : i32
    %c59_i32_183 = arith.constant 59 : i32
    %246 = tpu.memref_slice %arg2[%arg0, %c59_i32_183, %1] : memref<2x64x512xf32, #tpu.memory_space<any>> -> memref<1x1x512xf32, #tpu.memory_space<any>>
    %247 = tpu.memref_squeeze %246 : memref<1x1x512xf32, #tpu.memory_space<any>> -> memref<1x512xf32, #tpu.memory_space<any>>
    %c61_i32 = arith.constant 61 : i32
    %c0_i32_184 = arith.constant 0 : i32
    %248 = tpu.memref_slice %arg3[%c0_i32_182, %c61_i32, %c0_i32_184] : memref<1x64x512xf32, #tpu.memory_space<vmem>> -> memref<1x1x512xf32, #tpu.memory_space<vmem>>
    %249 = tpu.memref_squeeze %248 : memref<1x1x512xf32, #tpu.memory_space<vmem>> -> memref<1x512xf32, #tpu.memory_space<vmem>>
    tpu.enqueue_dma source(%247 : memref<1x512xf32, #tpu.memory_space<any>>) target(%249 : memref<1x512xf32, #tpu.memory_space<vmem>>) target_semaphore(%arg4 : memref<!tpu.dma_semaphore, #tpu.memory_space<semaphore_mem>>)
    %c0_i32_185 = arith.constant 0 : i32
    %c61_i32_186 = arith.constant 61 : i32
    %250 = tpu.memref_slice %arg2[%arg0, %c61_i32_186, %1] : memref<2x64x512xf32, #tpu.memory_space<any>> -> memref<1x1x512xf32, #tpu.memory_space<any>>
    %251 = tpu.memref_squeeze %250 : memref<1x1x512xf32, #tpu.memory_space<any>> -> memref<1x512xf32, #tpu.memory_space<any>>
    %c62_i32_187 = arith.constant 62 : i32
    %c0_i32_188 = arith.constant 0 : i32
    %252 = tpu.memref_slice %arg3[%c0_i32_185, %c62_i32_187, %c0_i32_188] : memref<1x64x512xf32, #tpu.memory_space<vmem>> -> memref<1x1x512xf32, #tpu.memory_space<vmem>>
    %253 = tpu.memref_squeeze %252 : memref<1x1x512xf32, #tpu.memory_space<vmem>> -> memref<1x512xf32, #tpu.memory_space<vmem>>
    tpu.enqueue_dma source(%251 : memref<1x512xf32, #tpu.memory_space<any>>) target(%253 : memref<1x512xf32, #tpu.memory_space<vmem>>) target_semaphore(%arg4 : memref<!tpu.dma_semaphore, #tpu.memory_space<semaphore_mem>>)
    %c0_i32_189 = arith.constant 0 : i32
    %c63_i32 = arith.constant 63 : i32
    %254 = tpu.memref_slice %arg2[%arg0, %c63_i32, %1] : memref<2x64x512xf32, #tpu.memory_space<any>> -> memref<1x1x512xf32, #tpu.memory_space<any>>
    %255 = tpu.memref_squeeze %254 : memref<1x1x512xf32, #tpu.memory_space<any>> -> memref<1x512xf32, #tpu.memory_space<any>>
    %c63_i32_190 = arith.constant 63 : i32
    %c0_i32_191 = arith.constant 0 : i32
    %256 = tpu.memref_slice %arg3[%c0_i32_189, %c63_i32_190, %c0_i32_191] : memref<1x64x512xf32, #tpu.memory_space<vmem>> -> memref<1x1x512xf32, #tpu.memory_space<vmem>>
    %257 = tpu.memref_squeeze %256 : memref<1x1x512xf32, #tpu.memory_space<vmem>> -> memref<1x512xf32, #tpu.memory_space<vmem>>
    tpu.enqueue_dma source(%255 : memref<1x512xf32, #tpu.memory_space<any>>) target(%257 : memref<1x512xf32, #tpu.memory_space<vmem>>) target_semaphore(%arg4 : memref<!tpu.dma_semaphore, #tpu.memory_space<semaphore_mem>>)
    %c0_i32_192 = arith.constant 0 : i32
    %c0_i32_193 = arith.constant 0 : i32
    %258 = tpu.memref_slice %arg2[%arg0, %c0_i32_193, %1] : memref<2x64x512xf32, #tpu.memory_space<any>> -> memref<1x1x512xf32, #tpu.memory_space<any>>
    %259 = tpu.memref_squeeze %258 : memref<1x1x512xf32, #tpu.memory_space<any>> -> memref<1x512xf32, #tpu.memory_space<any>>
    %c0_i32_194 = arith.constant 0 : i32
    %c0_i32_195 = arith.constant 0 : i32
    %260 = tpu.memref_slice %arg3[%c0_i32_192, %c0_i32_194, %c0_i32_195] : memref<1x64x512xf32, #tpu.memory_space<vmem>> -> memref<1x1x512xf32, #tpu.memory_space<vmem>>
    %261 = tpu.memref_squeeze %260 : memref<1x1x512xf32, #tpu.memory_space<vmem>> -> memref<1x512xf32, #tpu.memory_space<vmem>>
    tpu.wait_dma2 semaphore(%arg4 : memref<!tpu.dma_semaphore, #tpu.memory_space<semaphore_mem>>) src(%259 : memref<1x512xf32, #tpu.memory_space<any>>) dst(%261 : memref<1x512xf32, #tpu.memory_space<vmem>>)
    %c0_i32_196 = arith.constant 0 : i32
    %c2_i32_197 = arith.constant 2 : i32
    %262 = tpu.memref_slice %arg2[%arg0, %c2_i32_197, %1] : memref<2x64x512xf32, #tpu.memory_space<any>> -> memref<1x1x512xf32, #tpu.memory_space<any>>
    %263 = tpu.memref_squeeze %262 : memref<1x1x512xf32, #tpu.memory_space<any>> -> memref<1x512xf32, #tpu.memory_space<any>>
    %c1_i32_198 = arith.constant 1 : i32
    %c0_i32_199 = arith.constant 0 : i32
    %264 = tpu.memref_slice %arg3[%c0_i32_196, %c1_i32_198, %c0_i32_199] : memref<1x64x512xf32, #tpu.memory_space<vmem>> -> memref<1x1x512xf32, #tpu.memory_space<vmem>>
    %265 = tpu.memref_squeeze %264 : memref<1x1x512xf32, #tpu.memory_space<vmem>> -> memref<1x512xf32, #tpu.memory_space<vmem>>
    tpu.wait_dma2 semaphore(%arg4 : memref<!tpu.dma_semaphore, #tpu.memory_space<semaphore_mem>>) src(%263 : memref<1x512xf32, #tpu.memory_space<any>>) dst(%265 : memref<1x512xf32, #tpu.memory_space<vmem>>)
    %c0_i32_200 = arith.constant 0 : i32
    %c4_i32_201 = arith.constant 4 : i32
    %266 = tpu.memref_slice %arg2[%arg0, %c4_i32_201, %1] : memref<2x64x512xf32, #tpu.memory_space<any>> -> memref<1x1x512xf32, #tpu.memory_space<any>>
    %267 = tpu.memref_squeeze %266 : memref<1x1x512xf32, #tpu.memory_space<any>> -> memref<1x512xf32, #tpu.memory_space<any>>
    %c2_i32_202 = arith.constant 2 : i32
    %c0_i32_203 = arith.constant 0 : i32
    %268 = tpu.memref_slice %arg3[%c0_i32_200, %c2_i32_202, %c0_i32_203] : memref<1x64x512xf32, #tpu.memory_space<vmem>> -> memref<1x1x512xf32, #tpu.memory_space<vmem>>
    %269 = tpu.memref_squeeze %268 : memref<1x1x512xf32, #tpu.memory_space<vmem>> -> memref<1x512xf32, #tpu.memory_space<vmem>>
    tpu.wait_dma2 semaphore(%arg4 : memref<!tpu.dma_semaphore, #tpu.memory_space<semaphore_mem>>) src(%267 : memref<1x512xf32, #tpu.memory_space<any>>) dst(%269 : memref<1x512xf32, #tpu.memory_space<vmem>>)
    %c0_i32_204 = arith.constant 0 : i32
    %c6_i32_205 = arith.constant 6 : i32
    %270 = tpu.memref_slice %arg2[%arg0, %c6_i32_205, %1] : memref<2x64x512xf32, #tpu.memory_space<any>> -> memref<1x1x512xf32, #tpu.memory_space<any>>
    %271 = tpu.memref_squeeze %270 : memref<1x1x512xf32, #tpu.memory_space<any>> -> memref<1x512xf32, #tpu.memory_space<any>>
    %c3_i32_206 = arith.constant 3 : i32
    %c0_i32_207 = arith.constant 0 : i32
    %272 = tpu.memref_slice %arg3[%c0_i32_204, %c3_i32_206, %c0_i32_207] : memref<1x64x512xf32, #tpu.memory_space<vmem>> -> memref<1x1x512xf32, #tpu.memory_space<vmem>>
    %273 = tpu.memref_squeeze %272 : memref<1x1x512xf32, #tpu.memory_space<vmem>> -> memref<1x512xf32, #tpu.memory_space<vmem>>
    tpu.wait_dma2 semaphore(%arg4 : memref<!tpu.dma_semaphore, #tpu.memory_space<semaphore_mem>>) src(%271 : memref<1x512xf32, #tpu.memory_space<any>>) dst(%273 : memref<1x512xf32, #tpu.memory_space<vmem>>)
    %c0_i32_208 = arith.constant 0 : i32
    %c8_i32_209 = arith.constant 8 : i32
    %274 = tpu.memref_slice %arg2[%arg0, %c8_i32_209, %1] : memref<2x64x512xf32, #tpu.memory_space<any>> -> memref<1x1x512xf32, #tpu.memory_space<any>>
    %275 = tpu.memref_squeeze %274 : memref<1x1x512xf32, #tpu.memory_space<any>> -> memref<1x512xf32, #tpu.memory_space<any>>
    %c4_i32_210 = arith.constant 4 : i32
    %c0_i32_211 = arith.constant 0 : i32
    %276 = tpu.memref_slice %arg3[%c0_i32_208, %c4_i32_210, %c0_i32_211] : memref<1x64x512xf32, #tpu.memory_space<vmem>> -> memref<1x1x512xf32, #tpu.memory_space<vmem>>
    %277 = tpu.memref_squeeze %276 : memref<1x1x512xf32, #tpu.memory_space<vmem>> -> memref<1x512xf32, #tpu.memory_space<vmem>>
    tpu.wait_dma2 semaphore(%arg4 : memref<!tpu.dma_semaphore, #tpu.memory_space<semaphore_mem>>) src(%275 : memref<1x512xf32, #tpu.memory_space<any>>) dst(%277 : memref<1x512xf32, #tpu.memory_space<vmem>>)
    %c0_i32_212 = arith.constant 0 : i32
    %c10_i32_213 = arith.constant 10 : i32
    %278 = tpu.memref_slice %arg2[%arg0, %c10_i32_213, %1] : memref<2x64x512xf32, #tpu.memory_space<any>> -> memref<1x1x512xf32, #tpu.memory_space<any>>
    %279 = tpu.memref_squeeze %278 : memref<1x1x512xf32, #tpu.memory_space<any>> -> memref<1x512xf32, #tpu.memory_space<any>>
    %c5_i32_214 = arith.constant 5 : i32
    %c0_i32_215 = arith.constant 0 : i32
    %280 = tpu.memref_slice %arg3[%c0_i32_212, %c5_i32_214, %c0_i32_215] : memref<1x64x512xf32, #tpu.memory_space<vmem>> -> memref<1x1x512xf32, #tpu.memory_space<vmem>>
    %281 = tpu.memref_squeeze %280 : memref<1x1x512xf32, #tpu.memory_space<vmem>> -> memref<1x512xf32, #tpu.memory_space<vmem>>
    tpu.wait_dma2 semaphore(%arg4 : memref<!tpu.dma_semaphore, #tpu.memory_space<semaphore_mem>>) src(%279 : memref<1x512xf32, #tpu.memory_space<any>>) dst(%281 : memref<1x512xf32, #tpu.memory_space<vmem>>)
    %c0_i32_216 = arith.constant 0 : i32
    %c12_i32_217 = arith.constant 12 : i32
    %282 = tpu.memref_slice %arg2[%arg0, %c12_i32_217, %1] : memref<2x64x512xf32, #tpu.memory_space<any>> -> memref<1x1x512xf32, #tpu.memory_space<any>>
    %283 = tpu.memref_squeeze %282 : memref<1x1x512xf32, #tpu.memory_space<any>> -> memref<1x512xf32, #tpu.memory_space<any>>
    %c6_i32_218 = arith.constant 6 : i32
    %c0_i32_219 = arith.constant 0 : i32
    %284 = tpu.memref_slice %arg3[%c0_i32_216, %c6_i32_218, %c0_i32_219] : memref<1x64x512xf32, #tpu.memory_space<vmem>> -> memref<1x1x512xf32, #tpu.memory_space<vmem>>
    %285 = tpu.memref_squeeze %284 : memref<1x1x512xf32, #tpu.memory_space<vmem>> -> memref<1x512xf32, #tpu.memory_space<vmem>>
    tpu.wait_dma2 semaphore(%arg4 : memref<!tpu.dma_semaphore, #tpu.memory_space<semaphore_mem>>) src(%283 : memref<1x512xf32, #tpu.memory_space<any>>) dst(%285 : memref<1x512xf32, #tpu.memory_space<vmem>>)
    %c0_i32_220 = arith.constant 0 : i32
    %c14_i32_221 = arith.constant 14 : i32
    %286 = tpu.memref_slice %arg2[%arg0, %c14_i32_221, %1] : memref<2x64x512xf32, #tpu.memory_space<any>> -> memref<1x1x512xf32, #tpu.memory_space<any>>
    %287 = tpu.memref_squeeze %286 : memref<1x1x512xf32, #tpu.memory_space<any>> -> memref<1x512xf32, #tpu.memory_space<any>>
    %c7_i32_222 = arith.constant 7 : i32
    %c0_i32_223 = arith.constant 0 : i32
    %288 = tpu.memref_slice %arg3[%c0_i32_220, %c7_i32_222, %c0_i32_223] : memref<1x64x512xf32, #tpu.memory_space<vmem>> -> memref<1x1x512xf32, #tpu.memory_space<vmem>>
    %289 = tpu.memref_squeeze %288 : memref<1x1x512xf32, #tpu.memory_space<vmem>> -> memref<1x512xf32, #tpu.memory_space<vmem>>
    tpu.wait_dma2 semaphore(%arg4 : memref<!tpu.dma_semaphore, #tpu.memory_space<semaphore_mem>>) src(%287 : memref<1x512xf32, #tpu.memory_space<any>>) dst(%289 : memref<1x512xf32, #tpu.memory_space<vmem>>)
    %c0_i32_224 = arith.constant 0 : i32
    %c16_i32_225 = arith.constant 16 : i32
    %290 = tpu.memref_slice %arg2[%arg0, %c16_i32_225, %1] : memref<2x64x512xf32, #tpu.memory_space<any>> -> memref<1x1x512xf32, #tpu.memory_space<any>>
    %291 = tpu.memref_squeeze %290 : memref<1x1x512xf32, #tpu.memory_space<any>> -> memref<1x512xf32, #tpu.memory_space<any>>
    %c8_i32_226 = arith.constant 8 : i32
    %c0_i32_227 = arith.constant 0 : i32
    %292 = tpu.memref_slice %arg3[%c0_i32_224, %c8_i32_226, %c0_i32_227] : memref<1x64x512xf32, #tpu.memory_space<vmem>> -> memref<1x1x512xf32, #tpu.memory_space<vmem>>
    %293 = tpu.memref_squeeze %292 : memref<1x1x512xf32, #tpu.memory_space<vmem>> -> memref<1x512xf32, #tpu.memory_space<vmem>>
    tpu.wait_dma2 semaphore(%arg4 : memref<!tpu.dma_semaphore, #tpu.memory_space<semaphore_mem>>) src(%291 : memref<1x512xf32, #tpu.memory_space<any>>) dst(%293 : memref<1x512xf32, #tpu.memory_space<vmem>>)
    %c0_i32_228 = arith.constant 0 : i32
    %c18_i32_229 = arith.constant 18 : i32
    %294 = tpu.memref_slice %arg2[%arg0, %c18_i32_229, %1] : memref<2x64x512xf32, #tpu.memory_space<any>> -> memref<1x1x512xf32, #tpu.memory_space<any>>
    %295 = tpu.memref_squeeze %294 : memref<1x1x512xf32, #tpu.memory_space<any>> -> memref<1x512xf32, #tpu.memory_space<any>>
    %c9_i32_230 = arith.constant 9 : i32
    %c0_i32_231 = arith.constant 0 : i32
    %296 = tpu.memref_slice %arg3[%c0_i32_228, %c9_i32_230, %c0_i32_231] : memref<1x64x512xf32, #tpu.memory_space<vmem>> -> memref<1x1x512xf32, #tpu.memory_space<vmem>>
    %297 = tpu.memref_squeeze %296 : memref<1x1x512xf32, #tpu.memory_space<vmem>> -> memref<1x512xf32, #tpu.memory_space<vmem>>
    tpu.wait_dma2 semaphore(%arg4 : memref<!tpu.dma_semaphore, #tpu.memory_space<semaphore_mem>>) src(%295 : memref<1x512xf32, #tpu.memory_space<any>>) dst(%297 : memref<1x512xf32, #tpu.memory_space<vmem>>)
    %c0_i32_232 = arith.constant 0 : i32
    %c20_i32_233 = arith.constant 20 : i32
    %298 = tpu.memref_slice %arg2[%arg0, %c20_i32_233, %1] : memref<2x64x512xf32, #tpu.memory_space<any>> -> memref<1x1x512xf32, #tpu.memory_space<any>>
    %299 = tpu.memref_squeeze %298 : memref<1x1x512xf32, #tpu.memory_space<any>> -> memref<1x512xf32, #tpu.memory_space<any>>
    %c10_i32_234 = arith.constant 10 : i32
    %c0_i32_235 = arith.constant 0 : i32
    %300 = tpu.memref_slice %arg3[%c0_i32_232, %c10_i32_234, %c0_i32_235] : memref<1x64x512xf32, #tpu.memory_space<vmem>> -> memref<1x1x512xf32, #tpu.memory_space<vmem>>
    %301 = tpu.memref_squeeze %300 : memref<1x1x512xf32, #tpu.memory_space<vmem>> -> memref<1x512xf32, #tpu.memory_space<vmem>>
    tpu.wait_dma2 semaphore(%arg4 : memref<!tpu.dma_semaphore, #tpu.memory_space<semaphore_mem>>) src(%299 : memref<1x512xf32, #tpu.memory_space<any>>) dst(%301 : memref<1x512xf32, #tpu.memory_space<vmem>>)
    %c0_i32_236 = arith.constant 0 : i32
    %c22_i32_237 = arith.constant 22 : i32
    %302 = tpu.memref_slice %arg2[%arg0, %c22_i32_237, %1] : memref<2x64x512xf32, #tpu.memory_space<any>> -> memref<1x1x512xf32, #tpu.memory_space<any>>
    %303 = tpu.memref_squeeze %302 : memref<1x1x512xf32, #tpu.memory_space<any>> -> memref<1x512xf32, #tpu.memory_space<any>>
    %c11_i32_238 = arith.constant 11 : i32
    %c0_i32_239 = arith.constant 0 : i32
    %304 = tpu.memref_slice %arg3[%c0_i32_236, %c11_i32_238, %c0_i32_239] : memref<1x64x512xf32, #tpu.memory_space<vmem>> -> memref<1x1x512xf32, #tpu.memory_space<vmem>>
    %305 = tpu.memref_squeeze %304 : memref<1x1x512xf32, #tpu.memory_space<vmem>> -> memref<1x512xf32, #tpu.memory_space<vmem>>
    tpu.wait_dma2 semaphore(%arg4 : memref<!tpu.dma_semaphore, #tpu.memory_space<semaphore_mem>>) src(%303 : memref<1x512xf32, #tpu.memory_space<any>>) dst(%305 : memref<1x512xf32, #tpu.memory_space<vmem>>)
    %c0_i32_240 = arith.constant 0 : i32
    %c24_i32_241 = arith.constant 24 : i32
    %306 = tpu.memref_slice %arg2[%arg0, %c24_i32_241, %1] : memref<2x64x512xf32, #tpu.memory_space<any>> -> memref<1x1x512xf32, #tpu.memory_space<any>>
    %307 = tpu.memref_squeeze %306 : memref<1x1x512xf32, #tpu.memory_space<any>> -> memref<1x512xf32, #tpu.memory_space<any>>
    %c12_i32_242 = arith.constant 12 : i32
    %c0_i32_243 = arith.constant 0 : i32
    %308 = tpu.memref_slice %arg3[%c0_i32_240, %c12_i32_242, %c0_i32_243] : memref<1x64x512xf32, #tpu.memory_space<vmem>> -> memref<1x1x512xf32, #tpu.memory_space<vmem>>
    %309 = tpu.memref_squeeze %308 : memref<1x1x512xf32, #tpu.memory_space<vmem>> -> memref<1x512xf32, #tpu.memory_space<vmem>>
    tpu.wait_dma2 semaphore(%arg4 : memref<!tpu.dma_semaphore, #tpu.memory_space<semaphore_mem>>) src(%307 : memref<1x512xf32, #tpu.memory_space<any>>) dst(%309 : memref<1x512xf32, #tpu.memory_space<vmem>>)
    %c0_i32_244 = arith.constant 0 : i32
    %c26_i32_245 = arith.constant 26 : i32
    %310 = tpu.memref_slice %arg2[%arg0, %c26_i32_245, %1] : memref<2x64x512xf32, #tpu.memory_space<any>> -> memref<1x1x512xf32, #tpu.memory_space<any>>
    %311 = tpu.memref_squeeze %310 : memref<1x1x512xf32, #tpu.memory_space<any>> -> memref<1x512xf32, #tpu.memory_space<any>>
    %c13_i32_246 = arith.constant 13 : i32
    %c0_i32_247 = arith.constant 0 : i32
    %312 = tpu.memref_slice %arg3[%c0_i32_244, %c13_i32_246, %c0_i32_247] : memref<1x64x512xf32, #tpu.memory_space<vmem>> -> memref<1x1x512xf32, #tpu.memory_space<vmem>>
    %313 = tpu.memref_squeeze %312 : memref<1x1x512xf32, #tpu.memory_space<vmem>> -> memref<1x512xf32, #tpu.memory_space<vmem>>
    tpu.wait_dma2 semaphore(%arg4 : memref<!tpu.dma_semaphore, #tpu.memory_space<semaphore_mem>>) src(%311 : memref<1x512xf32, #tpu.memory_space<any>>) dst(%313 : memref<1x512xf32, #tpu.memory_space<vmem>>)
    %c0_i32_248 = arith.constant 0 : i32
    %c28_i32_249 = arith.constant 28 : i32
    %314 = tpu.memref_slice %arg2[%arg0, %c28_i32_249, %1] : memref<2x64x512xf32, #tpu.memory_space<any>> -> memref<1x1x512xf32, #tpu.memory_space<any>>
    %315 = tpu.memref_squeeze %314 : memref<1x1x512xf32, #tpu.memory_space<any>> -> memref<1x512xf32, #tpu.memory_space<any>>
    %c14_i32_250 = arith.constant 14 : i32
    %c0_i32_251 = arith.constant 0 : i32
    %316 = tpu.memref_slice %arg3[%c0_i32_248, %c14_i32_250, %c0_i32_251] : memref<1x64x512xf32, #tpu.memory_space<vmem>> -> memref<1x1x512xf32, #tpu.memory_space<vmem>>
    %317 = tpu.memref_squeeze %316 : memref<1x1x512xf32, #tpu.memory_space<vmem>> -> memref<1x512xf32, #tpu.memory_space<vmem>>
    tpu.wait_dma2 semaphore(%arg4 : memref<!tpu.dma_semaphore, #tpu.memory_space<semaphore_mem>>) src(%315 : memref<1x512xf32, #tpu.memory_space<any>>) dst(%317 : memref<1x512xf32, #tpu.memory_space<vmem>>)
    %c0_i32_252 = arith.constant 0 : i32
    %c30_i32_253 = arith.constant 30 : i32
    %318 = tpu.memref_slice %arg2[%arg0, %c30_i32_253, %1] : memref<2x64x512xf32, #tpu.memory_space<any>> -> memref<1x1x512xf32, #tpu.memory_space<any>>
    %319 = tpu.memref_squeeze %318 : memref<1x1x512xf32, #tpu.memory_space<any>> -> memref<1x512xf32, #tpu.memory_space<any>>
    %c15_i32_254 = arith.constant 15 : i32
    %c0_i32_255 = arith.constant 0 : i32
    %320 = tpu.memref_slice %arg3[%c0_i32_252, %c15_i32_254, %c0_i32_255] : memref<1x64x512xf32, #tpu.memory_space<vmem>> -> memref<1x1x512xf32, #tpu.memory_space<vmem>>
    %321 = tpu.memref_squeeze %320 : memref<1x1x512xf32, #tpu.memory_space<vmem>> -> memref<1x512xf32, #tpu.memory_space<vmem>>
    tpu.wait_dma2 semaphore(%arg4 : memref<!tpu.dma_semaphore, #tpu.memory_space<semaphore_mem>>) src(%319 : memref<1x512xf32, #tpu.memory_space<any>>) dst(%321 : memref<1x512xf32, #tpu.memory_space<vmem>>)
    %c0_i32_256 = arith.constant 0 : i32
    %c32_i32_257 = arith.constant 32 : i32
    %322 = tpu.memref_slice %arg2[%arg0, %c32_i32_257, %1] : memref<2x64x512xf32, #tpu.memory_space<any>> -> memref<1x1x512xf32, #tpu.memory_space<any>>
    %323 = tpu.memref_squeeze %322 : memref<1x1x512xf32, #tpu.memory_space<any>> -> memref<1x512xf32, #tpu.memory_space<any>>
    %c16_i32_258 = arith.constant 16 : i32
    %c0_i32_259 = arith.constant 0 : i32
    %324 = tpu.memref_slice %arg3[%c0_i32_256, %c16_i32_258, %c0_i32_259] : memref<1x64x512xf32, #tpu.memory_space<vmem>> -> memref<1x1x512xf32, #tpu.memory_space<vmem>>
    %325 = tpu.memref_squeeze %324 : memref<1x1x512xf32, #tpu.memory_space<vmem>> -> memref<1x512xf32, #tpu.memory_space<vmem>>
    tpu.wait_dma2 semaphore(%arg4 : memref<!tpu.dma_semaphore, #tpu.memory_space<semaphore_mem>>) src(%323 : memref<1x512xf32, #tpu.memory_space<any>>) dst(%325 : memref<1x512xf32, #tpu.memory_space<vmem>>)
    %c0_i32_260 = arith.constant 0 : i32
    %c34_i32_261 = arith.constant 34 : i32
    %326 = tpu.memref_slice %arg2[%arg0, %c34_i32_261, %1] : memref<2x64x512xf32, #tpu.memory_space<any>> -> memref<1x1x512xf32, #tpu.memory_space<any>>
    %327 = tpu.memref_squeeze %326 : memref<1x1x512xf32, #tpu.memory_space<any>> -> memref<1x512xf32, #tpu.memory_space<any>>
    %c17_i32_262 = arith.constant 17 : i32
    %c0_i32_263 = arith.constant 0 : i32
    %328 = tpu.memref_slice %arg3[%c0_i32_260, %c17_i32_262, %c0_i32_263] : memref<1x64x512xf32, #tpu.memory_space<vmem>> -> memref<1x1x512xf32, #tpu.memory_space<vmem>>
    %329 = tpu.memref_squeeze %328 : memref<1x1x512xf32, #tpu.memory_space<vmem>> -> memref<1x512xf32, #tpu.memory_space<vmem>>
    tpu.wait_dma2 semaphore(%arg4 : memref<!tpu.dma_semaphore, #tpu.memory_space<semaphore_mem>>) src(%327 : memref<1x512xf32, #tpu.memory_space<any>>) dst(%329 : memref<1x512xf32, #tpu.memory_space<vmem>>)
    %c0_i32_264 = arith.constant 0 : i32
    %c36_i32_265 = arith.constant 36 : i32
    %330 = tpu.memref_slice %arg2[%arg0, %c36_i32_265, %1] : memref<2x64x512xf32, #tpu.memory_space<any>> -> memref<1x1x512xf32, #tpu.memory_space<any>>
    %331 = tpu.memref_squeeze %330 : memref<1x1x512xf32, #tpu.memory_space<any>> -> memref<1x512xf32, #tpu.memory_space<any>>
    %c18_i32_266 = arith.constant 18 : i32
    %c0_i32_267 = arith.constant 0 : i32
    %332 = tpu.memref_slice %arg3[%c0_i32_264, %c18_i32_266, %c0_i32_267] : memref<1x64x512xf32, #tpu.memory_space<vmem>> -> memref<1x1x512xf32, #tpu.memory_space<vmem>>
    %333 = tpu.memref_squeeze %332 : memref<1x1x512xf32, #tpu.memory_space<vmem>> -> memref<1x512xf32, #tpu.memory_space<vmem>>
    tpu.wait_dma2 semaphore(%arg4 : memref<!tpu.dma_semaphore, #tpu.memory_space<semaphore_mem>>) src(%331 : memref<1x512xf32, #tpu.memory_space<any>>) dst(%333 : memref<1x512xf32, #tpu.memory_space<vmem>>)
    %c0_i32_268 = arith.constant 0 : i32
    %c38_i32_269 = arith.constant 38 : i32
    %334 = tpu.memref_slice %arg2[%arg0, %c38_i32_269, %1] : memref<2x64x512xf32, #tpu.memory_space<any>> -> memref<1x1x512xf32, #tpu.memory_space<any>>
    %335 = tpu.memref_squeeze %334 : memref<1x1x512xf32, #tpu.memory_space<any>> -> memref<1x512xf32, #tpu.memory_space<any>>
    %c19_i32_270 = arith.constant 19 : i32
    %c0_i32_271 = arith.constant 0 : i32
    %336 = tpu.memref_slice %arg3[%c0_i32_268, %c19_i32_270, %c0_i32_271] : memref<1x64x512xf32, #tpu.memory_space<vmem>> -> memref<1x1x512xf32, #tpu.memory_space<vmem>>
    %337 = tpu.memref_squeeze %336 : memref<1x1x512xf32, #tpu.memory_space<vmem>> -> memref<1x512xf32, #tpu.memory_space<vmem>>
    tpu.wait_dma2 semaphore(%arg4 : memref<!tpu.dma_semaphore, #tpu.memory_space<semaphore_mem>>) src(%335 : memref<1x512xf32, #tpu.memory_space<any>>) dst(%337 : memref<1x512xf32, #tpu.memory_space<vmem>>)
    %c0_i32_272 = arith.constant 0 : i32
    %c40_i32_273 = arith.constant 40 : i32
    %338 = tpu.memref_slice %arg2[%arg0, %c40_i32_273, %1] : memref<2x64x512xf32, #tpu.memory_space<any>> -> memref<1x1x512xf32, #tpu.memory_space<any>>
    %339 = tpu.memref_squeeze %338 : memref<1x1x512xf32, #tpu.memory_space<any>> -> memref<1x512xf32, #tpu.memory_space<any>>
    %c20_i32_274 = arith.constant 20 : i32
    %c0_i32_275 = arith.constant 0 : i32
    %340 = tpu.memref_slice %arg3[%c0_i32_272, %c20_i32_274, %c0_i32_275] : memref<1x64x512xf32, #tpu.memory_space<vmem>> -> memref<1x1x512xf32, #tpu.memory_space<vmem>>
    %341 = tpu.memref_squeeze %340 : memref<1x1x512xf32, #tpu.memory_space<vmem>> -> memref<1x512xf32, #tpu.memory_space<vmem>>
    tpu.wait_dma2 semaphore(%arg4 : memref<!tpu.dma_semaphore, #tpu.memory_space<semaphore_mem>>) src(%339 : memref<1x512xf32, #tpu.memory_space<any>>) dst(%341 : memref<1x512xf32, #tpu.memory_space<vmem>>)
    %c0_i32_276 = arith.constant 0 : i32
    %c42_i32_277 = arith.constant 42 : i32
    %342 = tpu.memref_slice %arg2[%arg0, %c42_i32_277, %1] : memref<2x64x512xf32, #tpu.memory_space<any>> -> memref<1x1x512xf32, #tpu.memory_space<any>>
    %343 = tpu.memref_squeeze %342 : memref<1x1x512xf32, #tpu.memory_space<any>> -> memref<1x512xf32, #tpu.memory_space<any>>
    %c21_i32_278 = arith.constant 21 : i32
    %c0_i32_279 = arith.constant 0 : i32
    %344 = tpu.memref_slice %arg3[%c0_i32_276, %c21_i32_278, %c0_i32_279] : memref<1x64x512xf32, #tpu.memory_space<vmem>> -> memref<1x1x512xf32, #tpu.memory_space<vmem>>
    %345 = tpu.memref_squeeze %344 : memref<1x1x512xf32, #tpu.memory_space<vmem>> -> memref<1x512xf32, #tpu.memory_space<vmem>>
    tpu.wait_dma2 semaphore(%arg4 : memref<!tpu.dma_semaphore, #tpu.memory_space<semaphore_mem>>) src(%343 : memref<1x512xf32, #tpu.memory_space<any>>) dst(%345 : memref<1x512xf32, #tpu.memory_space<vmem>>)
    %c0_i32_280 = arith.constant 0 : i32
    %c44_i32_281 = arith.constant 44 : i32
    %346 = tpu.memref_slice %arg2[%arg0, %c44_i32_281, %1] : memref<2x64x512xf32, #tpu.memory_space<any>> -> memref<1x1x512xf32, #tpu.memory_space<any>>
    %347 = tpu.memref_squeeze %346 : memref<1x1x512xf32, #tpu.memory_space<any>> -> memref<1x512xf32, #tpu.memory_space<any>>
    %c22_i32_282 = arith.constant 22 : i32
    %c0_i32_283 = arith.constant 0 : i32
    %348 = tpu.memref_slice %arg3[%c0_i32_280, %c22_i32_282, %c0_i32_283] : memref<1x64x512xf32, #tpu.memory_space<vmem>> -> memref<1x1x512xf32, #tpu.memory_space<vmem>>
    %349 = tpu.memref_squeeze %348 : memref<1x1x512xf32, #tpu.memory_space<vmem>> -> memref<1x512xf32, #tpu.memory_space<vmem>>
    tpu.wait_dma2 semaphore(%arg4 : memref<!tpu.dma_semaphore, #tpu.memory_space<semaphore_mem>>) src(%347 : memref<1x512xf32, #tpu.memory_space<any>>) dst(%349 : memref<1x512xf32, #tpu.memory_space<vmem>>)
    %c0_i32_284 = arith.constant 0 : i32
    %c46_i32_285 = arith.constant 46 : i32
    %350 = tpu.memref_slice %arg2[%arg0, %c46_i32_285, %1] : memref<2x64x512xf32, #tpu.memory_space<any>> -> memref<1x1x512xf32, #tpu.memory_space<any>>
    %351 = tpu.memref_squeeze %350 : memref<1x1x512xf32, #tpu.memory_space<any>> -> memref<1x512xf32, #tpu.memory_space<any>>
    %c23_i32_286 = arith.constant 23 : i32
    %c0_i32_287 = arith.constant 0 : i32
    %352 = tpu.memref_slice %arg3[%c0_i32_284, %c23_i32_286, %c0_i32_287] : memref<1x64x512xf32, #tpu.memory_space<vmem>> -> memref<1x1x512xf32, #tpu.memory_space<vmem>>
    %353 = tpu.memref_squeeze %352 : memref<1x1x512xf32, #tpu.memory_space<vmem>> -> memref<1x512xf32, #tpu.memory_space<vmem>>
    tpu.wait_dma2 semaphore(%arg4 : memref<!tpu.dma_semaphore, #tpu.memory_space<semaphore_mem>>) src(%351 : memref<1x512xf32, #tpu.memory_space<any>>) dst(%353 : memref<1x512xf32, #tpu.memory_space<vmem>>)
    %c0_i32_288 = arith.constant 0 : i32
    %c48_i32_289 = arith.constant 48 : i32
    %354 = tpu.memref_slice %arg2[%arg0, %c48_i32_289, %1] : memref<2x64x512xf32, #tpu.memory_space<any>> -> memref<1x1x512xf32, #tpu.memory_space<any>>
    %355 = tpu.memref_squeeze %354 : memref<1x1x512xf32, #tpu.memory_space<any>> -> memref<1x512xf32, #tpu.memory_space<any>>
    %c24_i32_290 = arith.constant 24 : i32
    %c0_i32_291 = arith.constant 0 : i32
    %356 = tpu.memref_slice %arg3[%c0_i32_288, %c24_i32_290, %c0_i32_291] : memref<1x64x512xf32, #tpu.memory_space<vmem>> -> memref<1x1x512xf32, #tpu.memory_space<vmem>>
    %357 = tpu.memref_squeeze %356 : memref<1x1x512xf32, #tpu.memory_space<vmem>> -> memref<1x512xf32, #tpu.memory_space<vmem>>
    tpu.wait_dma2 semaphore(%arg4 : memref<!tpu.dma_semaphore, #tpu.memory_space<semaphore_mem>>) src(%355 : memref<1x512xf32, #tpu.memory_space<any>>) dst(%357 : memref<1x512xf32, #tpu.memory_space<vmem>>)
    %c0_i32_292 = arith.constant 0 : i32
    %c50_i32_293 = arith.constant 50 : i32
    %358 = tpu.memref_slice %arg2[%arg0, %c50_i32_293, %1] : memref<2x64x512xf32, #tpu.memory_space<any>> -> memref<1x1x512xf32, #tpu.memory_space<any>>
    %359 = tpu.memref_squeeze %358 : memref<1x1x512xf32, #tpu.memory_space<any>> -> memref<1x512xf32, #tpu.memory_space<any>>
    %c25_i32_294 = arith.constant 25 : i32
    %c0_i32_295 = arith.constant 0 : i32
    %360 = tpu.memref_slice %arg3[%c0_i32_292, %c25_i32_294, %c0_i32_295] : memref<1x64x512xf32, #tpu.memory_space<vmem>> -> memref<1x1x512xf32, #tpu.memory_space<vmem>>
    %361 = tpu.memref_squeeze %360 : memref<1x1x512xf32, #tpu.memory_space<vmem>> -> memref<1x512xf32, #tpu.memory_space<vmem>>
    tpu.wait_dma2 semaphore(%arg4 : memref<!tpu.dma_semaphore, #tpu.memory_space<semaphore_mem>>) src(%359 : memref<1x512xf32, #tpu.memory_space<any>>) dst(%361 : memref<1x512xf32, #tpu.memory_space<vmem>>)
    %c0_i32_296 = arith.constant 0 : i32
    %c52_i32_297 = arith.constant 52 : i32
    %362 = tpu.memref_slice %arg2[%arg0, %c52_i32_297, %1] : memref<2x64x512xf32, #tpu.memory_space<any>> -> memref<1x1x512xf32, #tpu.memory_space<any>>
    %363 = tpu.memref_squeeze %362 : memref<1x1x512xf32, #tpu.memory_space<any>> -> memref<1x512xf32, #tpu.memory_space<any>>
    %c26_i32_298 = arith.constant 26 : i32
    %c0_i32_299 = arith.constant 0 : i32
    %364 = tpu.memref_slice %arg3[%c0_i32_296, %c26_i32_298, %c0_i32_299] : memref<1x64x512xf32, #tpu.memory_space<vmem>> -> memref<1x1x512xf32, #tpu.memory_space<vmem>>
    %365 = tpu.memref_squeeze %364 : memref<1x1x512xf32, #tpu.memory_space<vmem>> -> memref<1x512xf32, #tpu.memory_space<vmem>>
    tpu.wait_dma2 semaphore(%arg4 : memref<!tpu.dma_semaphore, #tpu.memory_space<semaphore_mem>>) src(%363 : memref<1x512xf32, #tpu.memory_space<any>>) dst(%365 : memref<1x512xf32, #tpu.memory_space<vmem>>)
    %c0_i32_300 = arith.constant 0 : i32
    %c54_i32_301 = arith.constant 54 : i32
    %366 = tpu.memref_slice %arg2[%arg0, %c54_i32_301, %1] : memref<2x64x512xf32, #tpu.memory_space<any>> -> memref<1x1x512xf32, #tpu.memory_space<any>>
    %367 = tpu.memref_squeeze %366 : memref<1x1x512xf32, #tpu.memory_space<any>> -> memref<1x512xf32, #tpu.memory_space<any>>
    %c27_i32_302 = arith.constant 27 : i32
    %c0_i32_303 = arith.constant 0 : i32
    %368 = tpu.memref_slice %arg3[%c0_i32_300, %c27_i32_302, %c0_i32_303] : memref<1x64x512xf32, #tpu.memory_space<vmem>> -> memref<1x1x512xf32, #tpu.memory_space<vmem>>
    %369 = tpu.memref_squeeze %368 : memref<1x1x512xf32, #tpu.memory_space<vmem>> -> memref<1x512xf32, #tpu.memory_space<vmem>>
    tpu.wait_dma2 semaphore(%arg4 : memref<!tpu.dma_semaphore, #tpu.memory_space<semaphore_mem>>) src(%367 : memref<1x512xf32, #tpu.memory_space<any>>) dst(%369 : memref<1x512xf32, #tpu.memory_space<vmem>>)
    %c0_i32_304 = arith.constant 0 : i32
    %c56_i32_305 = arith.constant 56 : i32
    %370 = tpu.memref_slice %arg2[%arg0, %c56_i32_305, %1] : memref<2x64x512xf32, #tpu.memory_space<any>> -> memref<1x1x512xf32, #tpu.memory_space<any>>
    %371 = tpu.memref_squeeze %370 : memref<1x1x512xf32, #tpu.memory_space<any>> -> memref<1x512xf32, #tpu.memory_space<any>>
    %c28_i32_306 = arith.constant 28 : i32
    %c0_i32_307 = arith.constant 0 : i32
    %372 = tpu.memref_slice %arg3[%c0_i32_304, %c28_i32_306, %c0_i32_307] : memref<1x64x512xf32, #tpu.memory_space<vmem>> -> memref<1x1x512xf32, #tpu.memory_space<vmem>>
    %373 = tpu.memref_squeeze %372 : memref<1x1x512xf32, #tpu.memory_space<vmem>> -> memref<1x512xf32, #tpu.memory_space<vmem>>
    tpu.wait_dma2 semaphore(%arg4 : memref<!tpu.dma_semaphore, #tpu.memory_space<semaphore_mem>>) src(%371 : memref<1x512xf32, #tpu.memory_space<any>>) dst(%373 : memref<1x512xf32, #tpu.memory_space<vmem>>)
    %c0_i32_308 = arith.constant 0 : i32
    %c58_i32_309 = arith.constant 58 : i32
    %374 = tpu.memref_slice %arg2[%arg0, %c58_i32_309, %1] : memref<2x64x512xf32, #tpu.memory_space<any>> -> memref<1x1x512xf32, #tpu.memory_space<any>>
    %375 = tpu.memref_squeeze %374 : memref<1x1x512xf32, #tpu.memory_space<any>> -> memref<1x512xf32, #tpu.memory_space<any>>
    %c29_i32_310 = arith.constant 29 : i32
    %c0_i32_311 = arith.constant 0 : i32
    %376 = tpu.memref_slice %arg3[%c0_i32_308, %c29_i32_310, %c0_i32_311] : memref<1x64x512xf32, #tpu.memory_space<vmem>> -> memref<1x1x512xf32, #tpu.memory_space<vmem>>
    %377 = tpu.memref_squeeze %376 : memref<1x1x512xf32, #tpu.memory_space<vmem>> -> memref<1x512xf32, #tpu.memory_space<vmem>>
    tpu.wait_dma2 semaphore(%arg4 : memref<!tpu.dma_semaphore, #tpu.memory_space<semaphore_mem>>) src(%375 : memref<1x512xf32, #tpu.memory_space<any>>) dst(%377 : memref<1x512xf32, #tpu.memory_space<vmem>>)
    %c0_i32_312 = arith.constant 0 : i32
    %c60_i32_313 = arith.constant 60 : i32
    %378 = tpu.memref_slice %arg2[%arg0, %c60_i32_313, %1] : memref<2x64x512xf32, #tpu.memory_space<any>> -> memref<1x1x512xf32, #tpu.memory_space<any>>
    %379 = tpu.memref_squeeze %378 : memref<1x1x512xf32, #tpu.memory_space<any>> -> memref<1x512xf32, #tpu.memory_space<any>>
    %c30_i32_314 = arith.constant 30 : i32
    %c0_i32_315 = arith.constant 0 : i32
    %380 = tpu.memref_slice %arg3[%c0_i32_312, %c30_i32_314, %c0_i32_315] : memref<1x64x512xf32, #tpu.memory_space<vmem>> -> memref<1x1x512xf32, #tpu.memory_space<vmem>>
    %381 = tpu.memref_squeeze %380 : memref<1x1x512xf32, #tpu.memory_space<vmem>> -> memref<1x512xf32, #tpu.memory_space<vmem>>
    tpu.wait_dma2 semaphore(%arg4 : memref<!tpu.dma_semaphore, #tpu.memory_space<semaphore_mem>>) src(%379 : memref<1x512xf32, #tpu.memory_space<any>>) dst(%381 : memref<1x512xf32, #tpu.memory_space<vmem>>)
    %c0_i32_316 = arith.constant 0 : i32
    %c62_i32_317 = arith.constant 62 : i32
    %382 = tpu.memref_slice %arg2[%arg0, %c62_i32_317, %1] : memref<2x64x512xf32, #tpu.memory_space<any>> -> memref<1x1x512xf32, #tpu.memory_space<any>>
    %383 = tpu.memref_squeeze %382 : memref<1x1x512xf32, #tpu.memory_space<any>> -> memref<1x512xf32, #tpu.memory_space<any>>
    %c31_i32_318 = arith.constant 31 : i32
    %c0_i32_319 = arith.constant 0 : i32
    %384 = tpu.memref_slice %arg3[%c0_i32_316, %c31_i32_318, %c0_i32_319] : memref<1x64x512xf32, #tpu.memory_space<vmem>> -> memref<1x1x512xf32, #tpu.memory_space<vmem>>
    %385 = tpu.memref_squeeze %384 : memref<1x1x512xf32, #tpu.memory_space<vmem>> -> memref<1x512xf32, #tpu.memory_space<vmem>>
    tpu.wait_dma2 semaphore(%arg4 : memref<!tpu.dma_semaphore, #tpu.memory_space<semaphore_mem>>) src(%383 : memref<1x512xf32, #tpu.memory_space<any>>) dst(%385 : memref<1x512xf32, #tpu.memory_space<vmem>>)
    %c0_i32_320 = arith.constant 0 : i32
    %c1_i32_321 = arith.constant 1 : i32
    %386 = tpu.memref_slice %arg2[%arg0, %c1_i32_321, %1] : memref<2x64x512xf32, #tpu.memory_space<any>> -> memref<1x1x512xf32, #tpu.memory_space<any>>
    %387 = tpu.memref_squeeze %386 : memref<1x1x512xf32, #tpu.memory_space<any>> -> memref<1x512xf32, #tpu.memory_space<any>>
    %c32_i32_322 = arith.constant 32 : i32
    %c0_i32_323 = arith.constant 0 : i32
    %388 = tpu.memref_slice %arg3[%c0_i32_320, %c32_i32_322, %c0_i32_323] : memref<1x64x512xf32, #tpu.memory_space<vmem>> -> memref<1x1x512xf32, #tpu.memory_space<vmem>>
    %389 = tpu.memref_squeeze %388 : memref<1x1x512xf32, #tpu.memory_space<vmem>> -> memref<1x512xf32, #tpu.memory_space<vmem>>
    tpu.wait_dma2 semaphore(%arg4 : memref<!tpu.dma_semaphore, #tpu.memory_space<semaphore_mem>>) src(%387 : memref<1x512xf32, #tpu.memory_space<any>>) dst(%389 : memref<1x512xf32, #tpu.memory_space<vmem>>)
    %c0_i32_324 = arith.constant 0 : i32
    %c3_i32_325 = arith.constant 3 : i32
    %390 = tpu.memref_slice %arg2[%arg0, %c3_i32_325, %1] : memref<2x64x512xf32, #tpu.memory_space<any>> -> memref<1x1x512xf32, #tpu.memory_space<any>>
    %391 = tpu.memref_squeeze %390 : memref<1x1x512xf32, #tpu.memory_space<any>> -> memref<1x512xf32, #tpu.memory_space<any>>
    %c33_i32_326 = arith.constant 33 : i32
    %c0_i32_327 = arith.constant 0 : i32
    %392 = tpu.memref_slice %arg3[%c0_i32_324, %c33_i32_326, %c0_i32_327] : memref<1x64x512xf32, #tpu.memory_space<vmem>> -> memref<1x1x512xf32, #tpu.memory_space<vmem>>
    %393 = tpu.memref_squeeze %392 : memref<1x1x512xf32, #tpu.memory_space<vmem>> -> memref<1x512xf32, #tpu.memory_space<vmem>>
    tpu.wait_dma2 semaphore(%arg4 : memref<!tpu.dma_semaphore, #tpu.memory_space<semaphore_mem>>) src(%391 : memref<1x512xf32, #tpu.memory_space<any>>) dst(%393 : memref<1x512xf32, #tpu.memory_space<vmem>>)
    %c0_i32_328 = arith.constant 0 : i32
    %c5_i32_329 = arith.constant 5 : i32
    %394 = tpu.memref_slice %arg2[%arg0, %c5_i32_329, %1] : memref<2x64x512xf32, #tpu.memory_space<any>> -> memref<1x1x512xf32, #tpu.memory_space<any>>
    %395 = tpu.memref_squeeze %394 : memref<1x1x512xf32, #tpu.memory_space<any>> -> memref<1x512xf32, #tpu.memory_space<any>>
    %c34_i32_330 = arith.constant 34 : i32
    %c0_i32_331 = arith.constant 0 : i32
    %396 = tpu.memref_slice %arg3[%c0_i32_328, %c34_i32_330, %c0_i32_331] : memref<1x64x512xf32, #tpu.memory_space<vmem>> -> memref<1x1x512xf32, #tpu.memory_space<vmem>>
    %397 = tpu.memref_squeeze %396 : memref<1x1x512xf32, #tpu.memory_space<vmem>> -> memref<1x512xf32, #tpu.memory_space<vmem>>
    tpu.wait_dma2 semaphore(%arg4 : memref<!tpu.dma_semaphore, #tpu.memory_space<semaphore_mem>>) src(%395 : memref<1x512xf32, #tpu.memory_space<any>>) dst(%397 : memref<1x512xf32, #tpu.memory_space<vmem>>)
    %c0_i32_332 = arith.constant 0 : i32
    %c7_i32_333 = arith.constant 7 : i32
    %398 = tpu.memref_slice %arg2[%arg0, %c7_i32_333, %1] : memref<2x64x512xf32, #tpu.memory_space<any>> -> memref<1x1x512xf32, #tpu.memory_space<any>>
    %399 = tpu.memref_squeeze %398 : memref<1x1x512xf32, #tpu.memory_space<any>> -> memref<1x512xf32, #tpu.memory_space<any>>
    %c35_i32_334 = arith.constant 35 : i32
    %c0_i32_335 = arith.constant 0 : i32
    %400 = tpu.memref_slice %arg3[%c0_i32_332, %c35_i32_334, %c0_i32_335] : memref<1x64x512xf32, #tpu.memory_space<vmem>> -> memref<1x1x512xf32, #tpu.memory_space<vmem>>
    %401 = tpu.memref_squeeze %400 : memref<1x1x512xf32, #tpu.memory_space<vmem>> -> memref<1x512xf32, #tpu.memory_space<vmem>>
    tpu.wait_dma2 semaphore(%arg4 : memref<!tpu.dma_semaphore, #tpu.memory_space<semaphore_mem>>) src(%399 : memref<1x512xf32, #tpu.memory_space<any>>) dst(%401 : memref<1x512xf32, #tpu.memory_space<vmem>>)
    %c0_i32_336 = arith.constant 0 : i32
    %c9_i32_337 = arith.constant 9 : i32
    %402 = tpu.memref_slice %arg2[%arg0, %c9_i32_337, %1] : memref<2x64x512xf32, #tpu.memory_space<any>> -> memref<1x1x512xf32, #tpu.memory_space<any>>
    %403 = tpu.memref_squeeze %402 : memref<1x1x512xf32, #tpu.memory_space<any>> -> memref<1x512xf32, #tpu.memory_space<any>>
    %c36_i32_338 = arith.constant 36 : i32
    %c0_i32_339 = arith.constant 0 : i32
    %404 = tpu.memref_slice %arg3[%c0_i32_336, %c36_i32_338, %c0_i32_339] : memref<1x64x512xf32, #tpu.memory_space<vmem>> -> memref<1x1x512xf32, #tpu.memory_space<vmem>>
    %405 = tpu.memref_squeeze %404 : memref<1x1x512xf32, #tpu.memory_space<vmem>> -> memref<1x512xf32, #tpu.memory_space<vmem>>
    tpu.wait_dma2 semaphore(%arg4 : memref<!tpu.dma_semaphore, #tpu.memory_space<semaphore_mem>>) src(%403 : memref<1x512xf32, #tpu.memory_space<any>>) dst(%405 : memref<1x512xf32, #tpu.memory_space<vmem>>)
    %c0_i32_340 = arith.constant 0 : i32
    %c11_i32_341 = arith.constant 11 : i32
    %406 = tpu.memref_slice %arg2[%arg0, %c11_i32_341, %1] : memref<2x64x512xf32, #tpu.memory_space<any>> -> memref<1x1x512xf32, #tpu.memory_space<any>>
    %407 = tpu.memref_squeeze %406 : memref<1x1x512xf32, #tpu.memory_space<any>> -> memref<1x512xf32, #tpu.memory_space<any>>
    %c37_i32_342 = arith.constant 37 : i32
    %c0_i32_343 = arith.constant 0 : i32
    %408 = tpu.memref_slice %arg3[%c0_i32_340, %c37_i32_342, %c0_i32_343] : memref<1x64x512xf32, #tpu.memory_space<vmem>> -> memref<1x1x512xf32, #tpu.memory_space<vmem>>
    %409 = tpu.memref_squeeze %408 : memref<1x1x512xf32, #tpu.memory_space<vmem>> -> memref<1x512xf32, #tpu.memory_space<vmem>>
    tpu.wait_dma2 semaphore(%arg4 : memref<!tpu.dma_semaphore, #tpu.memory_space<semaphore_mem>>) src(%407 : memref<1x512xf32, #tpu.memory_space<any>>) dst(%409 : memref<1x512xf32, #tpu.memory_space<vmem>>)
    %c0_i32_344 = arith.constant 0 : i32
    %c13_i32_345 = arith.constant 13 : i32
    %410 = tpu.memref_slice %arg2[%arg0, %c13_i32_345, %1] : memref<2x64x512xf32, #tpu.memory_space<any>> -> memref<1x1x512xf32, #tpu.memory_space<any>>
    %411 = tpu.memref_squeeze %410 : memref<1x1x512xf32, #tpu.memory_space<any>> -> memref<1x512xf32, #tpu.memory_space<any>>
    %c38_i32_346 = arith.constant 38 : i32
    %c0_i32_347 = arith.constant 0 : i32
    %412 = tpu.memref_slice %arg3[%c0_i32_344, %c38_i32_346, %c0_i32_347] : memref<1x64x512xf32, #tpu.memory_space<vmem>> -> memref<1x1x512xf32, #tpu.memory_space<vmem>>
    %413 = tpu.memref_squeeze %412 : memref<1x1x512xf32, #tpu.memory_space<vmem>> -> memref<1x512xf32, #tpu.memory_space<vmem>>
    tpu.wait_dma2 semaphore(%arg4 : memref<!tpu.dma_semaphore, #tpu.memory_space<semaphore_mem>>) src(%411 : memref<1x512xf32, #tpu.memory_space<any>>) dst(%413 : memref<1x512xf32, #tpu.memory_space<vmem>>)
    %c0_i32_348 = arith.constant 0 : i32
    %c15_i32_349 = arith.constant 15 : i32
    %414 = tpu.memref_slice %arg2[%arg0, %c15_i32_349, %1] : memref<2x64x512xf32, #tpu.memory_space<any>> -> memref<1x1x512xf32, #tpu.memory_space<any>>
    %415 = tpu.memref_squeeze %414 : memref<1x1x512xf32, #tpu.memory_space<any>> -> memref<1x512xf32, #tpu.memory_space<any>>
    %c39_i32_350 = arith.constant 39 : i32
    %c0_i32_351 = arith.constant 0 : i32
    %416 = tpu.memref_slice %arg3[%c0_i32_348, %c39_i32_350, %c0_i32_351] : memref<1x64x512xf32, #tpu.memory_space<vmem>> -> memref<1x1x512xf32, #tpu.memory_space<vmem>>
    %417 = tpu.memref_squeeze %416 : memref<1x1x512xf32, #tpu.memory_space<vmem>> -> memref<1x512xf32, #tpu.memory_space<vmem>>
    tpu.wait_dma2 semaphore(%arg4 : memref<!tpu.dma_semaphore, #tpu.memory_space<semaphore_mem>>) src(%415 : memref<1x512xf32, #tpu.memory_space<any>>) dst(%417 : memref<1x512xf32, #tpu.memory_space<vmem>>)
    %c0_i32_352 = arith.constant 0 : i32
    %c17_i32_353 = arith.constant 17 : i32
    %418 = tpu.memref_slice %arg2[%arg0, %c17_i32_353, %1] : memref<2x64x512xf32, #tpu.memory_space<any>> -> memref<1x1x512xf32, #tpu.memory_space<any>>
    %419 = tpu.memref_squeeze %418 : memref<1x1x512xf32, #tpu.memory_space<any>> -> memref<1x512xf32, #tpu.memory_space<any>>
    %c40_i32_354 = arith.constant 40 : i32
    %c0_i32_355 = arith.constant 0 : i32
    %420 = tpu.memref_slice %arg3[%c0_i32_352, %c40_i32_354, %c0_i32_355] : memref<1x64x512xf32, #tpu.memory_space<vmem>> -> memref<1x1x512xf32, #tpu.memory_space<vmem>>
    %421 = tpu.memref_squeeze %420 : memref<1x1x512xf32, #tpu.memory_space<vmem>> -> memref<1x512xf32, #tpu.memory_space<vmem>>
    tpu.wait_dma2 semaphore(%arg4 : memref<!tpu.dma_semaphore, #tpu.memory_space<semaphore_mem>>) src(%419 : memref<1x512xf32, #tpu.memory_space<any>>) dst(%421 : memref<1x512xf32, #tpu.memory_space<vmem>>)
    %c0_i32_356 = arith.constant 0 : i32
    %c19_i32_357 = arith.constant 19 : i32
    %422 = tpu.memref_slice %arg2[%arg0, %c19_i32_357, %1] : memref<2x64x512xf32, #tpu.memory_space<any>> -> memref<1x1x512xf32, #tpu.memory_space<any>>
    %423 = tpu.memref_squeeze %422 : memref<1x1x512xf32, #tpu.memory_space<any>> -> memref<1x512xf32, #tpu.memory_space<any>>
    %c41_i32_358 = arith.constant 41 : i32
    %c0_i32_359 = arith.constant 0 : i32
    %424 = tpu.memref_slice %arg3[%c0_i32_356, %c41_i32_358, %c0_i32_359] : memref<1x64x512xf32, #tpu.memory_space<vmem>> -> memref<1x1x512xf32, #tpu.memory_space<vmem>>
    %425 = tpu.memref_squeeze %424 : memref<1x1x512xf32, #tpu.memory_space<vmem>> -> memref<1x512xf32, #tpu.memory_space<vmem>>
    tpu.wait_dma2 semaphore(%arg4 : memref<!tpu.dma_semaphore, #tpu.memory_space<semaphore_mem>>) src(%423 : memref<1x512xf32, #tpu.memory_space<any>>) dst(%425 : memref<1x512xf32, #tpu.memory_space<vmem>>)
    %c0_i32_360 = arith.constant 0 : i32
    %c21_i32_361 = arith.constant 21 : i32
    %426 = tpu.memref_slice %arg2[%arg0, %c21_i32_361, %1] : memref<2x64x512xf32, #tpu.memory_space<any>> -> memref<1x1x512xf32, #tpu.memory_space<any>>
    %427 = tpu.memref_squeeze %426 : memref<1x1x512xf32, #tpu.memory_space<any>> -> memref<1x512xf32, #tpu.memory_space<any>>
    %c42_i32_362 = arith.constant 42 : i32
    %c0_i32_363 = arith.constant 0 : i32
    %428 = tpu.memref_slice %arg3[%c0_i32_360, %c42_i32_362, %c0_i32_363] : memref<1x64x512xf32, #tpu.memory_space<vmem>> -> memref<1x1x512xf32, #tpu.memory_space<vmem>>
    %429 = tpu.memref_squeeze %428 : memref<1x1x512xf32, #tpu.memory_space<vmem>> -> memref<1x512xf32, #tpu.memory_space<vmem>>
    tpu.wait_dma2 semaphore(%arg4 : memref<!tpu.dma_semaphore, #tpu.memory_space<semaphore_mem>>) src(%427 : memref<1x512xf32, #tpu.memory_space<any>>) dst(%429 : memref<1x512xf32, #tpu.memory_space<vmem>>)
    %c0_i32_364 = arith.constant 0 : i32
    %c23_i32_365 = arith.constant 23 : i32
    %430 = tpu.memref_slice %arg2[%arg0, %c23_i32_365, %1] : memref<2x64x512xf32, #tpu.memory_space<any>> -> memref<1x1x512xf32, #tpu.memory_space<any>>
    %431 = tpu.memref_squeeze %430 : memref<1x1x512xf32, #tpu.memory_space<any>> -> memref<1x512xf32, #tpu.memory_space<any>>
    %c43_i32_366 = arith.constant 43 : i32
    %c0_i32_367 = arith.constant 0 : i32
    %432 = tpu.memref_slice %arg3[%c0_i32_364, %c43_i32_366, %c0_i32_367] : memref<1x64x512xf32, #tpu.memory_space<vmem>> -> memref<1x1x512xf32, #tpu.memory_space<vmem>>
    %433 = tpu.memref_squeeze %432 : memref<1x1x512xf32, #tpu.memory_space<vmem>> -> memref<1x512xf32, #tpu.memory_space<vmem>>
    tpu.wait_dma2 semaphore(%arg4 : memref<!tpu.dma_semaphore, #tpu.memory_space<semaphore_mem>>) src(%431 : memref<1x512xf32, #tpu.memory_space<any>>) dst(%433 : memref<1x512xf32, #tpu.memory_space<vmem>>)
    %c0_i32_368 = arith.constant 0 : i32
    %c25_i32_369 = arith.constant 25 : i32
    %434 = tpu.memref_slice %arg2[%arg0, %c25_i32_369, %1] : memref<2x64x512xf32, #tpu.memory_space<any>> -> memref<1x1x512xf32, #tpu.memory_space<any>>
    %435 = tpu.memref_squeeze %434 : memref<1x1x512xf32, #tpu.memory_space<any>> -> memref<1x512xf32, #tpu.memory_space<any>>
    %c44_i32_370 = arith.constant 44 : i32
    %c0_i32_371 = arith.constant 0 : i32
    %436 = tpu.memref_slice %arg3[%c0_i32_368, %c44_i32_370, %c0_i32_371] : memref<1x64x512xf32, #tpu.memory_space<vmem>> -> memref<1x1x512xf32, #tpu.memory_space<vmem>>
    %437 = tpu.memref_squeeze %436 : memref<1x1x512xf32, #tpu.memory_space<vmem>> -> memref<1x512xf32, #tpu.memory_space<vmem>>
    tpu.wait_dma2 semaphore(%arg4 : memref<!tpu.dma_semaphore, #tpu.memory_space<semaphore_mem>>) src(%435 : memref<1x512xf32, #tpu.memory_space<any>>) dst(%437 : memref<1x512xf32, #tpu.memory_space<vmem>>)
    %c0_i32_372 = arith.constant 0 : i32
    %c27_i32_373 = arith.constant 27 : i32
    %438 = tpu.memref_slice %arg2[%arg0, %c27_i32_373, %1] : memref<2x64x512xf32, #tpu.memory_space<any>> -> memref<1x1x512xf32, #tpu.memory_space<any>>
    %439 = tpu.memref_squeeze %438 : memref<1x1x512xf32, #tpu.memory_space<any>> -> memref<1x512xf32, #tpu.memory_space<any>>
    %c45_i32_374 = arith.constant 45 : i32
    %c0_i32_375 = arith.constant 0 : i32
    %440 = tpu.memref_slice %arg3[%c0_i32_372, %c45_i32_374, %c0_i32_375] : memref<1x64x512xf32, #tpu.memory_space<vmem>> -> memref<1x1x512xf32, #tpu.memory_space<vmem>>
    %441 = tpu.memref_squeeze %440 : memref<1x1x512xf32, #tpu.memory_space<vmem>> -> memref<1x512xf32, #tpu.memory_space<vmem>>
    tpu.wait_dma2 semaphore(%arg4 : memref<!tpu.dma_semaphore, #tpu.memory_space<semaphore_mem>>) src(%439 : memref<1x512xf32, #tpu.memory_space<any>>) dst(%441 : memref<1x512xf32, #tpu.memory_space<vmem>>)
    %c0_i32_376 = arith.constant 0 : i32
    %c29_i32_377 = arith.constant 29 : i32
    %442 = tpu.memref_slice %arg2[%arg0, %c29_i32_377, %1] : memref<2x64x512xf32, #tpu.memory_space<any>> -> memref<1x1x512xf32, #tpu.memory_space<any>>
    %443 = tpu.memref_squeeze %442 : memref<1x1x512xf32, #tpu.memory_space<any>> -> memref<1x512xf32, #tpu.memory_space<any>>
    %c46_i32_378 = arith.constant 46 : i32
    %c0_i32_379 = arith.constant 0 : i32
    %444 = tpu.memref_slice %arg3[%c0_i32_376, %c46_i32_378, %c0_i32_379] : memref<1x64x512xf32, #tpu.memory_space<vmem>> -> memref<1x1x512xf32, #tpu.memory_space<vmem>>
    %445 = tpu.memref_squeeze %444 : memref<1x1x512xf32, #tpu.memory_space<vmem>> -> memref<1x512xf32, #tpu.memory_space<vmem>>
    tpu.wait_dma2 semaphore(%arg4 : memref<!tpu.dma_semaphore, #tpu.memory_space<semaphore_mem>>) src(%443 : memref<1x512xf32, #tpu.memory_space<any>>) dst(%445 : memref<1x512xf32, #tpu.memory_space<vmem>>)
    %c0_i32_380 = arith.constant 0 : i32
    %c31_i32_381 = arith.constant 31 : i32
    %446 = tpu.memref_slice %arg2[%arg0, %c31_i32_381, %1] : memref<2x64x512xf32, #tpu.memory_space<any>> -> memref<1x1x512xf32, #tpu.memory_space<any>>
    %447 = tpu.memref_squeeze %446 : memref<1x1x512xf32, #tpu.memory_space<any>> -> memref<1x512xf32, #tpu.memory_space<any>>
    %c47_i32_382 = arith.constant 47 : i32
    %c0_i32_383 = arith.constant 0 : i32
    %448 = tpu.memref_slice %arg3[%c0_i32_380, %c47_i32_382, %c0_i32_383] : memref<1x64x512xf32, #tpu.memory_space<vmem>> -> memref<1x1x512xf32, #tpu.memory_space<vmem>>
    %449 = tpu.memref_squeeze %448 : memref<1x1x512xf32, #tpu.memory_space<vmem>> -> memref<1x512xf32, #tpu.memory_space<vmem>>
    tpu.wait_dma2 semaphore(%arg4 : memref<!tpu.dma_semaphore, #tpu.memory_space<semaphore_mem>>) src(%447 : memref<1x512xf32, #tpu.memory_space<any>>) dst(%449 : memref<1x512xf32, #tpu.memory_space<vmem>>)
    %c0_i32_384 = arith.constant 0 : i32
    %c33_i32_385 = arith.constant 33 : i32
    %450 = tpu.memref_slice %arg2[%arg0, %c33_i32_385, %1] : memref<2x64x512xf32, #tpu.memory_space<any>> -> memref<1x1x512xf32, #tpu.memory_space<any>>
    %451 = tpu.memref_squeeze %450 : memref<1x1x512xf32, #tpu.memory_space<any>> -> memref<1x512xf32, #tpu.memory_space<any>>
    %c48_i32_386 = arith.constant 48 : i32
    %c0_i32_387 = arith.constant 0 : i32
    %452 = tpu.memref_slice %arg3[%c0_i32_384, %c48_i32_386, %c0_i32_387] : memref<1x64x512xf32, #tpu.memory_space<vmem>> -> memref<1x1x512xf32, #tpu.memory_space<vmem>>
    %453 = tpu.memref_squeeze %452 : memref<1x1x512xf32, #tpu.memory_space<vmem>> -> memref<1x512xf32, #tpu.memory_space<vmem>>
    tpu.wait_dma2 semaphore(%arg4 : memref<!tpu.dma_semaphore, #tpu.memory_space<semaphore_mem>>) src(%451 : memref<1x512xf32, #tpu.memory_space<any>>) dst(%453 : memref<1x512xf32, #tpu.memory_space<vmem>>)
    %c0_i32_388 = arith.constant 0 : i32
    %c35_i32_389 = arith.constant 35 : i32
    %454 = tpu.memref_slice %arg2[%arg0, %c35_i32_389, %1] : memref<2x64x512xf32, #tpu.memory_space<any>> -> memref<1x1x512xf32, #tpu.memory_space<any>>
    %455 = tpu.memref_squeeze %454 : memref<1x1x512xf32, #tpu.memory_space<any>> -> memref<1x512xf32, #tpu.memory_space<any>>
    %c49_i32_390 = arith.constant 49 : i32
    %c0_i32_391 = arith.constant 0 : i32
    %456 = tpu.memref_slice %arg3[%c0_i32_388, %c49_i32_390, %c0_i32_391] : memref<1x64x512xf32, #tpu.memory_space<vmem>> -> memref<1x1x512xf32, #tpu.memory_space<vmem>>
    %457 = tpu.memref_squeeze %456 : memref<1x1x512xf32, #tpu.memory_space<vmem>> -> memref<1x512xf32, #tpu.memory_space<vmem>>
    tpu.wait_dma2 semaphore(%arg4 : memref<!tpu.dma_semaphore, #tpu.memory_space<semaphore_mem>>) src(%455 : memref<1x512xf32, #tpu.memory_space<any>>) dst(%457 : memref<1x512xf32, #tpu.memory_space<vmem>>)
    %c0_i32_392 = arith.constant 0 : i32
    %c37_i32_393 = arith.constant 37 : i32
    %458 = tpu.memref_slice %arg2[%arg0, %c37_i32_393, %1] : memref<2x64x512xf32, #tpu.memory_space<any>> -> memref<1x1x512xf32, #tpu.memory_space<any>>
    %459 = tpu.memref_squeeze %458 : memref<1x1x512xf32, #tpu.memory_space<any>> -> memref<1x512xf32, #tpu.memory_space<any>>
    %c50_i32_394 = arith.constant 50 : i32
    %c0_i32_395 = arith.constant 0 : i32
    %460 = tpu.memref_slice %arg3[%c0_i32_392, %c50_i32_394, %c0_i32_395] : memref<1x64x512xf32, #tpu.memory_space<vmem>> -> memref<1x1x512xf32, #tpu.memory_space<vmem>>
    %461 = tpu.memref_squeeze %460 : memref<1x1x512xf32, #tpu.memory_space<vmem>> -> memref<1x512xf32, #tpu.memory_space<vmem>>
    tpu.wait_dma2 semaphore(%arg4 : memref<!tpu.dma_semaphore, #tpu.memory_space<semaphore_mem>>) src(%459 : memref<1x512xf32, #tpu.memory_space<any>>) dst(%461 : memref<1x512xf32, #tpu.memory_space<vmem>>)
    %c0_i32_396 = arith.constant 0 : i32
    %c39_i32_397 = arith.constant 39 : i32
    %462 = tpu.memref_slice %arg2[%arg0, %c39_i32_397, %1] : memref<2x64x512xf32, #tpu.memory_space<any>> -> memref<1x1x512xf32, #tpu.memory_space<any>>
    %463 = tpu.memref_squeeze %462 : memref<1x1x512xf32, #tpu.memory_space<any>> -> memref<1x512xf32, #tpu.memory_space<any>>
    %c51_i32_398 = arith.constant 51 : i32
    %c0_i32_399 = arith.constant 0 : i32
    %464 = tpu.memref_slice %arg3[%c0_i32_396, %c51_i32_398, %c0_i32_399] : memref<1x64x512xf32, #tpu.memory_space<vmem>> -> memref<1x1x512xf32, #tpu.memory_space<vmem>>
    %465 = tpu.memref_squeeze %464 : memref<1x1x512xf32, #tpu.memory_space<vmem>> -> memref<1x512xf32, #tpu.memory_space<vmem>>
    tpu.wait_dma2 semaphore(%arg4 : memref<!tpu.dma_semaphore, #tpu.memory_space<semaphore_mem>>) src(%463 : memref<1x512xf32, #tpu.memory_space<any>>) dst(%465 : memref<1x512xf32, #tpu.memory_space<vmem>>)
    %c0_i32_400 = arith.constant 0 : i32
    %c41_i32_401 = arith.constant 41 : i32
    %466 = tpu.memref_slice %arg2[%arg0, %c41_i32_401, %1] : memref<2x64x512xf32, #tpu.memory_space<any>> -> memref<1x1x512xf32, #tpu.memory_space<any>>
    %467 = tpu.memref_squeeze %466 : memref<1x1x512xf32, #tpu.memory_space<any>> -> memref<1x512xf32, #tpu.memory_space<any>>
    %c52_i32_402 = arith.constant 52 : i32
    %c0_i32_403 = arith.constant 0 : i32
    %468 = tpu.memref_slice %arg3[%c0_i32_400, %c52_i32_402, %c0_i32_403] : memref<1x64x512xf32, #tpu.memory_space<vmem>> -> memref<1x1x512xf32, #tpu.memory_space<vmem>>
    %469 = tpu.memref_squeeze %468 : memref<1x1x512xf32, #tpu.memory_space<vmem>> -> memref<1x512xf32, #tpu.memory_space<vmem>>
    tpu.wait_dma2 semaphore(%arg4 : memref<!tpu.dma_semaphore, #tpu.memory_space<semaphore_mem>>) src(%467 : memref<1x512xf32, #tpu.memory_space<any>>) dst(%469 : memref<1x512xf32, #tpu.memory_space<vmem>>)
    %c0_i32_404 = arith.constant 0 : i32
    %c43_i32_405 = arith.constant 43 : i32
    %470 = tpu.memref_slice %arg2[%arg0, %c43_i32_405, %1] : memref<2x64x512xf32, #tpu.memory_space<any>> -> memref<1x1x512xf32, #tpu.memory_space<any>>
    %471 = tpu.memref_squeeze %470 : memref<1x1x512xf32, #tpu.memory_space<any>> -> memref<1x512xf32, #tpu.memory_space<any>>
    %c53_i32_406 = arith.constant 53 : i32
    %c0_i32_407 = arith.constant 0 : i32
    %472 = tpu.memref_slice %arg3[%c0_i32_404, %c53_i32_406, %c0_i32_407] : memref<1x64x512xf32, #tpu.memory_space<vmem>> -> memref<1x1x512xf32, #tpu.memory_space<vmem>>
    %473 = tpu.memref_squeeze %472 : memref<1x1x512xf32, #tpu.memory_space<vmem>> -> memref<1x512xf32, #tpu.memory_space<vmem>>
    tpu.wait_dma2 semaphore(%arg4 : memref<!tpu.dma_semaphore, #tpu.memory_space<semaphore_mem>>) src(%471 : memref<1x512xf32, #tpu.memory_space<any>>) dst(%473 : memref<1x512xf32, #tpu.memory_space<vmem>>)
    %c0_i32_408 = arith.constant 0 : i32
    %c45_i32_409 = arith.constant 45 : i32
    %474 = tpu.memref_slice %arg2[%arg0, %c45_i32_409, %1] : memref<2x64x512xf32, #tpu.memory_space<any>> -> memref<1x1x512xf32, #tpu.memory_space<any>>
    %475 = tpu.memref_squeeze %474 : memref<1x1x512xf32, #tpu.memory_space<any>> -> memref<1x512xf32, #tpu.memory_space<any>>
    %c54_i32_410 = arith.constant 54 : i32
    %c0_i32_411 = arith.constant 0 : i32
    %476 = tpu.memref_slice %arg3[%c0_i32_408, %c54_i32_410, %c0_i32_411] : memref<1x64x512xf32, #tpu.memory_space<vmem>> -> memref<1x1x512xf32, #tpu.memory_space<vmem>>
    %477 = tpu.memref_squeeze %476 : memref<1x1x512xf32, #tpu.memory_space<vmem>> -> memref<1x512xf32, #tpu.memory_space<vmem>>
    tpu.wait_dma2 semaphore(%arg4 : memref<!tpu.dma_semaphore, #tpu.memory_space<semaphore_mem>>) src(%475 : memref<1x512xf32, #tpu.memory_space<any>>) dst(%477 : memref<1x512xf32, #tpu.memory_space<vmem>>)
    %c0_i32_412 = arith.constant 0 : i32
    %c47_i32_413 = arith.constant 47 : i32
    %478 = tpu.memref_slice %arg2[%arg0, %c47_i32_413, %1] : memref<2x64x512xf32, #tpu.memory_space<any>> -> memref<1x1x512xf32, #tpu.memory_space<any>>
    %479 = tpu.memref_squeeze %478 : memref<1x1x512xf32, #tpu.memory_space<any>> -> memref<1x512xf32, #tpu.memory_space<any>>
    %c55_i32_414 = arith.constant 55 : i32
    %c0_i32_415 = arith.constant 0 : i32
    %480 = tpu.memref_slice %arg3[%c0_i32_412, %c55_i32_414, %c0_i32_415] : memref<1x64x512xf32, #tpu.memory_space<vmem>> -> memref<1x1x512xf32, #tpu.memory_space<vmem>>
    %481 = tpu.memref_squeeze %480 : memref<1x1x512xf32, #tpu.memory_space<vmem>> -> memref<1x512xf32, #tpu.memory_space<vmem>>
    tpu.wait_dma2 semaphore(%arg4 : memref<!tpu.dma_semaphore, #tpu.memory_space<semaphore_mem>>) src(%479 : memref<1x512xf32, #tpu.memory_space<any>>) dst(%481 : memref<1x512xf32, #tpu.memory_space<vmem>>)
    %c0_i32_416 = arith.constant 0 : i32
    %c49_i32_417 = arith.constant 49 : i32
    %482 = tpu.memref_slice %arg2[%arg0, %c49_i32_417, %1] : memref<2x64x512xf32, #tpu.memory_space<any>> -> memref<1x1x512xf32, #tpu.memory_space<any>>
    %483 = tpu.memref_squeeze %482 : memref<1x1x512xf32, #tpu.memory_space<any>> -> memref<1x512xf32, #tpu.memory_space<any>>
    %c56_i32_418 = arith.constant 56 : i32
    %c0_i32_419 = arith.constant 0 : i32
    %484 = tpu.memref_slice %arg3[%c0_i32_416, %c56_i32_418, %c0_i32_419] : memref<1x64x512xf32, #tpu.memory_space<vmem>> -> memref<1x1x512xf32, #tpu.memory_space<vmem>>
    %485 = tpu.memref_squeeze %484 : memref<1x1x512xf32, #tpu.memory_space<vmem>> -> memref<1x512xf32, #tpu.memory_space<vmem>>
    tpu.wait_dma2 semaphore(%arg4 : memref<!tpu.dma_semaphore, #tpu.memory_space<semaphore_mem>>) src(%483 : memref<1x512xf32, #tpu.memory_space<any>>) dst(%485 : memref<1x512xf32, #tpu.memory_space<vmem>>)
    %c0_i32_420 = arith.constant 0 : i32
    %c51_i32_421 = arith.constant 51 : i32
    %486 = tpu.memref_slice %arg2[%arg0, %c51_i32_421, %1] : memref<2x64x512xf32, #tpu.memory_space<any>> -> memref<1x1x512xf32, #tpu.memory_space<any>>
    %487 = tpu.memref_squeeze %486 : memref<1x1x512xf32, #tpu.memory_space<any>> -> memref<1x512xf32, #tpu.memory_space<any>>
    %c57_i32_422 = arith.constant 57 : i32
    %c0_i32_423 = arith.constant 0 : i32
    %488 = tpu.memref_slice %arg3[%c0_i32_420, %c57_i32_422, %c0_i32_423] : memref<1x64x512xf32, #tpu.memory_space<vmem>> -> memref<1x1x512xf32, #tpu.memory_space<vmem>>
    %489 = tpu.memref_squeeze %488 : memref<1x1x512xf32, #tpu.memory_space<vmem>> -> memref<1x512xf32, #tpu.memory_space<vmem>>
    tpu.wait_dma2 semaphore(%arg4 : memref<!tpu.dma_semaphore, #tpu.memory_space<semaphore_mem>>) src(%487 : memref<1x512xf32, #tpu.memory_space<any>>) dst(%489 : memref<1x512xf32, #tpu.memory_space<vmem>>)
    %c0_i32_424 = arith.constant 0 : i32
    %c53_i32_425 = arith.constant 53 : i32
    %490 = tpu.memref_slice %arg2[%arg0, %c53_i32_425, %1] : memref<2x64x512xf32, #tpu.memory_space<any>> -> memref<1x1x512xf32, #tpu.memory_space<any>>
    %491 = tpu.memref_squeeze %490 : memref<1x1x512xf32, #tpu.memory_space<any>> -> memref<1x512xf32, #tpu.memory_space<any>>
    %c58_i32_426 = arith.constant 58 : i32
    %c0_i32_427 = arith.constant 0 : i32
    %492 = tpu.memref_slice %arg3[%c0_i32_424, %c58_i32_426, %c0_i32_427] : memref<1x64x512xf32, #tpu.memory_space<vmem>> -> memref<1x1x512xf32, #tpu.memory_space<vmem>>
    %493 = tpu.memref_squeeze %492 : memref<1x1x512xf32, #tpu.memory_space<vmem>> -> memref<1x512xf32, #tpu.memory_space<vmem>>
    tpu.wait_dma2 semaphore(%arg4 : memref<!tpu.dma_semaphore, #tpu.memory_space<semaphore_mem>>) src(%491 : memref<1x512xf32, #tpu.memory_space<any>>) dst(%493 : memref<1x512xf32, #tpu.memory_space<vmem>>)
    %c0_i32_428 = arith.constant 0 : i32
    %c55_i32_429 = arith.constant 55 : i32
    %494 = tpu.memref_slice %arg2[%arg0, %c55_i32_429, %1] : memref<2x64x512xf32, #tpu.memory_space<any>> -> memref<1x1x512xf32, #tpu.memory_space<any>>
    %495 = tpu.memref_squeeze %494 : memref<1x1x512xf32, #tpu.memory_space<any>> -> memref<1x512xf32, #tpu.memory_space<any>>
    %c59_i32_430 = arith.constant 59 : i32
    %c0_i32_431 = arith.constant 0 : i32
    %496 = tpu.memref_slice %arg3[%c0_i32_428, %c59_i32_430, %c0_i32_431] : memref<1x64x512xf32, #tpu.memory_space<vmem>> -> memref<1x1x512xf32, #tpu.memory_space<vmem>>
    %497 = tpu.memref_squeeze %496 : memref<1x1x512xf32, #tpu.memory_space<vmem>> -> memref<1x512xf32, #tpu.memory_space<vmem>>
    tpu.wait_dma2 semaphore(%arg4 : memref<!tpu.dma_semaphore, #tpu.memory_space<semaphore_mem>>) src(%495 : memref<1x512xf32, #tpu.memory_space<any>>) dst(%497 : memref<1x512xf32, #tpu.memory_space<vmem>>)
    %c0_i32_432 = arith.constant 0 : i32
    %c57_i32_433 = arith.constant 57 : i32
    %498 = tpu.memref_slice %arg2[%arg0, %c57_i32_433, %1] : memref<2x64x512xf32, #tpu.memory_space<any>> -> memref<1x1x512xf32, #tpu.memory_space<any>>
    %499 = tpu.memref_squeeze %498 : memref<1x1x512xf32, #tpu.memory_space<any>> -> memref<1x512xf32, #tpu.memory_space<any>>
    %c60_i32_434 = arith.constant 60 : i32
    %c0_i32_435 = arith.constant 0 : i32
    %500 = tpu.memref_slice %arg3[%c0_i32_432, %c60_i32_434, %c0_i32_435] : memref<1x64x512xf32, #tpu.memory_space<vmem>> -> memref<1x1x512xf32, #tpu.memory_space<vmem>>
    %501 = tpu.memref_squeeze %500 : memref<1x1x512xf32, #tpu.memory_space<vmem>> -> memref<1x512xf32, #tpu.memory_space<vmem>>
    tpu.wait_dma2 semaphore(%arg4 : memref<!tpu.dma_semaphore, #tpu.memory_space<semaphore_mem>>) src(%499 : memref<1x512xf32, #tpu.memory_space<any>>) dst(%501 : memref<1x512xf32, #tpu.memory_space<vmem>>)
    %c0_i32_436 = arith.constant 0 : i32
    %c59_i32_437 = arith.constant 59 : i32
    %502 = tpu.memref_slice %arg2[%arg0, %c59_i32_437, %1] : memref<2x64x512xf32, #tpu.memory_space<any>> -> memref<1x1x512xf32, #tpu.memory_space<any>>
    %503 = tpu.memref_squeeze %502 : memref<1x1x512xf32, #tpu.memory_space<any>> -> memref<1x512xf32, #tpu.memory_space<any>>
    %c61_i32_438 = arith.constant 61 : i32
    %c0_i32_439 = arith.constant 0 : i32
    %504 = tpu.memref_slice %arg3[%c0_i32_436, %c61_i32_438, %c0_i32_439] : memref<1x64x512xf32, #tpu.memory_space<vmem>> -> memref<1x1x512xf32, #tpu.memory_space<vmem>>
    %505 = tpu.memref_squeeze %504 : memref<1x1x512xf32, #tpu.memory_space<vmem>> -> memref<1x512xf32, #tpu.memory_space<vmem>>
    tpu.wait_dma2 semaphore(%arg4 : memref<!tpu.dma_semaphore, #tpu.memory_space<semaphore_mem>>) src(%503 : memref<1x512xf32, #tpu.memory_space<any>>) dst(%505 : memref<1x512xf32, #tpu.memory_space<vmem>>)
    %c0_i32_440 = arith.constant 0 : i32
    %c61_i32_441 = arith.constant 61 : i32
    %506 = tpu.memref_slice %arg2[%arg0, %c61_i32_441, %1] : memref<2x64x512xf32, #tpu.memory_space<any>> -> memref<1x1x512xf32, #tpu.memory_space<any>>
    %507 = tpu.memref_squeeze %506 : memref<1x1x512xf32, #tpu.memory_space<any>> -> memref<1x512xf32, #tpu.memory_space<any>>
    %c62_i32_442 = arith.constant 62 : i32
    %c0_i32_443 = arith.constant 0 : i32
    %508 = tpu.memref_slice %arg3[%c0_i32_440, %c62_i32_442, %c0_i32_443] : memref<1x64x512xf32, #tpu.memory_space<vmem>> -> memref<1x1x512xf32, #tpu.memory_space<vmem>>
    %509 = tpu.memref_squeeze %508 : memref<1x1x512xf32, #tpu.memory_space<vmem>> -> memref<1x512xf32, #tpu.memory_space<vmem>>
    tpu.wait_dma2 semaphore(%arg4 : memref<!tpu.dma_semaphore, #tpu.memory_space<semaphore_mem>>) src(%507 : memref<1x512xf32, #tpu.memory_space<any>>) dst(%509 : memref<1x512xf32, #tpu.memory_space<vmem>>)
    %c0_i32_444 = arith.constant 0 : i32
    %c63_i32_445 = arith.constant 63 : i32
    %510 = tpu.memref_slice %arg2[%arg0, %c63_i32_445, %1] : memref<2x64x512xf32, #tpu.memory_space<any>> -> memref<1x1x512xf32, #tpu.memory_space<any>>
    %511 = tpu.memref_squeeze %510 : memref<1x1x512xf32, #tpu.memory_space<any>> -> memref<1x512xf32, #tpu.memory_space<any>>
    %c63_i32_446 = arith.constant 63 : i32
    %c0_i32_447 = arith.constant 0 : i32
    %512 = tpu.memref_slice %arg3[%c0_i32_444, %c63_i32_446, %c0_i32_447] : memref<1x64x512xf32, #tpu.memory_space<vmem>> -> memref<1x1x512xf32, #tpu.memory_space<vmem>>
    %513 = tpu.memref_squeeze %512 : memref<1x1x512xf32, #tpu.memory_space<vmem>> -> memref<1x512xf32, #tpu.memory_space<vmem>>
    tpu.wait_dma2 semaphore(%arg4 : memref<!tpu.dma_semaphore, #tpu.memory_space<semaphore_mem>>) src(%511 : memref<1x512xf32, #tpu.memory_space<any>>) dst(%513 : memref<1x512xf32, #tpu.memory_space<vmem>>)
    return
  }
  func.func @transform_1(%arg0: i32, %arg1: i32) -> (i32, i32, i32) {
    %c0_i32 = arith.constant 0 : i32
    %c0_i32_0 = arith.constant 0 : i32
    return %arg0, %c0_i32, %arg1 : i32, i32, i32
  }
}

</mosaic_0001>

<bundles_post_ra>
// kernel: tpu_custom_call.1
= control target key start
LH: loop header
LB: loop body
LE: loop exit
PB: predicated region body
PF: predicated region fallthrough
CT: control target
= control target key end

     0   :  { %6 = vsyncpa [#allocation4], 0  ;;  %s4544_s0 = inlined_call_operand.hbm [shape: f32[2,64,512], index: 0, kind: input, shape index: {}]   ;;  %s4545_s1 = inlined_call_operand.hbm [shape: f32[2,64,512], index: 1, kind: output, shape index: {}]  }
   0x1   :  { %8 = vsyncpa [#allocation4 + $0x1], 0  ;;  %s3215_s6 = smov 0   ;;  %s3217_s7 = smov 0  }
   0x2   :  { %s3219_s8 = smov 0   ;;  %s3221_s9 = smov 0  }
   0x3 LB: > { %s23_s10 = sadd.s32 1, %s3194_s8  ;;  %s1289_s11 = sadd.s32 4294967295, %s3198_s9   ;;  %s3198_s9 = sphi %s3221_s9, %s14_s9   ;;  %s3194_s8 = sphi %s3219_s8, %s4552_s8   ;;  %s3190_s7 = sphi %s3217_s7, %s4551_s7   ;;  %s3186_s6 = sphi %s3215_s6, %s4550_s6  }
   0x4   : > { %p25_p0 = scmp.ge.s32.totalorder %s23_s10, 2  ;;  %p41_p1 = scmp.ne.s32.totalorder %s3190_s7, %s3186_s6 }
   0x5   : > { %s32_s12 = sadd.s32 1, %s3190_s7  ;;  %p42_p2 = scmp.eq.s32.totalorder %s1289_s11, 1 }
   0x6   : > { %s4554_s10 = smov (%p25_p0, %s23_s10), 0  ;;  %p36_p3 = scmp.eq.s32.totalorder %s3198_s9, 1 }
   0x7   : > { %s27_s13 = ssub.s32 %s3194_s8, %s4554_s10  ;;  %p3245_p6 = por %p42_p2, %p41_p1 }
   0x8   : > { %p30_p4 = scmp.eq.s32.totalorder %s27_s13, 0  ;;  %p1290_p5 = scmp.ne.s32.totalorder %s27_s13, 0 }
   0x9   : > { %p1291_p8 = scmp.ge.s32.totalorder %s3198_s9, 2 }
   0xa   : > { %s3250_s15 = scalar_select %p30_p4, %s3190_s7, %s32_s12  }
   0xb   : > { %p3252_p7 = por %p1290_p5, %p36_p3  ;;  %51 = sbr.rel (%p1291_p8) target bundleno = 1353 (0x549), region = 12 }
   0xc   : > { %s56_s17 = sand.u32 (!%p1291_p8), 1, %s3190_s7   ;;  %s1427_s18 = sshll.u32 (!%p1291_p8), %s3194_s8, 12 }
   0xd   : > { %s1292_s19 = sshll.u32 (!%p1291_p8), %s56_s17, 8  ;;  %s3266_s22 = scalar_lea.hbm (!%p1291_p8), %s4544_s0, %s1427_s18 }
   0xe   : > { %s3268_s23 = scalar_lea.vmem (!%p1291_p8), [#allocation3], %s1292_s19  ;;  %s3274_s25 = scalar_lea.hbm (!%p1291_p8), %s3266_s22, 32 }
   0xf   : > { %s69_s24 = sshll.u32 (!%p1291_p8), %s3268_s23, 4  ;;  %s3277_s26 = scalar_lea.hbm (!%p1291_p8), %s3266_s22, 64  ;;  %s3271_s24 = int_to_ptr.vmem [resolvable:$true] %s69_s24 }
  0x10   : > { %p1536_p9 = scmp.ne.s32.totalorder (!%p1291_p8), %s3266_s22, %s3277_s26  ;;  %s3284_s29 = scalar_lea.hbm (!%p1291_p8), %s4544_s0, 8192 }
  0x11   : > { %p1538_p10 = scmp.lt.u32.totalorder (!%p1291_p8), %s3266_s22, %s4544_s0  ;;  %p1539_p11 = scmp.lt.u32.totalorder (!%p1291_p8), %s3284_s29, %s3277_s26 }
  0x12   : > { %p1541_p13 = scmp.lt.u32.totalorder %s3277_s26, %s3266_s22 }
  0x13   : > { %p1540_p12 = por %p1539_p11, %p1538_p10 }
  0x15   : > { %p1542_p0 = por %p1541_p13, %p1540_p12 }
  0x17   : > { %p1543_p1 = pnand %p1542_p0, %p1536_p9 }
  0x19   : > { %1546 = shalt.err (!%p1543_p1)  }
  0x1a   : > { %s1547_s3 = scalar_lea.vmem %s3271_s24, 64  ;;  %s3200_s4 = smov [#allocation3]  }
  0x1b   : > { %p1548_p2 = scmp.ne.s32.totalorder %s3271_s24, %s1547_s3  ;;  %s1549_s5 = sshll.u32 %s3200_s4, 4  ;;  %s3296_s5 = int_to_ptr.vmem [resolvable:$false] %s1549_s5 }
  0x1c   : > { %s3299_s11 = scalar_lea.vmem %s3296_s5, 8192  ;;  %p4546_p3 = scmp.lt.s32.totalorder %s3271_s24, %s3296_s5 }
  0x1d   : > { %p1553_p4 = scmp.lt.s32.totalorder %s3299_s11, %s1547_s3 }
  0x1f   : > { %p1554_p5 = por %p1553_p4, %p4546_p3 }
  0x21   : > { %p1555_p8 = pnand %p1554_p5, %p1548_p2 }
  0x23   : > { %1558 = shalt.err (!%p1555_p8)  }
  0x24   : > { %s3201_s12 = smov 128   ;;  %s3202_s13 = smov 1  }
  0x25   : > { %72 = dma.hbm_to_vmem [thread:$0]  %s3266_s22, 64, %s3271_s24, [#allocation2], %s3201_s12, %s3201_s12, %s3202_s13 }
  0x26   : > { %s77_s19 = scalar_lea.vmem %s3268_s23, 1 [#allocation3]  ;;  %s87_s21 = scalar_lea.vmem %s3268_s23, 2 [#allocation3] }
  0x27   : > { %s79_s20 = sshll.u32 %s77_s19, 4  ;;  %s89_s27 = sshll.u32 %s87_s21, 4  ;;  %s80_s20 = int_to_ptr.vmem [resolvable:$true] %s79_s20  ;;  %s90_s27 = int_to_ptr.vmem [resolvable:$true] %s89_s27 }
  0x28   : > { %s3315_s28 = scalar_lea.hbm %s3266_s22, 96  ;;  %p1562_p10 = scmp.lt.u32.totalorder %s3274_s25, %s4544_s0 }
  0x29   : > { %p1560_p9 = scmp.ne.s32.totalorder %s3274_s25, %s3315_s28  ;;  %p1563_p11 = scmp.lt.u32.totalorder %s3284_s29, %s3315_s28 }
  0x2a   : > { %p1565_p13 = scmp.lt.u32.totalorder %s3315_s28, %s3274_s25 }
  0x2b   : > { %p1564_p12 = por %p1563_p11, %p1562_p10 }
  0x2d   : > { %p1566_p0 = por %p1565_p13, %p1564_p12 }
  0x2f   : > { %p1567_p1 = pnand %p1566_p0, %p1560_p9 }
  0x31   : > { %1570 = shalt.err (!%p1567_p1)  }
  0x32   : > { %s1571_s3 = scalar_lea.vmem %s80_s20, 64  ;;  %p1576_p4 = scmp.lt.s32.totalorder %s80_s20, %s3296_s5 }
  0x33   : > { %p1572_p2 = scmp.ne.s32.totalorder %s80_s20, %s1571_s3  ;;  %p1577_p5 = scmp.lt.s32.totalorder %s3299_s11, %s1571_s3 }
  0x35   : > { %p1578_p8 = por %p1577_p5, %p1576_p4 }
  0x37   : > { %p1579_p3 = pnand %p1578_p8, %p1572_p2 }
  0x39   : > { %1582 = shalt.err (!%p1579_p3)  }
  0x3a   : > { %82 = dma.hbm_to_vmem [thread:$0]  %s3274_s25, 64, %s80_s20, [#allocation2], %s3201_s12, %s3201_s12, %s3202_s13 }
  0x3b   : > { %s1608_s4 = scalar_lea.hbm %s3266_s22, 128  ;;  %p1587_p10 = scmp.lt.u32.totalorder %s3277_s26, %s4544_s0 }
  0x3c   : > { %p1585_p9 = scmp.ne.s32.totalorder %s3277_s26, %s1608_s4  ;;  %p1588_p11 = scmp.lt.u32.totalorder %s3284_s29, %s1608_s4 }
  0x3d   : > { %p1590_p3 = scmp.lt.u32.totalorder %s1608_s4, %s3277_s26 }
  0x3e   : > { %p1589_p12 = por %p1588_p11, %p1587_p10 }
  0x40   : > { %p1591_p13 = por %p1590_p3, %p1589_p12 }
  0x42   : > { %p1592_p0 = pnand %p1591_p13, %p1585_p9 }
  0x44   : > { %1595 = shalt.err (!%p1592_p0)  }
  0x45   : > { %s1596_s30 = scalar_lea.vmem %s90_s27, 64  ;;  %p1601_p2 = scmp.lt.s32.totalorder %s90_s27, %s3296_s5 }
  0x46   : > { %p1597_p1 = scmp.ne.s32.totalorder %s90_s27, %s1596_s30  ;;  %p1602_p4 = scmp.lt.s32.totalorder %s3299_s11, %s1596_s30 }
  0x48   : > { %p1603_p5 = por %p1602_p4, %p1601_p2 }
  0x4a   : > { %p1604_p8 = pnand %p1603_p5, %p1597_p1 }
  0x4c   : > { %1607 = shalt.err (!%p1604_p8)  }
  0x4d   : > { %92 = dma.hbm_to_vmem [thread:$0]  %s3277_s26, 64, %s90_s27, [#allocation2], %s3201_s12, %s3201_s12, %s3202_s13 }
  0x4e   : > { %s97_s25 = scalar_lea.vmem %s3268_s23, 3 [#allocation3]  ;;  %s3349_s20 = scalar_lea.hbm %s3266_s22, 512 }
  0x4f   : > { %s99_s2 = sshll.u32 %s97_s25, 4  ;;  %s107_s3 = scalar_lea.vmem %s3268_s23, 4 [#allocation3]  ;;  %s100_s2 = int_to_ptr.vmem [resolvable:$true] %s99_s2 }
  0x50   : > { %s109_s4 = sshll.u32 %s107_s3, 4  ;;  %s1633_s19 = scalar_lea.hbm %s3266_s22, 160  ;;  %s110_s4 = int_to_ptr.vmem [resolvable:$true] %s109_s4 }
  0x51   : > { %p1610_p9 = scmp.ne.s32.totalorder %s3315_s28, %s1633_s19  ;;  %p1612_p10 = scmp.lt.u32.totalorder %s3315_s28, %s4544_s0 }
  0x52   : > { %p1613_p11 = scmp.lt.u32.totalorder %s3284_s29, %s1633_s19  ;;  %p1615_p3 = scmp.lt.u32.totalorder %s1633_s19, %s3315_s28 }
  0x54   : > { %p1614_p12 = por %p1613_p11, %p1612_p10 }
  0x56   : > { %p1616_p13 = por %p1615_p3, %p1614_p12 }
  0x58   : > { %p1617_p0 = pnand %p1616_p13, %p1610_p9 }
  0x5a   : > { %1620 = shalt.err (!%p1617_p0)  }
  0x5b   : > { %s1621_s26 = scalar_lea.vmem %s100_s2, 64  ;;  %p1626_p2 = scmp.lt.s32.totalorder %s100_s2, %s3296_s5 }
  0x5c   : > { %p1622_p1 = scmp.ne.s32.totalorder %s100_s2, %s1621_s26  ;;  %p1627_p4 = scmp.lt.s32.totalorder %s3299_s11, %s1621_s26 }
  0x5e   : > { %p1628_p5 = por %p1627_p4, %p1626_p2 }
  0x60   : > { %p1629_p8 = pnand %p1628_p5, %p1622_p1 }
  0x62   : > { %1632 = shalt.err (!%p1629_p8)  }
  0x63   : > { %102 = dma.hbm_to_vmem [thread:$0]  %s3315_s28, 64, %s100_s2, [#allocation2], %s3201_s12, %s3201_s12, %s3202_s13 }
  0x64   : > { %s3367_s27 = scalar_lea.hbm %s3266_s22, 544  ;;  %s3370_s25 = scalar_lea.hbm %s3266_s22, 576 }
  0x65   : > { %p1635_p9 = scmp.ne.s32.totalorder %s3349_s20, %s3370_s25  ;;  %p1637_p10 = scmp.lt.u32.totalorder %s3349_s20, %s4544_s0 }
  0x66   : > { %p1638_p11 = scmp.lt.u32.totalorder %s3284_s29, %s3370_s25  ;;  %p1640_p3 = scmp.lt.u32.totalorder %s3370_s25, %s3349_s20 }
  0x68   : > { %p1639_p12 = por %p1638_p11, %p1637_p10 }
  0x6a   : > { %p1641_p13 = por %p1640_p3, %p1639_p12 }
  0x6c   : > { %p1642_p0 = pnand %p1641_p13, %p1635_p9 }
  0x6e   : > { %1645 = shalt.err (!%p1642_p0)  }
  0x6f   : > { %s1646_s28 = scalar_lea.vmem %s110_s4, 64  ;;  %p1651_p2 = scmp.lt.s32.totalorder %s110_s4, %s3296_s5 }
  0x70   : > { %p1647_p1 = scmp.ne.s32.totalorder %s110_s4, %s1646_s28  ;;  %p1652_p4 = scmp.lt.s32.totalorder %s3299_s11, %s1646_s28 }
  0x72   : > { %p1653_p5 = por %p1652_p4, %p1651_p2 }
  0x74   : > { %p1654_p8 = pnand %p1653_p5, %p1647_p1 }
  0x76   : > { %1657 = shalt.err (!%p1654_p8)  }
  0x77   : > { %112 = dma.hbm_to_vmem [thread:$0]  %s3349_s20, 64, %s110_s4, [#allocation2], %s3201_s12, %s3201_s12, %s3202_s13 }
  0x78   : > { %s117_s2 = scalar_lea.vmem %s3268_s23, 5 [#allocation3]  ;;  %s127_s30 = scalar_lea.vmem %s3268_s23, 6 [#allocation3] }
  0x79   : > { %s119_s21 = sshll.u32 %s117_s2, 4  ;;  %s129_s26 = sshll.u32 %s127_s30, 4  ;;  %s120_s21 = int_to_ptr.vmem [resolvable:$true] %s119_s21  ;;  %s130_s26 = int_to_ptr.vmem [resolvable:$true] %s129_s26 }
  0x7a   : > { %s3391_s3 = scalar_lea.hbm %s3266_s22, 608  ;;  %p1662_p10 = scmp.lt.u32.totalorder %s3367_s27, %s4544_s0 }
  0x7b   : > { %p1660_p9 = scmp.ne.s32.totalorder %s3367_s27, %s3391_s3  ;;  %p1663_p11 = scmp.lt.u32.totalorder %s3284_s29, %s3391_s3 }
  0x7c   : > { %p1665_p3 = scmp.lt.u32.totalorder %s3391_s3, %s3367_s27 }
  0x7d   : > { %p1664_p12 = por %p1663_p11, %p1662_p10 }
  0x7f   : > { %p1666_p13 = por %p1665_p3, %p1664_p12 }
  0x81   : > { %p1667_p0 = pnand %p1666_p13, %p1660_p9 }
  0x83   : > { %1670 = shalt.err (!%p1667_p0)  }
  0x84   : > { %s1671_s20 = scalar_lea.vmem %s120_s21, 64  ;;  %p1676_p2 = scmp.lt.s32.totalorder %s120_s21, %s3296_s5 }
  0x85   : > { %p1672_p1 = scmp.ne.s32.totalorder %s120_s21, %s1671_s20  ;;  %p1677_p4 = scmp.lt.s32.totalorder %s3299_s11, %s1671_s20 }
  0x87   : > { %p1678_p5 = por %p1677_p4, %p1676_p2 }
  0x89   : > { %p1679_p8 = pnand %p1678_p5, %p1672_p1 }
  0x8b   : > { %1682 = shalt.err (!%p1679_p8)  }
  0x8c   : > { %122 = dma.hbm_to_vmem [thread:$0]  %s3367_s27, 64, %s120_s21, [#allocation2], %s3201_s12, %s3201_s12, %s3202_s13 }
  0x8d   : > { %s1708_s4 = scalar_lea.hbm %s3266_s22, 640  ;;  %p1687_p10 = scmp.lt.u32.totalorder %s3370_s25, %s4544_s0 }
  0x8e   : > { %p1685_p9 = scmp.ne.s32.totalorder %s3370_s25, %s1708_s4  ;;  %p1688_p11 = scmp.lt.u32.totalorder %s3284_s29, %s1708_s4 }
  0x8f   : > { %p1690_p3 = scmp.lt.u32.totalorder %s1708_s4, %s3370_s25 }
  0x90   : > { %p1689_p12 = por %p1688_p11, %p1687_p10 }
  0x92   : > { %p1691_p13 = por %p1690_p3, %p1689_p12 }
  0x94   : > { %p1692_p0 = pnand %p1691_p13, %p1685_p9 }
  0x96   : > { %1695 = shalt.err (!%p1692_p0)  }
  0x97   : > { %s1696_s19 = scalar_lea.vmem %s130_s26, 64  ;;  %p1701_p2 = scmp.lt.s32.totalorder %s130_s26, %s3296_s5 }
  0x98   : > { %p1697_p1 = scmp.ne.s32.totalorder %s130_s26, %s1696_s19  ;;  %p1702_p4 = scmp.lt.s32.totalorder %s3299_s11, %s1696_s19 }
  0x9a   : > { %p1703_p5 = por %p1702_p4, %p1701_p2 }
  0x9c   : > { %p1704_p8 = pnand %p1703_p5, %p1697_p1 }
  0x9e   : > { %1707 = shalt.err (!%p1704_p8)  }
  0x9f   : > { %132 = dma.hbm_to_vmem [thread:$0]  %s3370_s25, 64, %s130_s26, [#allocation2], %s3201_s12, %s3201_s12, %s3202_s13 }
  0xa0   : > { %s137_s27 = scalar_lea.vmem %s3268_s23, 7 [#allocation3]  ;;  %s3425_s21 = scalar_lea.hbm %s3266_s22, 1024 }
  0xa1   : > { %s139_s28 = sshll.u32 %s137_s27, 4  ;;  %s147_s20 = scalar_lea.vmem %s3268_s23, 32 [#allocation3]  ;;  %s140_s28 = int_to_ptr.vmem [resolvable:$true] %s139_s28 }
  0xa2   : > { %s149_s4 = sshll.u32 %s147_s20, 4  ;;  %s1733_s2 = scalar_lea.hbm %s3266_s22, 672  ;;  %s150_s4 = int_to_ptr.vmem [resolvable:$true] %s149_s4 }
  0xa3   : > { %p1710_p9 = scmp.ne.s32.totalorder %s3391_s3, %s1733_s2  ;;  %p1712_p10 = scmp.lt.u32.totalorder %s3391_s3, %s4544_s0 }
  0xa4   : > { %p1713_p11 = scmp.lt.u32.totalorder %s3284_s29, %s1733_s2  ;;  %p1715_p3 = scmp.lt.u32.totalorder %s1733_s2, %s3391_s3 }
  0xa6   : > { %p1714_p12 = por %p1713_p11, %p1712_p10 }
  0xa8   : > { %p1716_p13 = por %p1715_p3, %p1714_p12 }
  0xaa   : > { %p1717_p0 = pnand %p1716_p13, %p1710_p9 }
  0xac   : > { %1720 = shalt.err (!%p1717_p0)  }
  0xad   : > { %s1721_s25 = scalar_lea.vmem %s140_s28, 64  ;;  %p1726_p2 = scmp.lt.s32.totalorder %s140_s28, %s3296_s5 }
  0xae   : > { %p1722_p1 = scmp.ne.s32.totalorder %s140_s28, %s1721_s25  ;;  %p1727_p4 = scmp.lt.s32.totalorder %s3299_s11, %s1721_s25 }
  0xb0   : > { %p1728_p5 = por %p1727_p4, %p1726_p2 }
  0xb2   : > { %p1729_p8 = pnand %p1728_p5, %p1722_p1 }
  0xb4   : > { %1732 = shalt.err (!%p1729_p8)  }
  0xb5   : > { %142 = dma.hbm_to_vmem [thread:$0]  %s3391_s3, 64, %s140_s28, [#allocation2], %s3201_s12, %s3201_s12, %s3202_s13 }
  0xb6   : > { %s3443_s26 = scalar_lea.hbm %s3266_s22, 1056  ;;  %s3446_s27 = scalar_lea.hbm %s3266_s22, 1088 }
  0xb7   : > { %p1735_p9 = scmp.ne.s32.totalorder %s3425_s21, %s3446_s27  ;;  %p1737_p10 = scmp.lt.u32.totalorder %s3425_s21, %s4544_s0 }
  0xb8   : > { %p1738_p11 = scmp.lt.u32.totalorder %s3284_s29, %s3446_s27  ;;  %p1740_p3 = scmp.lt.u32.totalorder %s3446_s27, %s3425_s21 }
  0xba   : > { %p1739_p12 = por %p1738_p11, %p1737_p10 }
  0xbc   : > { %p1741_p13 = por %p1740_p3, %p1739_p12 }
  0xbe   : > { %p1742_p0 = pnand %p1741_p13, %p1735_p9 }
  0xc0   : > { %1745 = shalt.err (!%p1742_p0)  }
  0xc1   : > { %s1746_s3 = scalar_lea.vmem %s150_s4, 64  ;;  %p1751_p2 = scmp.lt.s32.totalorder %s150_s4, %s3296_s5 }
  0xc2   : > { %p1747_p1 = scmp.ne.s32.totalorder %s150_s4, %s1746_s3  ;;  %p1752_p4 = scmp.lt.s32.totalorder %s3299_s11, %s1746_s3 }
  0xc4   : > { %p1753_p5 = por %p1752_p4, %p1751_p2 }
  0xc6   : > { %p1754_p8 = pnand %p1753_p5, %p1747_p1 }
  0xc8   : > { %1757 = shalt.err (!%p1754_p8)  }
  0xc9   : > { %152 = dma.hbm_to_vmem [thread:$0]  %s3425_s21, 64, %s150_s4, [#allocation2], %s3201_s12, %s3201_s12, %s3202_s13 }
  0xca   : > { %s157_s28 = scalar_lea.vmem %s3268_s23, 33 [#allocation3]  ;;  %s167_s19 = scalar_lea.vmem %s3268_s23, 34 [#allocation3] }
  0xcb   : > { %s159_s30 = sshll.u32 %s157_s28, 4  ;;  %s169_s25 = sshll.u32 %s167_s19, 4  ;;  %s160_s30 = int_to_ptr.vmem [resolvable:$true] %s159_s30  ;;  %s170_s25 = int_to_ptr.vmem [resolvable:$true] %s169_s25 }
  0xcc   : > { %s3467_s20 = scalar_lea.hbm %s3266_s22, 1120  ;;  %p1762_p10 = scmp.lt.u32.totalorder %s3443_s26, %s4544_s0 }
  0xcd   : > { %p1760_p9 = scmp.ne.s32.totalorder %s3443_s26, %s3467_s20  ;;  %p1763_p11 = scmp.lt.u32.totalorder %s3284_s29, %s3467_s20 }
  0xce   : > { %p1765_p3 = scmp.lt.u32.totalorder %s3467_s20, %s3443_s26 }
  0xcf   : > { %p1764_p12 = por %p1763_p11, %p1762_p10 }
  0xd1   : > { %p1766_p13 = por %p1765_p3, %p1764_p12 }
  0xd3   : > { %p1767_p0 = pnand %p1766_p13, %p1760_p9 }
  0xd5   : > { %1770 = shalt.err (!%p1767_p0)  }
  0xd6   : > { %s1771_s21 = scalar_lea.vmem %s160_s30, 64  ;;  %p1776_p2 = scmp.lt.s32.totalorder %s160_s30, %s3296_s5 }
  0xd7   : > { %p1772_p1 = scmp.ne.s32.totalorder %s160_s30, %s1771_s21  ;;  %p1777_p4 = scmp.lt.s32.totalorder %s3299_s11, %s1771_s21 }
  0xd9   : > { %p1778_p5 = por %p1777_p4, %p1776_p2 }
  0xdb   : > { %p1779_p8 = pnand %p1778_p5, %p1772_p1 }
  0xdd   : > { %1782 = shalt.err (!%p1779_p8)  }
  0xde   : > { %162 = dma.hbm_to_vmem [thread:$0]  %s3443_s26, 64, %s160_s30, [#allocation2], %s3201_s12, %s3201_s12, %s3202_s13 }
  0xdf   : > { %s1808_s4 = scalar_lea.hbm %s3266_s22, 1152  ;;  %p1787_p10 = scmp.lt.u32.totalorder %s3446_s27, %s4544_s0 }
  0xe0   : > { %p1785_p9 = scmp.ne.s32.totalorder %s3446_s27, %s1808_s4  ;;  %p1788_p11 = scmp.lt.u32.totalorder %s3284_s29, %s1808_s4 }
  0xe1   : > { %p1790_p3 = scmp.lt.u32.totalorder %s1808_s4, %s3446_s27 }
  0xe2   : > { %p1789_p12 = por %p1788_p11, %p1787_p10 }
  0xe4   : > { %p1791_p13 = por %p1790_p3, %p1789_p12 }
  0xe6   : > { %p1792_p0 = pnand %p1791_p13, %p1785_p9 }
  0xe8   : > { %1795 = shalt.err (!%p1792_p0)  }
  0xe9   : > { %s1796_s2 = scalar_lea.vmem %s170_s25, 64  ;;  %p1801_p2 = scmp.lt.s32.totalorder %s170_s25, %s3296_s5 }
  0xea   : > { %p1797_p1 = scmp.ne.s32.totalorder %s170_s25, %s1796_s2  ;;  %p1802_p4 = scmp.lt.s32.totalorder %s3299_s11, %s1796_s2 }
  0xec   : > { %p1803_p5 = por %p1802_p4, %p1801_p2 }
  0xee   : > { %p1804_p8 = pnand %p1803_p5, %p1797_p1 }
  0xf0   : > { %1807 = shalt.err (!%p1804_p8)  }
  0xf1   : > { %172 = dma.hbm_to_vmem [thread:$0]  %s3446_s27, 64, %s170_s25, [#allocation2], %s3201_s12, %s3201_s12, %s3202_s13 }
  0xf2   : > { %s177_s26 = scalar_lea.vmem %s3268_s23, 35 [#allocation3]  ;;  %s3501_s30 = scalar_lea.hbm %s3266_s22, 1536 }
  0xf3   : > { %s179_s3 = sshll.u32 %s177_s26, 4  ;;  %s187_s21 = scalar_lea.vmem %s3268_s23, 36 [#allocation3]  ;;  %s180_s3 = int_to_ptr.vmem [resolvable:$true] %s179_s3 }
  0xf4   : > { %s189_s4 = sshll.u32 %s187_s21, 4  ;;  %s1833_s28 = scalar_lea.hbm %s3266_s22, 1184  ;;  %s190_s4 = int_to_ptr.vmem [resolvable:$true] %s189_s4 }
  0xf5   : > { %p1810_p9 = scmp.ne.s32.totalorder %s3467_s20, %s1833_s28  ;;  %p1812_p10 = scmp.lt.u32.totalorder %s3467_s20, %s4544_s0 }
  0xf6   : > { %p1813_p11 = scmp.lt.u32.totalorder %s3284_s29, %s1833_s28  ;;  %p1815_p3 = scmp.lt.u32.totalorder %s1833_s28, %s3467_s20 }
  0xf8   : > { %p1814_p12 = por %p1813_p11, %p1812_p10 }
  0xfa   : > { %p1816_p13 = por %p1815_p3, %p1814_p12 }
  0xfc   : > { %p1817_p0 = pnand %p1816_p13, %p1810_p9 }
  0xfe   : > { %1820 = shalt.err (!%p1817_p0)  }
  0xff   : > { %s1821_s27 = scalar_lea.vmem %s180_s3, 64  ;;  %p1826_p2 = scmp.lt.s32.totalorder %s180_s3, %s3296_s5 }
 0x100   : > { %p1822_p1 = scmp.ne.s32.totalorder %s180_s3, %s1821_s27  ;;  %p1827_p4 = scmp.lt.s32.totalorder %s3299_s11, %s1821_s27 }
 0x102   : > { %p1828_p5 = por %p1827_p4, %p1826_p2 }
 0x104   : > { %p1829_p8 = pnand %p1828_p5, %p1822_p1 }
 0x106   : > { %1832 = shalt.err (!%p1829_p8)  }
 0x107   : > { %182 = dma.hbm_to_vmem [thread:$0]  %s3467_s20, 64, %s180_s3, [#allocation2], %s3201_s12, %s3201_s12, %s3202_s13 }
 0x108   : > { %s3519_s25 = scalar_lea.hbm %s3266_s22, 1568  ;;  %s3522_s26 = scalar_lea.hbm %s3266_s22, 1600 }
 0x109   : > { %p1835_p9 = scmp.ne.s32.totalorder %s3501_s30, %s3522_s26  ;;  %p1837_p10 = scmp.lt.u32.totalorder %s3501_s30, %s4544_s0 }
 0x10a   : > { %p1838_p11 = scmp.lt.u32.totalorder %s3284_s29, %s3522_s26  ;;  %p1840_p3 = scmp.lt.u32.totalorder %s3522_s26, %s3501_s30 }
 0x10c   : > { %p1839_p12 = por %p1838_p11, %p1837_p10 }
 0x10e   : > { %p1841_p13 = por %p1840_p3, %p1839_p12 }
 0x110   : > { %p1842_p0 = pnand %p1841_p13, %p1835_p9 }
 0x112   : > { %1845 = shalt.err (!%p1842_p0)  }
 0x113   : > { %s1846_s20 = scalar_lea.vmem %s190_s4, 64  ;;  %p1851_p2 = scmp.lt.s32.totalorder %s190_s4, %s3296_s5 }
 0x114   : > { %p1847_p1 = scmp.ne.s32.totalorder %s190_s4, %s1846_s20  ;;  %p1852_p4 = scmp.lt.s32.totalorder %s3299_s11, %s1846_s20 }
 0x116   : > { %p1853_p5 = por %p1852_p4, %p1851_p2 }
 0x118   : > { %p1854_p8 = pnand %p1853_p5, %p1847_p1 }
 0x11a   : > { %1857 = shalt.err (!%p1854_p8)  }
 0x11b   : > { %192 = dma.hbm_to_vmem [thread:$0]  %s3501_s30, 64, %s190_s4, [#allocation2], %s3201_s12, %s3201_s12, %s3202_s13 }
 0x11c   : > { %s197_s3 = scalar_lea.vmem %s3268_s23, 37 [#allocation3]  ;;  %s207_s2 = scalar_lea.vmem %s3268_s23, 38 [#allocation3] }
 0x11d   : > { %s199_s19 = sshll.u32 %s197_s3, 4  ;;  %s209_s27 = sshll.u32 %s207_s2, 4  ;;  %s200_s19 = int_to_ptr.vmem [resolvable:$true] %s199_s19  ;;  %s210_s27 = int_to_ptr.vmem [resolvable:$true] %s209_s27 }
 0x11e   : > { %s3543_s21 = scalar_lea.hbm %s3266_s22, 1632  ;;  %p1862_p10 = scmp.lt.u32.totalorder %s3519_s25, %s4544_s0 }
 0x11f   : > { %p1860_p9 = scmp.ne.s32.totalorder %s3519_s25, %s3543_s21  ;;  %p1863_p11 = scmp.lt.u32.totalorder %s3284_s29, %s3543_s21 }
 0x120   : > { %p1865_p3 = scmp.lt.u32.totalorder %s3543_s21, %s3519_s25 }
 0x121   : > { %p1864_p12 = por %p1863_p11, %p1862_p10 }
 0x123   : > { %p1866_p13 = por %p1865_p3, %p1864_p12 }
 0x125   : > { %p1867_p0 = pnand %p1866_p13, %p1860_p9 }
 0x127   : > { %1870 = shalt.err (!%p1867_p0)  }
 0x128   : > { %s1871_s30 = scalar_lea.vmem %s200_s19, 64  ;;  %p1876_p2 = scmp.lt.s32.totalorder %s200_s19, %s3296_s5 }
 0x129   : > { %p1872_p1 = scmp.ne.s32.totalorder %s200_s19, %s1871_s30  ;;  %p1877_p4 = scmp.lt.s32.totalorder %s3299_s11, %s1871_s30 }
 0x12b   : > { %p1878_p5 = por %p1877_p4, %p1876_p2 }
 0x12d   : > { %p1879_p8 = pnand %p1878_p5, %p1872_p1 }
 0x12f   : > { %1882 = shalt.err (!%p1879_p8)  }
 0x130   : > { %202 = dma.hbm_to_vmem [thread:$0]  %s3519_s25, 64, %s200_s19, [#allocation2], %s3201_s12, %s3201_s12, %s3202_s13 }
 0x131   : > { %s1908_s4 = scalar_lea.hbm %s3266_s22, 1664  ;;  %p1887_p10 = scmp.lt.u32.totalorder %s3522_s26, %s4544_s0 }
 0x132   : > { %p1885_p9 = scmp.ne.s32.totalorder %s3522_s26, %s1908_s4  ;;  %p1888_p11 = scmp.lt.u32.totalorder %s3284_s29, %s1908_s4 }
 0x133   : > { %p1890_p3 = scmp.lt.u32.totalorder %s1908_s4, %s3522_s26 }
 0x134   : > { %p1889_p12 = por %p1888_p11, %p1887_p10 }
 0x136   : > { %p1891_p13 = por %p1890_p3, %p1889_p12 }
 0x138   : > { %p1892_p0 = pnand %p1891_p13, %p1885_p9 }
 0x13a   : > { %1895 = shalt.err (!%p1892_p0)  }
 0x13b   : > { %s1896_s28 = scalar_lea.vmem %s210_s27, 64  ;;  %p1901_p2 = scmp.lt.s32.totalorder %s210_s27, %s3296_s5 }
 0x13c   : > { %p1897_p1 = scmp.ne.s32.totalorder %s210_s27, %s1896_s28  ;;  %p1902_p4 = scmp.lt.s32.totalorder %s3299_s11, %s1896_s28 }
 0x13e   : > { %p1903_p5 = por %p1902_p4, %p1901_p2 }
 0x140   : > { %p1904_p8 = pnand %p1903_p5, %p1897_p1 }
 0x142   : > { %1907 = shalt.err (!%p1904_p8)  }
 0x143   : > { %212 = dma.hbm_to_vmem [thread:$0]  %s3522_s26, 64, %s210_s27, [#allocation2], %s3201_s12, %s3201_s12, %s3202_s13 }
 0x144   : > { %s217_s25 = scalar_lea.vmem %s3268_s23, 39 [#allocation3]  ;;  %s3577_s19 = scalar_lea.hbm %s3266_s22, 2048 }
 0x145   : > { %s219_s20 = sshll.u32 %s217_s25, 4  ;;  %s227_s30 = scalar_lea.vmem %s3268_s23, 64 [#allocation3]  ;;  %s220_s20 = int_to_ptr.vmem [resolvable:$true] %s219_s20 }
 0x146   : > { %s229_s4 = sshll.u32 %s227_s30, 4  ;;  %s1933_s3 = scalar_lea.hbm %s3266_s22, 1696  ;;  %s230_s4 = int_to_ptr.vmem [resolvable:$true] %s229_s4 }
 0x147   : > { %p1910_p9 = scmp.ne.s32.totalorder %s3543_s21, %s1933_s3  ;;  %p1912_p10 = scmp.lt.u32.totalorder %s3543_s21, %s4544_s0 }
 0x148   : > { %p1913_p11 = scmp.lt.u32.totalorder %s3284_s29, %s1933_s3  ;;  %p1915_p3 = scmp.lt.u32.totalorder %s1933_s3, %s3543_s21 }
 0x14a   : > { %p1914_p12 = por %p1913_p11, %p1912_p10 }
 0x14c   : > { %p1916_p13 = por %p1915_p3, %p1914_p12 }
 0x14e   : > { %p1917_p0 = pnand %p1916_p13, %p1910_p9 }
 0x150   : > { %1920 = shalt.err (!%p1917_p0)  }
 0x151   : > { %s1921_s26 = scalar_lea.vmem %s220_s20, 64  ;;  %p1926_p2 = scmp.lt.s32.totalorder %s220_s20, %s3296_s5 }
 0x152   : > { %p1922_p1 = scmp.ne.s32.totalorder %s220_s20, %s1921_s26  ;;  %p1927_p4 = scmp.lt.s32.totalorder %s3299_s11, %s1921_s26 }
 0x154   : > { %p1928_p5 = por %p1927_p4, %p1926_p2 }
 0x156   : > { %p1929_p8 = pnand %p1928_p5, %p1922_p1 }
 0x158   : > { %1932 = shalt.err (!%p1929_p8)  }
 0x159   : > { %222 = dma.hbm_to_vmem [thread:$0]  %s3543_s21, 64, %s220_s20, [#allocation2], %s3201_s12, %s3201_s12, %s3202_s13 }
 0x15a   : > { %s3595_s27 = scalar_lea.hbm %s3266_s22, 2080  ;;  %s3598_s25 = scalar_lea.hbm %s3266_s22, 2112 }
 0x15b   : > { %p1935_p9 = scmp.ne.s32.totalorder %s3577_s19, %s3598_s25  ;;  %p1937_p10 = scmp.lt.u32.totalorder %s3577_s19, %s4544_s0 }
 0x15c   : > { %p1938_p11 = scmp.lt.u32.totalorder %s3284_s29, %s3598_s25  ;;  %p1940_p3 = scmp.lt.u32.totalorder %s3598_s25, %s3577_s19 }
 0x15e   : > { %p1939_p12 = por %p1938_p11, %p1937_p10 }
 0x160   : > { %p1941_p13 = por %p1940_p3, %p1939_p12 }
 0x162   : > { %p1942_p0 = pnand %p1941_p13, %p1935_p9 }
 0x164   : > { %1945 = shalt.err (!%p1942_p0)  }
 0x165   : > { %s1946_s21 = scalar_lea.vmem %s230_s4, 64  ;;  %p1951_p2 = scmp.lt.s32.totalorder %s230_s4, %s3296_s5 }
 0x166   : > { %p1947_p1 = scmp.ne.s32.totalorder %s230_s4, %s1946_s21  ;;  %p1952_p4 = scmp.lt.s32.totalorder %s3299_s11, %s1946_s21 }
 0x168   : > { %p1953_p5 = por %p1952_p4, %p1951_p2 }
 0x16a   : > { %p1954_p8 = pnand %p1953_p5, %p1947_p1 }
 0x16c   : > { %1957 = shalt.err (!%p1954_p8)  }
 0x16d   : > { %232 = dma.hbm_to_vmem [thread:$0]  %s3577_s19, 64, %s230_s4, [#allocation2], %s3201_s12, %s3201_s12, %s3202_s13 }
 0x16e   : > { %s237_s20 = scalar_lea.vmem %s3268_s23, 65 [#allocation3]  ;;  %s247_s28 = scalar_lea.vmem %s3268_s23, 66 [#allocation3] }
 0x16f   : > { %s239_s2 = sshll.u32 %s237_s20, 4  ;;  %s249_s26 = sshll.u32 %s247_s28, 4  ;;  %s240_s2 = int_to_ptr.vmem [resolvable:$true] %s239_s2  ;;  %s250_s26 = int_to_ptr.vmem [resolvable:$true] %s249_s26 }
 0x170   : > { %s3619_s30 = scalar_lea.hbm %s3266_s22, 2144  ;;  %p1962_p10 = scmp.lt.u32.totalorder %s3595_s27, %s4544_s0 }
 0x171   : > { %p1960_p9 = scmp.ne.s32.totalorder %s3595_s27, %s3619_s30  ;;  %p1963_p11 = scmp.lt.u32.totalorder %s3284_s29, %s3619_s30 }
 0x172   : > { %p1965_p3 = scmp.lt.u32.totalorder %s3619_s30, %s3595_s27 }
 0x173   : > { %p1964_p12 = por %p1963_p11, %p1962_p10 }
 0x175   : > { %p1966_p13 = por %p1965_p3, %p1964_p12 }
 0x177   : > { %p1967_p0 = pnand %p1966_p13, %p1960_p9 }
 0x179   : > { %1970 = shalt.err (!%p1967_p0)  }
 0x17a   : > { %s1971_s19 = scalar_lea.vmem %s240_s2, 64  ;;  %p1976_p2 = scmp.lt.s32.totalorder %s240_s2, %s3296_s5 }
 0x17b   : > { %p1972_p1 = scmp.ne.s32.totalorder %s240_s2, %s1971_s19  ;;  %p1977_p4 = scmp.lt.s32.totalorder %s3299_s11, %s1971_s19 }
 0x17d   : > { %p1978_p5 = por %p1977_p4, %p1976_p2 }
 0x17f   : > { %p1979_p8 = pnand %p1978_p5, %p1972_p1 }
 0x181   : > { %1982 = shalt.err (!%p1979_p8)  }
 0x182   : > { %242 = dma.hbm_to_vmem [thread:$0]  %s3595_s27, 64, %s240_s2, [#allocation2], %s3201_s12, %s3201_s12, %s3202_s13 }
 0x183   : > { %s2008_s4 = scalar_lea.hbm %s3266_s22, 2176  ;;  %p1987_p10 = scmp.lt.u32.totalorder %s3598_s25, %s4544_s0 }
 0x184   : > { %p1985_p9 = scmp.ne.s32.totalorder %s3598_s25, %s2008_s4  ;;  %p1988_p11 = scmp.lt.u32.totalorder %s3284_s29, %s2008_s4 }
 0x185   : > { %p1990_p3 = scmp.lt.u32.totalorder %s2008_s4, %s3598_s25 }
 0x186   : > { %p1989_p12 = por %p1988_p11, %p1987_p10 }
 0x188   : > { %p1991_p13 = por %p1990_p3, %p1989_p12 }
 0x18a   : > { %p1992_p0 = pnand %p1991_p13, %p1985_p9 }
 0x18c   : > { %1995 = shalt.err (!%p1992_p0)  }
 0x18d   : > { %s1996_s3 = scalar_lea.vmem %s250_s26, 64  ;;  %p2001_p2 = scmp.lt.s32.totalorder %s250_s26, %s3296_s5 }
 0x18e   : > { %p1997_p1 = scmp.ne.s32.totalorder %s250_s26, %s1996_s3  ;;  %p2002_p4 = scmp.lt.s32.totalorder %s3299_s11, %s1996_s3 }
 0x190   : > { %p2003_p5 = por %p2002_p4, %p2001_p2 }
 0x192   : > { %p2004_p8 = pnand %p2003_p5, %p1997_p1 }
 0x194   : > { %2007 = shalt.err (!%p2004_p8)  }
 0x195   : > { %252 = dma.hbm_to_vmem [thread:$0]  %s3598_s25, 64, %s250_s26, [#allocation2], %s3201_s12, %s3201_s12, %s3202_s13 }
 0x196   : > { %s257_s27 = scalar_lea.vmem %s3268_s23, 67 [#allocation3]  ;;  %s3653_s2 = scalar_lea.hbm %s3266_s22, 2560 }
 0x197   : > { %s259_s21 = sshll.u32 %s257_s27, 4  ;;  %s267_s19 = scalar_lea.vmem %s3268_s23, 68 [#allocation3]  ;;  %s260_s21 = int_to_ptr.vmem [resolvable:$true] %s259_s21 }
 0x198   : > { %s269_s4 = sshll.u32 %s267_s19, 4  ;;  %s2033_s20 = scalar_lea.hbm %s3266_s22, 2208  ;;  %s270_s4 = int_to_ptr.vmem [resolvable:$true] %s269_s4 }
 0x199   : > { %p2010_p9 = scmp.ne.s32.totalorder %s3619_s30, %s2033_s20  ;;  %p2012_p10 = scmp.lt.u32.totalorder %s3619_s30, %s4544_s0 }
 0x19a   : > { %p2013_p11 = scmp.lt.u32.totalorder %s3284_s29, %s2033_s20  ;;  %p2015_p3 = scmp.lt.u32.totalorder %s2033_s20, %s3619_s30 }
 0x19c   : > { %p2014_p12 = por %p2013_p11, %p2012_p10 }
 0x19e   : > { %p2016_p13 = por %p2015_p3, %p2014_p12 }
 0x1a0   : > { %p2017_p0 = pnand %p2016_p13, %p2010_p9 }
 0x1a2   : > { %2020 = shalt.err (!%p2017_p0)  }
 0x1a3   : > { %s2021_s25 = scalar_lea.vmem %s260_s21, 64  ;;  %p2026_p2 = scmp.lt.s32.totalorder %s260_s21, %s3296_s5 }
 0x1a4   : > { %p2022_p1 = scmp.ne.s32.totalorder %s260_s21, %s2021_s25  ;;  %p2027_p4 = scmp.lt.s32.totalorder %s3299_s11, %s2021_s25 }
 0x1a6   : > { %p2028_p5 = por %p2027_p4, %p2026_p2 }
 0x1a8   : > { %p2029_p8 = pnand %p2028_p5, %p2022_p1 }
 0x1aa   : > { %2032 = shalt.err (!%p2029_p8)  }
 0x1ab   : > { %262 = dma.hbm_to_vmem [thread:$0]  %s3619_s30, 64, %s260_s21, [#allocation2], %s3201_s12, %s3201_s12, %s3202_s13 }
 0x1ac   : > { %s3671_s26 = scalar_lea.hbm %s3266_s22, 2592  ;;  %s3674_s27 = scalar_lea.hbm %s3266_s22, 2624 }
 0x1ad   : > { %p2035_p9 = scmp.ne.s32.totalorder %s3653_s2, %s3674_s27  ;;  %p2037_p10 = scmp.lt.u32.totalorder %s3653_s2, %s4544_s0 }
 0x1ae   : > { %p2038_p11 = scmp.lt.u32.totalorder %s3284_s29, %s3674_s27  ;;  %p2040_p3 = scmp.lt.u32.totalorder %s3674_s27, %s3653_s2 }
 0x1b0   : > { %p2039_p12 = por %p2038_p11, %p2037_p10 }
 0x1b2   : > { %p2041_p13 = por %p2040_p3, %p2039_p12 }
 0x1b4   : > { %p2042_p0 = pnand %p2041_p13, %p2035_p9 }
 0x1b6   : > { %2045 = shalt.err (!%p2042_p0)  }
 0x1b7   : > { %s2046_s30 = scalar_lea.vmem %s270_s4, 64  ;;  %p2051_p2 = scmp.lt.s32.totalorder %s270_s4, %s3296_s5 }
 0x1b8   : > { %p2047_p1 = scmp.ne.s32.totalorder %s270_s4, %s2046_s30  ;;  %p2052_p4 = scmp.lt.s32.totalorder %s3299_s11, %s2046_s30 }
 0x1ba   : > { %p2053_p5 = por %p2052_p4, %p2051_p2 }
 0x1bc   : > { %p2054_p8 = pnand %p2053_p5, %p2047_p1 }
 0x1be   : > { %2057 = shalt.err (!%p2054_p8)  }
 0x1bf   : > { %272 = dma.hbm_to_vmem [thread:$0]  %s3653_s2, 64, %s270_s4, [#allocation2], %s3201_s12, %s3201_s12, %s3202_s13 }
 0x1c0   : > { %s277_s21 = scalar_lea.vmem %s3268_s23, 69 [#allocation3]  ;;  %s287_s3 = scalar_lea.vmem %s3268_s23, 70 [#allocation3] }
 0x1c1   : > { %s279_s28 = sshll.u32 %s277_s21, 4  ;;  %s289_s25 = sshll.u32 %s287_s3, 4  ;;  %s280_s28 = int_to_ptr.vmem [resolvable:$true] %s279_s28  ;;  %s290_s25 = int_to_ptr.vmem [resolvable:$true] %s289_s25 }
 0x1c2   : > { %s3695_s19 = scalar_lea.hbm %s3266_s22, 2656  ;;  %p2062_p10 = scmp.lt.u32.totalorder %s3671_s26, %s4544_s0 }
 0x1c3   : > { %p2060_p9 = scmp.ne.s32.totalorder %s3671_s26, %s3695_s19  ;;  %p2063_p11 = scmp.lt.u32.totalorder %s3284_s29, %s3695_s19 }
 0x1c4   : > { %p2065_p3 = scmp.lt.u32.totalorder %s3695_s19, %s3671_s26 }
 0x1c5   : > { %p2064_p12 = por %p2063_p11, %p2062_p10 }
 0x1c7   : > { %p2066_p13 = por %p2065_p3, %p2064_p12 }
 0x1c9   : > { %p2067_p0 = pnand %p2066_p13, %p2060_p9 }
 0x1cb   : > { %2070 = shalt.err (!%p2067_p0)  }
 0x1cc   : > { %s2071_s2 = scalar_lea.vmem %s280_s28, 64  ;;  %p2076_p2 = scmp.lt.s32.totalorder %s280_s28, %s3296_s5 }
 0x1cd   : > { %p2072_p1 = scmp.ne.s32.totalorder %s280_s28, %s2071_s2  ;;  %p2077_p4 = scmp.lt.s32.totalorder %s3299_s11, %s2071_s2 }
 0x1cf   : > { %p2078_p5 = por %p2077_p4, %p2076_p2 }
 0x1d1   : > { %p2079_p8 = pnand %p2078_p5, %p2072_p1 }
 0x1d3   : > { %2082 = shalt.err (!%p2079_p8)  }
 0x1d4   : > { %282 = dma.hbm_to_vmem [thread:$0]  %s3671_s26, 64, %s280_s28, [#allocation2], %s3201_s12, %s3201_s12, %s3202_s13 }
 0x1d5   : > { %s2108_s4 = scalar_lea.hbm %s3266_s22, 2688  ;;  %p2087_p10 = scmp.lt.u32.totalorder %s3674_s27, %s4544_s0 }
 0x1d6   : > { %p2085_p9 = scmp.ne.s32.totalorder %s3674_s27, %s2108_s4  ;;  %p2088_p11 = scmp.lt.u32.totalorder %s3284_s29, %s2108_s4 }
 0x1d7   : > { %p2090_p3 = scmp.lt.u32.totalorder %s2108_s4, %s3674_s27 }
 0x1d8   : > { %p2089_p12 = por %p2088_p11, %p2087_p10 }
 0x1da   : > { %p2091_p13 = por %p2090_p3, %p2089_p12 }
 0x1dc   : > { %p2092_p0 = pnand %p2091_p13, %p2085_p9 }
 0x1de   : > { %2095 = shalt.err (!%p2092_p0)  }
 0x1df   : > { %s2096_s20 = scalar_lea.vmem %s290_s25, 64  ;;  %p2101_p2 = scmp.lt.s32.totalorder %s290_s25, %s3296_s5 }
 0x1e0   : > { %p2097_p1 = scmp.ne.s32.totalorder %s290_s25, %s2096_s20  ;;  %p2102_p4 = scmp.lt.s32.totalorder %s3299_s11, %s2096_s20 }
 0x1e2   : > { %p2103_p5 = por %p2102_p4, %p2101_p2 }
 0x1e4   : > { %p2104_p8 = pnand %p2103_p5, %p2097_p1 }
 0x1e6   : > { %2107 = shalt.err (!%p2104_p8)  }
 0x1e7   : > { %292 = dma.hbm_to_vmem [thread:$0]  %s3674_s27, 64, %s290_s25, [#allocation2], %s3201_s12, %s3201_s12, %s3202_s13 }
 0x1e8   : > { %s297_s26 = scalar_lea.vmem %s3268_s23, 71 [#allocation3]  ;;  %s3729_s28 = scalar_lea.hbm %s3266_s22, 3072 }
 0x1e9   : > { %s299_s30 = sshll.u32 %s297_s26, 4  ;;  %s307_s2 = scalar_lea.vmem %s3268_s23, 96 [#allocation3]  ;;  %s300_s30 = int_to_ptr.vmem [resolvable:$true] %s299_s30 }
 0x1ea   : > { %s309_s4 = sshll.u32 %s307_s2, 4  ;;  %s2133_s21 = scalar_lea.hbm %s3266_s22, 2720  ;;  %s310_s4 = int_to_ptr.vmem [resolvable:$true] %s309_s4 }
 0x1eb   : > { %p2110_p9 = scmp.ne.s32.totalorder %s3695_s19, %s2133_s21  ;;  %p2112_p10 = scmp.lt.u32.totalorder %s3695_s19, %s4544_s0 }
 0x1ec   : > { %p2113_p11 = scmp.lt.u32.totalorder %s3284_s29, %s2133_s21  ;;  %p2115_p3 = scmp.lt.u32.totalorder %s2133_s21, %s3695_s19 }
 0x1ee   : > { %p2114_p12 = por %p2113_p11, %p2112_p10 }
 0x1f0   : > { %p2116_p13 = por %p2115_p3, %p2114_p12 }
 0x1f2   : > { %p2117_p0 = pnand %p2116_p13, %p2110_p9 }
 0x1f4   : > { %2120 = shalt.err (!%p2117_p0)  }
 0x1f5   : > { %s2121_s27 = scalar_lea.vmem %s300_s30, 64  ;;  %p2126_p2 = scmp.lt.s32.totalorder %s300_s30, %s3296_s5 }
 0x1f6   : > { %p2122_p1 = scmp.ne.s32.totalorder %s300_s30, %s2121_s27  ;;  %p2127_p4 = scmp.lt.s32.totalorder %s3299_s11, %s2121_s27 }
 0x1f8   : > { %p2128_p5 = por %p2127_p4, %p2126_p2 }
 0x1fa   : > { %p2129_p8 = pnand %p2128_p5, %p2122_p1 }
 0x1fc   : > { %2132 = shalt.err (!%p2129_p8)  }
 0x1fd   : > { %302 = dma.hbm_to_vmem [thread:$0]  %s3695_s19, 64, %s300_s30, [#allocation2], %s3201_s12, %s3201_s12, %s3202_s13 }
 0x1fe   : > { %s3747_s25 = scalar_lea.hbm %s3266_s22, 3104  ;;  %s3750_s26 = scalar_lea.hbm %s3266_s22, 3136 }
 0x1ff   : > { %p2135_p9 = scmp.ne.s32.totalorder %s3729_s28, %s3750_s26  ;;  %p2137_p10 = scmp.lt.u32.totalorder %s3729_s28, %s4544_s0 }
 0x200   : > { %p2138_p11 = scmp.lt.u32.totalorder %s3284_s29, %s3750_s26  ;;  %p2140_p3 = scmp.lt.u32.totalorder %s3750_s26, %s3729_s28 }
 0x202   : > { %p2139_p12 = por %p2138_p11, %p2137_p10 }
 0x204   : > { %p2141_p13 = por %p2140_p3, %p2139_p12 }
 0x206   : > { %p2142_p0 = pnand %p2141_p13, %p2135_p9 }
 0x208   : > { %2145 = shalt.err (!%p2142_p0)  }
 0x209   : > { %s2146_s19 = scalar_lea.vmem %s310_s4, 64  ;;  %p2151_p2 = scmp.lt.s32.totalorder %s310_s4, %s3296_s5 }
 0x20a   : > { %p2147_p1 = scmp.ne.s32.totalorder %s310_s4, %s2146_s19  ;;  %p2152_p4 = scmp.lt.s32.totalorder %s3299_s11, %s2146_s19 }
 0x20c   : > { %p2153_p5 = por %p2152_p4, %p2151_p2 }
 0x20e   : > { %p2154_p8 = pnand %p2153_p5, %p2147_p1 }
 0x210   : > { %2157 = shalt.err (!%p2154_p8)  }
 0x211   : > { %312 = dma.hbm_to_vmem [thread:$0]  %s3729_s28, 64, %s310_s4, [#allocation2], %s3201_s12, %s3201_s12, %s3202_s13 }
 0x212   : > { %s317_s30 = scalar_lea.vmem %s3268_s23, 97 [#allocation3]  ;;  %s327_s20 = scalar_lea.vmem %s3268_s23, 98 [#allocation3] }
 0x213   : > { %s319_s3 = sshll.u32 %s317_s30, 4  ;;  %s329_s27 = sshll.u32 %s327_s20, 4  ;;  %s320_s3 = int_to_ptr.vmem [resolvable:$true] %s319_s3  ;;  %s330_s27 = int_to_ptr.vmem [resolvable:$true] %s329_s27 }
 0x214   : > { %s3771_s2 = scalar_lea.hbm %s3266_s22, 3168  ;;  %p2162_p10 = scmp.lt.u32.totalorder %s3747_s25, %s4544_s0 }
 0x215   : > { %p2160_p9 = scmp.ne.s32.totalorder %s3747_s25, %s3771_s2  ;;  %p2163_p11 = scmp.lt.u32.totalorder %s3284_s29, %s3771_s2 }
 0x216   : > { %p2165_p3 = scmp.lt.u32.totalorder %s3771_s2, %s3747_s25 }
 0x217   : > { %p2164_p12 = por %p2163_p11, %p2162_p10 }
 0x219   : > { %p2166_p13 = por %p2165_p3, %p2164_p12 }
 0x21b   : > { %p2167_p0 = pnand %p2166_p13, %p2160_p9 }
 0x21d   : > { %2170 = shalt.err (!%p2167_p0)  }
 0x21e   : > { %s2171_s28 = scalar_lea.vmem %s320_s3, 64  ;;  %p2176_p2 = scmp.lt.s32.totalorder %s320_s3, %s3296_s5 }
 0x21f   : > { %p2172_p1 = scmp.ne.s32.totalorder %s320_s3, %s2171_s28  ;;  %p2177_p4 = scmp.lt.s32.totalorder %s3299_s11, %s2171_s28 }
 0x221   : > { %p2178_p5 = por %p2177_p4, %p2176_p2 }
 0x223   : > { %p2179_p8 = pnand %p2178_p5, %p2172_p1 }
 0x225   : > { %2182 = shalt.err (!%p2179_p8)  }
 0x226   : > { %322 = dma.hbm_to_vmem [thread:$0]  %s3747_s25, 64, %s320_s3, [#allocation2], %s3201_s12, %s3201_s12, %s3202_s13 }
 0x227   : > { %s2208_s4 = scalar_lea.hbm %s3266_s22, 3200  ;;  %p2187_p10 = scmp.lt.u32.totalorder %s3750_s26, %s4544_s0 }
 0x228   : > { %p2185_p9 = scmp.ne.s32.totalorder %s3750_s26, %s2208_s4  ;;  %p2188_p11 = scmp.lt.u32.totalorder %s3284_s29, %s2208_s4 }
 0x229   : > { %p2190_p3 = scmp.lt.u32.totalorder %s2208_s4, %s3750_s26 }
 0x22a   : > { %p2189_p12 = por %p2188_p11, %p2187_p10 }
 0x22c   : > { %p2191_p13 = por %p2190_p3, %p2189_p12 }
 0x22e   : > { %p2192_p0 = pnand %p2191_p13, %p2185_p9 }
 0x230   : > { %2195 = shalt.err (!%p2192_p0)  }
 0x231   : > { %s2196_s21 = scalar_lea.vmem %s330_s27, 64  ;;  %p2201_p2 = scmp.lt.s32.totalorder %s330_s27, %s3296_s5 }
 0x232   : > { %p2197_p1 = scmp.ne.s32.totalorder %s330_s27, %s2196_s21  ;;  %p2202_p4 = scmp.lt.s32.totalorder %s3299_s11, %s2196_s21 }
 0x234   : > { %p2203_p5 = por %p2202_p4, %p2201_p2 }
 0x236   : > { %p2204_p8 = pnand %p2203_p5, %p2197_p1 }
 0x238   : > { %2207 = shalt.err (!%p2204_p8)  }
 0x239   : > { %332 = dma.hbm_to_vmem [thread:$0]  %s3750_s26, 64, %s330_s27, [#allocation2], %s3201_s12, %s3201_s12, %s3202_s13 }
 0x23a   : > { %s337_s25 = scalar_lea.vmem %s3268_s23, 99 [#allocation3]  ;;  %s3805_s3 = scalar_lea.hbm %s3266_s22, 3584 }
 0x23b   : > { %s339_s19 = sshll.u32 %s337_s25, 4  ;;  %s347_s28 = scalar_lea.vmem %s3268_s23, 100 [#allocation3]  ;;  %s340_s19 = int_to_ptr.vmem [resolvable:$true] %s339_s19 }
 0x23c   : > { %s349_s4 = sshll.u32 %s347_s28, 4  ;;  %s2233_s30 = scalar_lea.hbm %s3266_s22, 3232  ;;  %s350_s4 = int_to_ptr.vmem [resolvable:$true] %s349_s4 }
 0x23d   : > { %p2210_p9 = scmp.ne.s32.totalorder %s3771_s2, %s2233_s30  ;;  %p2212_p10 = scmp.lt.u32.totalorder %s3771_s2, %s4544_s0 }
 0x23e   : > { %p2213_p11 = scmp.lt.u32.totalorder %s3284_s29, %s2233_s30  ;;  %p2215_p3 = scmp.lt.u32.totalorder %s2233_s30, %s3771_s2 }
 0x240   : > { %p2214_p12 = por %p2213_p11, %p2212_p10 }
 0x242   : > { %p2216_p13 = por %p2215_p3, %p2214_p12 }
 0x244   : > { %p2217_p0 = pnand %p2216_p13, %p2210_p9 }
 0x246   : > { %2220 = shalt.err (!%p2217_p0)  }
 0x247   : > { %s2221_s26 = scalar_lea.vmem %s340_s19, 64  ;;  %p2226_p2 = scmp.lt.s32.totalorder %s340_s19, %s3296_s5 }
 0x248   : > { %p2222_p1 = scmp.ne.s32.totalorder %s340_s19, %s2221_s26  ;;  %p2227_p4 = scmp.lt.s32.totalorder %s3299_s11, %s2221_s26 }
 0x24a   : > { %p2228_p5 = por %p2227_p4, %p2226_p2 }
 0x24c   : > { %p2229_p8 = pnand %p2228_p5, %p2222_p1 }
 0x24e   : > { %2232 = shalt.err (!%p2229_p8)  }
 0x24f   : > { %342 = dma.hbm_to_vmem [thread:$0]  %s3771_s2, 64, %s340_s19, [#allocation2], %s3201_s12, %s3201_s12, %s3202_s13 }
 0x250   : > { %s3823_s27 = scalar_lea.hbm %s3266_s22, 3616  ;;  %s3826_s25 = scalar_lea.hbm %s3266_s22, 3648 }
 0x251   : > { %p2235_p9 = scmp.ne.s32.totalorder %s3805_s3, %s3826_s25  ;;  %p2237_p10 = scmp.lt.u32.totalorder %s3805_s3, %s4544_s0 }
 0x252   : > { %p2238_p11 = scmp.lt.u32.totalorder %s3284_s29, %s3826_s25  ;;  %p2240_p3 = scmp.lt.u32.totalorder %s3826_s25, %s3805_s3 }
 0x254   : > { %p2239_p12 = por %p2238_p11, %p2237_p10 }
 0x256   : > { %p2241_p13 = por %p2240_p3, %p2239_p12 }
 0x258   : > { %p2242_p0 = pnand %p2241_p13, %p2235_p9 }
 0x25a   : > { %2245 = shalt.err (!%p2242_p0)  }
 0x25b   : > { %s2246_s2 = scalar_lea.vmem %s350_s4, 64  ;;  %p2251_p2 = scmp.lt.s32.totalorder %s350_s4, %s3296_s5 }
 0x25c   : > { %p2247_p1 = scmp.ne.s32.totalorder %s350_s4, %s2246_s2  ;;  %p2252_p4 = scmp.lt.s32.totalorder %s3299_s11, %s2246_s2 }
 0x25e   : > { %p2253_p5 = por %p2252_p4, %p2251_p2 }
 0x260   : > { %p2254_p8 = pnand %p2253_p5, %p2247_p1 }
 0x262   : > { %2257 = shalt.err (!%p2254_p8)  }
 0x263   : > { %352 = dma.hbm_to_vmem [thread:$0]  %s3805_s3, 64, %s350_s4, [#allocation2], %s3201_s12, %s3201_s12, %s3202_s13 }
 0x264   : > { %s357_s19 = scalar_lea.vmem %s3268_s23, 101 [#allocation3]  ;;  %s367_s21 = scalar_lea.vmem %s3268_s23, 102 [#allocation3] }
 0x265   : > { %s359_s20 = sshll.u32 %s357_s19, 4  ;;  %s369_s26 = sshll.u32 %s367_s21, 4  ;;  %s360_s20 = int_to_ptr.vmem [resolvable:$true] %s359_s20  ;;  %s370_s26 = int_to_ptr.vmem [resolvable:$true] %s369_s26 }
 0x266   : > { %s3847_s28 = scalar_lea.hbm %s3266_s22, 3680  ;;  %p2262_p10 = scmp.lt.u32.totalorder %s3823_s27, %s4544_s0 }
 0x267   : > { %p2260_p9 = scmp.ne.s32.totalorder %s3823_s27, %s3847_s28  ;;  %p2263_p11 = scmp.lt.u32.totalorder %s3284_s29, %s3847_s28 }
 0x268   : > { %p2265_p3 = scmp.lt.u32.totalorder %s3847_s28, %s3823_s27 }
 0x269   : > { %p2264_p12 = por %p2263_p11, %p2262_p10 }
 0x26b   : > { %p2266_p13 = por %p2265_p3, %p2264_p12 }
 0x26d   : > { %p2267_p0 = pnand %p2266_p13, %p2260_p9 }
 0x26f   : > { %2270 = shalt.err (!%p2267_p0)  }
 0x270   : > { %s2271_s3 = scalar_lea.vmem %s360_s20, 64  ;;  %p2276_p2 = scmp.lt.s32.totalorder %s360_s20, %s3296_s5 }
 0x271   : > { %p2272_p1 = scmp.ne.s32.totalorder %s360_s20, %s2271_s3  ;;  %p2277_p4 = scmp.lt.s32.totalorder %s3299_s11, %s2271_s3 }
 0x273   : > { %p2278_p5 = por %p2277_p4, %p2276_p2 }
 0x275   : > { %p2279_p8 = pnand %p2278_p5, %p2272_p1 }
 0x277   : > { %2282 = shalt.err (!%p2279_p8)  }
 0x278   : > { %362 = dma.hbm_to_vmem [thread:$0]  %s3823_s27, 64, %s360_s20, [#allocation2], %s3201_s12, %s3201_s12, %s3202_s13 }
 0x279   : > { %s2308_s4 = scalar_lea.hbm %s3266_s22, 3712  ;;  %p2287_p10 = scmp.lt.u32.totalorder %s3826_s25, %s4544_s0 }
 0x27a   : > { %p2285_p9 = scmp.ne.s32.totalorder %s3826_s25, %s2308_s4  ;;  %p2288_p11 = scmp.lt.u32.totalorder %s3284_s29, %s2308_s4 }
 0x27b   : > { %p2290_p3 = scmp.lt.u32.totalorder %s2308_s4, %s3826_s25 }
 0x27c   : > { %p2289_p12 = por %p2288_p11, %p2287_p10 }
 0x27e   : > { %p2291_p13 = por %p2290_p3, %p2289_p12 }
 0x280   : > { %p2292_p0 = pnand %p2291_p13, %p2285_p9 }
 0x282   : > { %2295 = shalt.err (!%p2292_p0)  }
 0x283   : > { %s2296_s30 = scalar_lea.vmem %s370_s26, 64  ;;  %p2301_p2 = scmp.lt.s32.totalorder %s370_s26, %s3296_s5 }
 0x284   : > { %p2297_p1 = scmp.ne.s32.totalorder %s370_s26, %s2296_s30  ;;  %p2302_p4 = scmp.lt.s32.totalorder %s3299_s11, %s2296_s30 }
 0x286   : > { %p2303_p5 = por %p2302_p4, %p2301_p2 }
 0x288   : > { %p2304_p8 = pnand %p2303_p5, %p2297_p1 }
 0x28a   : > { %2307 = shalt.err (!%p2304_p8)  }
 0x28b   : > { %372 = dma.hbm_to_vmem [thread:$0]  %s3826_s25, 64, %s370_s26, [#allocation2], %s3201_s12, %s3201_s12, %s3202_s13 }
 0x28c   : > { %s377_s27 = scalar_lea.vmem %s3268_s23, 103 [#allocation3]  ;;  %s3881_s20 = scalar_lea.hbm %s3266_s22, 16 }
 0x28d   : > { %s379_s2 = sshll.u32 %s377_s27, 4  ;;  %s387_s3 = scalar_lea.vmem %s3268_s23, 128 [#allocation3]  ;;  %s380_s2 = int_to_ptr.vmem [resolvable:$true] %s379_s2 }
 0x28e   : > { %s389_s4 = sshll.u32 %s387_s3, 4  ;;  %s2333_s19 = scalar_lea.hbm %s3266_s22, 3744  ;;  %s390_s4 = int_to_ptr.vmem [resolvable:$true] %s389_s4 }
 0x28f   : > { %p2310_p9 = scmp.ne.s32.totalorder %s3847_s28, %s2333_s19  ;;  %p2312_p10 = scmp.lt.u32.totalorder %s3847_s28, %s4544_s0 }
 0x290   : > { %p2313_p11 = scmp.lt.u32.totalorder %s3284_s29, %s2333_s19  ;;  %p2315_p3 = scmp.lt.u32.totalorder %s2333_s19, %s3847_s28 }
 0x292   : > { %p2314_p12 = por %p2313_p11, %p2312_p10 }
 0x294   : > { %p2316_p13 = por %p2315_p3, %p2314_p12 }
 0x296   : > { %p2317_p0 = pnand %p2316_p13, %p2310_p9 }
 0x298   : > { %2320 = shalt.err (!%p2317_p0)  }
 0x299   : > { %s2321_s25 = scalar_lea.vmem %s380_s2, 64  ;;  %p2326_p2 = scmp.lt.s32.totalorder %s380_s2, %s3296_s5 }
 0x29a   : > { %p2322_p1 = scmp.ne.s32.totalorder %s380_s2, %s2321_s25  ;;  %p2327_p4 = scmp.lt.s32.totalorder %s3299_s11, %s2321_s25 }
 0x29c   : > { %p2328_p5 = por %p2327_p4, %p2326_p2 }
 0x29e   : > { %p2329_p8 = pnand %p2328_p5, %p2322_p1 }
 0x2a0   : > { %2332 = shalt.err (!%p2329_p8)  }
 0x2a1   : > { %382 = dma.hbm_to_vmem [thread:$0]  %s3847_s28, 64, %s380_s2, [#allocation2], %s3201_s12, %s3201_s12, %s3202_s13 }
 0x2a2   : > { %s3899_s26 = scalar_lea.hbm %s3266_s22, 48  ;;  %s3902_s27 = scalar_lea.hbm %s3266_s22, 80 }
 0x2a3   : > { %p2335_p9 = scmp.ne.s32.totalorder %s3881_s20, %s3902_s27  ;;  %p2337_p10 = scmp.lt.u32.totalorder %s3881_s20, %s4544_s0 }
 0x2a4   : > { %p2338_p11 = scmp.lt.u32.totalorder %s3284_s29, %s3902_s27  ;;  %p2340_p3 = scmp.lt.u32.totalorder %s3902_s27, %s3881_s20 }
 0x2a6   : > { %p2339_p12 = por %p2338_p11, %p2337_p10 }
 0x2a8   : > { %p2341_p13 = por %p2340_p3, %p2339_p12 }
 0x2aa   : > { %p2342_p0 = pnand %p2341_p13, %p2335_p9 }
 0x2ac   : > { %2345 = shalt.err (!%p2342_p0)  }
 0x2ad   : > { %s2346_s28 = scalar_lea.vmem %s390_s4, 64  ;;  %p2351_p2 = scmp.lt.s32.totalorder %s390_s4, %s3296_s5 }
 0x2ae   : > { %p2347_p1 = scmp.ne.s32.totalorder %s390_s4, %s2346_s28  ;;  %p2352_p4 = scmp.lt.s32.totalorder %s3299_s11, %s2346_s28 }
 0x2b0   : > { %p2353_p5 = por %p2352_p4, %p2351_p2 }
 0x2b2   : > { %p2354_p8 = pnand %p2353_p5, %p2347_p1 }
 0x2b4   : > { %2357 = shalt.err (!%p2354_p8)  }
 0x2b5   : > { %392 = dma.hbm_to_vmem [thread:$0]  %s3881_s20, 64, %s390_s4, [#allocation2], %s3201_s12, %s3201_s12, %s3202_s13 }
 0x2b6   : > { %s397_s2 = scalar_lea.vmem %s3268_s23, 129 [#allocation3]  ;;  %s407_s30 = scalar_lea.vmem %s3268_s23, 130 [#allocation3] }
 0x2b7   : > { %s399_s21 = sshll.u32 %s397_s2, 4  ;;  %s409_s25 = sshll.u32 %s407_s30, 4  ;;  %s400_s21 = int_to_ptr.vmem [resolvable:$true] %s399_s21  ;;  %s410_s25 = int_to_ptr.vmem [resolvable:$true] %s409_s25 }
 0x2b8   : > { %s3923_s3 = scalar_lea.hbm %s3266_s22, 112  ;;  %p2362_p10 = scmp.lt.u32.totalorder %s3899_s26, %s4544_s0 }
 0x2b9   : > { %p2360_p9 = scmp.ne.s32.totalorder %s3899_s26, %s3923_s3  ;;  %p2363_p11 = scmp.lt.u32.totalorder %s3284_s29, %s3923_s3 }
 0x2ba   : > { %p2365_p3 = scmp.lt.u32.totalorder %s3923_s3, %s3899_s26 }
 0x2bb   : > { %p2364_p12 = por %p2363_p11, %p2362_p10 }
 0x2bd   : > { %p2366_p13 = por %p2365_p3, %p2364_p12 }
 0x2bf   : > { %p2367_p0 = pnand %p2366_p13, %p2360_p9 }
 0x2c1   : > { %2370 = shalt.err (!%p2367_p0)  }
 0x2c2   : > { %s2371_s20 = scalar_lea.vmem %s400_s21, 64  ;;  %p2376_p2 = scmp.lt.s32.totalorder %s400_s21, %s3296_s5 }
 0x2c3   : > { %p2372_p1 = scmp.ne.s32.totalorder %s400_s21, %s2371_s20  ;;  %p2377_p4 = scmp.lt.s32.totalorder %s3299_s11, %s2371_s20 }
 0x2c5   : > { %p2378_p5 = por %p2377_p4, %p2376_p2 }
 0x2c7   : > { %p2379_p8 = pnand %p2378_p5, %p2372_p1 }
 0x2c9   : > { %2382 = shalt.err (!%p2379_p8)  }
 0x2ca   : > { %402 = dma.hbm_to_vmem [thread:$0]  %s3899_s26, 64, %s400_s21, [#allocation2], %s3201_s12, %s3201_s12, %s3202_s13 }
 0x2cb   : > { %s2408_s4 = scalar_lea.hbm %s3266_s22, 144  ;;  %p2387_p10 = scmp.lt.u32.totalorder %s3902_s27, %s4544_s0 }
 0x2cc   : > { %p2385_p9 = scmp.ne.s32.totalorder %s3902_s27, %s2408_s4  ;;  %p2388_p11 = scmp.lt.u32.totalorder %s3284_s29, %s2408_s4 }
 0x2cd   : > { %p2390_p3 = scmp.lt.u32.totalorder %s2408_s4, %s3902_s27 }
 0x2ce   : > { %p2389_p12 = por %p2388_p11, %p2387_p10 }
 0x2d0   : > { %p2391_p13 = por %p2390_p3, %p2389_p12 }
 0x2d2   : > { %p2392_p0 = pnand %p2391_p13, %p2385_p9 }
 0x2d4   : > { %2395 = shalt.err (!%p2392_p0)  }
 0x2d5   : > { %s2396_s19 = scalar_lea.vmem %s410_s25, 64  ;;  %p2401_p2 = scmp.lt.s32.totalorder %s410_s25, %s3296_s5 }
 0x2d6   : > { %p2397_p1 = scmp.ne.s32.totalorder %s410_s25, %s2396_s19  ;;  %p2402_p4 = scmp.lt.s32.totalorder %s3299_s11, %s2396_s19 }
 0x2d8   : > { %p2403_p5 = por %p2402_p4, %p2401_p2 }
 0x2da   : > { %p2404_p8 = pnand %p2403_p5, %p2397_p1 }
 0x2dc   : > { %2407 = shalt.err (!%p2404_p8)  }
 0x2dd   : > { %412 = dma.hbm_to_vmem [thread:$0]  %s3902_s27, 64, %s410_s25, [#allocation2], %s3201_s12, %s3201_s12, %s3202_s13 }
 0x2de   : > { %s417_s26 = scalar_lea.vmem %s3268_s23, 131 [#allocation3]  ;;  %s3957_s21 = scalar_lea.hbm %s3266_s22, 528 }
 0x2df   : > { %s419_s28 = sshll.u32 %s417_s26, 4  ;;  %s427_s20 = scalar_lea.vmem %s3268_s23, 132 [#allocation3]  ;;  %s420_s28 = int_to_ptr.vmem [resolvable:$true] %s419_s28 }
 0x2e0   : > { %s429_s4 = sshll.u32 %s427_s20, 4  ;;  %s2433_s2 = scalar_lea.hbm %s3266_s22, 176  ;;  %s430_s4 = int_to_ptr.vmem [resolvable:$true] %s429_s4 }
 0x2e1   : > { %p2410_p9 = scmp.ne.s32.totalorder %s3923_s3, %s2433_s2  ;;  %p2412_p10 = scmp.lt.u32.totalorder %s3923_s3, %s4544_s0 }
 0x2e2   : > { %p2413_p11 = scmp.lt.u32.totalorder %s3284_s29, %s2433_s2  ;;  %p2415_p3 = scmp.lt.u32.totalorder %s2433_s2, %s3923_s3 }
 0x2e4   : > { %p2414_p12 = por %p2413_p11, %p2412_p10 }
 0x2e6   : > { %p2416_p13 = por %p2415_p3, %p2414_p12 }
 0x2e8   : > { %p2417_p0 = pnand %p2416_p13, %p2410_p9 }
 0x2ea   : > { %2420 = shalt.err (!%p2417_p0)  }
 0x2eb   : > { %s2421_s27 = scalar_lea.vmem %s420_s28, 64  ;;  %p2426_p2 = scmp.lt.s32.totalorder %s420_s28, %s3296_s5 }
 0x2ec   : > { %p2422_p1 = scmp.ne.s32.totalorder %s420_s28, %s2421_s27  ;;  %p2427_p4 = scmp.lt.s32.totalorder %s3299_s11, %s2421_s27 }
 0x2ee   : > { %p2428_p5 = por %p2427_p4, %p2426_p2 }
 0x2f0   : > { %p2429_p8 = pnand %p2428_p5, %p2422_p1 }
 0x2f2   : > { %2432 = shalt.err (!%p2429_p8)  }
 0x2f3   : > { %422 = dma.hbm_to_vmem [thread:$0]  %s3923_s3, 64, %s420_s28, [#allocation2], %s3201_s12, %s3201_s12, %s3202_s13 }
 0x2f4   : > { %s3975_s25 = scalar_lea.hbm %s3266_s22, 560  ;;  %s3978_s26 = scalar_lea.hbm %s3266_s22, 592 }
 0x2f5   : > { %p2435_p9 = scmp.ne.s32.totalorder %s3957_s21, %s3978_s26  ;;  %p2437_p10 = scmp.lt.u32.totalorder %s3957_s21, %s4544_s0 }
 0x2f6   : > { %p2438_p11 = scmp.lt.u32.totalorder %s3284_s29, %s3978_s26  ;;  %p2440_p3 = scmp.lt.u32.totalorder %s3978_s26, %s3957_s21 }
 0x2f8   : > { %p2439_p12 = por %p2438_p11, %p2437_p10 }
 0x2fa   : > { %p2441_p13 = por %p2440_p3, %p2439_p12 }
 0x2fc   : > { %p2442_p0 = pnand %p2441_p13, %p2435_p9 }
 0x2fe   : > { %2445 = shalt.err (!%p2442_p0)  }
 0x2ff   : > { %s2446_s3 = scalar_lea.vmem %s430_s4, 64  ;;  %p2451_p2 = scmp.lt.s32.totalorder %s430_s4, %s3296_s5 }
 0x300   : > { %p2447_p1 = scmp.ne.s32.totalorder %s430_s4, %s2446_s3  ;;  %p2452_p4 = scmp.lt.s32.totalorder %s3299_s11, %s2446_s3 }
 0x302   : > { %p2453_p5 = por %p2452_p4, %p2451_p2 }
 0x304   : > { %p2454_p8 = pnand %p2453_p5, %p2447_p1 }
 0x306   : > { %2457 = shalt.err (!%p2454_p8)  }
 0x307   : > { %432 = dma.hbm_to_vmem [thread:$0]  %s3957_s21, 64, %s430_s4, [#allocation2], %s3201_s12, %s3201_s12, %s3202_s13 }
 0x308   : > { %s437_s28 = scalar_lea.vmem %s3268_s23, 133 [#allocation3]  ;;  %s447_s19 = scalar_lea.vmem %s3268_s23, 134 [#allocation3] }
 0x309   : > { %s439_s30 = sshll.u32 %s437_s28, 4  ;;  %s449_s27 = sshll.u32 %s447_s19, 4  ;;  %s440_s30 = int_to_ptr.vmem [resolvable:$true] %s439_s30  ;;  %s450_s27 = int_to_ptr.vmem [resolvable:$true] %s449_s27 }
 0x30a   : > { %s3999_s20 = scalar_lea.hbm %s3266_s22, 624  ;;  %p2462_p10 = scmp.lt.u32.totalorder %s3975_s25, %s4544_s0 }
 0x30b   : > { %p2460_p9 = scmp.ne.s32.totalorder %s3975_s25, %s3999_s20  ;;  %p2463_p11 = scmp.lt.u32.totalorder %s3284_s29, %s3999_s20 }
 0x30c   : > { %p2465_p3 = scmp.lt.u32.totalorder %s3999_s20, %s3975_s25 }
 0x30d   : > { %p2464_p12 = por %p2463_p11, %p2462_p10 }
 0x30f   : > { %p2466_p13 = por %p2465_p3, %p2464_p12 }
 0x311   : > { %p2467_p0 = pnand %p2466_p13, %p2460_p9 }
 0x313   : > { %2470 = shalt.err (!%p2467_p0)  }
 0x314   : > { %s2471_s21 = scalar_lea.vmem %s440_s30, 64  ;;  %p2476_p2 = scmp.lt.s32.totalorder %s440_s30, %s3296_s5 }
 0x315   : > { %p2472_p1 = scmp.ne.s32.totalorder %s440_s30, %s2471_s21  ;;  %p2477_p4 = scmp.lt.s32.totalorder %s3299_s11, %s2471_s21 }
 0x317   : > { %p2478_p5 = por %p2477_p4, %p2476_p2 }
 0x319   : > { %p2479_p8 = pnand %p2478_p5, %p2472_p1 }
 0x31b   : > { %2482 = shalt.err (!%p2479_p8)  }
 0x31c   : > { %442 = dma.hbm_to_vmem [thread:$0]  %s3975_s25, 64, %s440_s30, [#allocation2], %s3201_s12, %s3201_s12, %s3202_s13 }
 0x31d   : > { %s2508_s4 = scalar_lea.hbm %s3266_s22, 656  ;;  %p2487_p10 = scmp.lt.u32.totalorder %s3978_s26, %s4544_s0 }
 0x31e   : > { %p2485_p9 = scmp.ne.s32.totalorder %s3978_s26, %s2508_s4  ;;  %p2488_p11 = scmp.lt.u32.totalorder %s3284_s29, %s2508_s4 }
 0x31f   : > { %p2490_p3 = scmp.lt.u32.totalorder %s2508_s4, %s3978_s26 }
 0x320   : > { %p2489_p12 = por %p2488_p11, %p2487_p10 }
 0x322   : > { %p2491_p13 = por %p2490_p3, %p2489_p12 }
 0x324   : > { %p2492_p0 = pnand %p2491_p13, %p2485_p9 }
 0x326   : > { %2495 = shalt.err (!%p2492_p0)  }
 0x327   : > { %s2496_s2 = scalar_lea.vmem %s450_s27, 64  ;;  %p2501_p2 = scmp.lt.s32.totalorder %s450_s27, %s3296_s5 }
 0x328   : > { %p2497_p1 = scmp.ne.s32.totalorder %s450_s27, %s2496_s2  ;;  %p2502_p4 = scmp.lt.s32.totalorder %s3299_s11, %s2496_s2 }
 0x32a   : > { %p2503_p5 = por %p2502_p4, %p2501_p2 }
 0x32c   : > { %p2504_p8 = pnand %p2503_p5, %p2497_p1 }
 0x32e   : > { %2507 = shalt.err (!%p2504_p8)  }
 0x32f   : > { %452 = dma.hbm_to_vmem [thread:$0]  %s3978_s26, 64, %s450_s27, [#allocation2], %s3201_s12, %s3201_s12, %s3202_s13 }
 0x330   : > { %s457_s25 = scalar_lea.vmem %s3268_s23, 135 [#allocation3]  ;;  %s4033_s30 = scalar_lea.hbm %s3266_s22, 1040 }
 0x331   : > { %s459_s3 = sshll.u32 %s457_s25, 4  ;;  %s467_s21 = scalar_lea.vmem %s3268_s23, 160 [#allocation3]  ;;  %s460_s3 = int_to_ptr.vmem [resolvable:$true] %s459_s3 }
 0x332   : > { %s469_s4 = sshll.u32 %s467_s21, 4  ;;  %s2533_s28 = scalar_lea.hbm %s3266_s22, 688  ;;  %s470_s4 = int_to_ptr.vmem [resolvable:$true] %s469_s4 }
 0x333   : > { %p2510_p9 = scmp.ne.s32.totalorder %s3999_s20, %s2533_s28  ;;  %p2512_p10 = scmp.lt.u32.totalorder %s3999_s20, %s4544_s0 }
 0x334   : > { %p2513_p11 = scmp.lt.u32.totalorder %s3284_s29, %s2533_s28  ;;  %p2515_p3 = scmp.lt.u32.totalorder %s2533_s28, %s3999_s20 }
 0x336   : > { %p2514_p12 = por %p2513_p11, %p2512_p10 }
 0x338   : > { %p2516_p13 = por %p2515_p3, %p2514_p12 }
 0x33a   : > { %p2517_p0 = pnand %p2516_p13, %p2510_p9 }
 0x33c   : > { %2520 = shalt.err (!%p2517_p0)  }
 0x33d   : > { %s2521_s26 = scalar_lea.vmem %s460_s3, 64  ;;  %p2526_p2 = scmp.lt.s32.totalorder %s460_s3, %s3296_s5 }
 0x33e   : > { %p2522_p1 = scmp.ne.s32.totalorder %s460_s3, %s2521_s26  ;;  %p2527_p4 = scmp.lt.s32.totalorder %s3299_s11, %s2521_s26 }
 0x340   : > { %p2528_p5 = por %p2527_p4, %p2526_p2 }
 0x342   : > { %p2529_p8 = pnand %p2528_p5, %p2522_p1 }
 0x344   : > { %2532 = shalt.err (!%p2529_p8)  }
 0x345   : > { %462 = dma.hbm_to_vmem [thread:$0]  %s3999_s20, 64, %s460_s3, [#allocation2], %s3201_s12, %s3201_s12, %s3202_s13 }
 0x346   : > { %s4051_s27 = scalar_lea.hbm %s3266_s22, 1072  ;;  %s4054_s25 = scalar_lea.hbm %s3266_s22, 1104 }
 0x347   : > { %p2535_p9 = scmp.ne.s32.totalorder %s4033_s30, %s4054_s25  ;;  %p2537_p10 = scmp.lt.u32.totalorder %s4033_s30, %s4544_s0 }
 0x348   : > { %p2538_p11 = scmp.lt.u32.totalorder %s3284_s29, %s4054_s25  ;;  %p2540_p3 = scmp.lt.u32.totalorder %s4054_s25, %s4033_s30 }
 0x34a   : > { %p2539_p12 = por %p2538_p11, %p2537_p10 }
 0x34c   : > { %p2541_p13 = por %p2540_p3, %p2539_p12 }
 0x34e   : > { %p2542_p0 = pnand %p2541_p13, %p2535_p9 }
 0x350   : > { %2545 = shalt.err (!%p2542_p0)  }
 0x351   : > { %s2546_s20 = scalar_lea.vmem %s470_s4, 64  ;;  %p2551_p2 = scmp.lt.s32.totalorder %s470_s4, %s3296_s5 }
 0x352   : > { %p2547_p1 = scmp.ne.s32.totalorder %s470_s4, %s2546_s20  ;;  %p2552_p4 = scmp.lt.s32.totalorder %s3299_s11, %s2546_s20 }
 0x354   : > { %p2553_p5 = por %p2552_p4, %p2551_p2 }
 0x356   : > { %p2554_p8 = pnand %p2553_p5, %p2547_p1 }
 0x358   : > { %2557 = shalt.err (!%p2554_p8)  }
 0x359   : > { %472 = dma.hbm_to_vmem [thread:$0]  %s4033_s30, 64, %s470_s4, [#allocation2], %s3201_s12, %s3201_s12, %s3202_s13 }
 0x35a   : > { %s477_s3 = scalar_lea.vmem %s3268_s23, 161 [#allocation3]  ;;  %s487_s2 = scalar_lea.vmem %s3268_s23, 162 [#allocation3] }
 0x35b   : > { %s479_s19 = sshll.u32 %s477_s3, 4  ;;  %s489_s26 = sshll.u32 %s487_s2, 4  ;;  %s480_s19 = int_to_ptr.vmem [resolvable:$true] %s479_s19  ;;  %s490_s26 = int_to_ptr.vmem [resolvable:$true] %s489_s26 }
 0x35c   : > { %s4075_s21 = scalar_lea.hbm %s3266_s22, 1136  ;;  %p2562_p10 = scmp.lt.u32.totalorder %s4051_s27, %s4544_s0 }
 0x35d   : > { %p2560_p9 = scmp.ne.s32.totalorder %s4051_s27, %s4075_s21  ;;  %p2563_p11 = scmp.lt.u32.totalorder %s3284_s29, %s4075_s21 }
 0x35e   : > { %p2565_p3 = scmp.lt.u32.totalorder %s4075_s21, %s4051_s27 }
 0x35f   : > { %p2564_p12 = por %p2563_p11, %p2562_p10 }
 0x361   : > { %p2566_p13 = por %p2565_p3, %p2564_p12 }
 0x363   : > { %p2567_p0 = pnand %p2566_p13, %p2560_p9 }
 0x365   : > { %2570 = shalt.err (!%p2567_p0)  }
 0x366   : > { %s2571_s30 = scalar_lea.vmem %s480_s19, 64  ;;  %p2576_p2 = scmp.lt.s32.totalorder %s480_s19, %s3296_s5 }
 0x367   : > { %p2572_p1 = scmp.ne.s32.totalorder %s480_s19, %s2571_s30  ;;  %p2577_p4 = scmp.lt.s32.totalorder %s3299_s11, %s2571_s30 }
 0x369   : > { %p2578_p5 = por %p2577_p4, %p2576_p2 }
 0x36b   : > { %p2579_p8 = pnand %p2578_p5, %p2572_p1 }
 0x36d   : > { %2582 = shalt.err (!%p2579_p8)  }
 0x36e   : > { %482 = dma.hbm_to_vmem [thread:$0]  %s4051_s27, 64, %s480_s19, [#allocation2], %s3201_s12, %s3201_s12, %s3202_s13 }
 0x36f   : > { %s2608_s4 = scalar_lea.hbm %s3266_s22, 1168  ;;  %p2587_p10 = scmp.lt.u32.totalorder %s4054_s25, %s4544_s0 }
 0x370   : > { %p2585_p9 = scmp.ne.s32.totalorder %s4054_s25, %s2608_s4  ;;  %p2588_p11 = scmp.lt.u32.totalorder %s3284_s29, %s2608_s4 }
 0x371   : > { %p2590_p3 = scmp.lt.u32.totalorder %s2608_s4, %s4054_s25 }
 0x372   : > { %p2589_p12 = por %p2588_p11, %p2587_p10 }
 0x374   : > { %p2591_p13 = por %p2590_p3, %p2589_p12 }
 0x376   : > { %p2592_p0 = pnand %p2591_p13, %p2585_p9 }
 0x378   : > { %2595 = shalt.err (!%p2592_p0)  }
 0x379   : > { %s2596_s28 = scalar_lea.vmem %s490_s26, 64  ;;  %p2601_p2 = scmp.lt.s32.totalorder %s490_s26, %s3296_s5 }
 0x37a   : > { %p2597_p1 = scmp.ne.s32.totalorder %s490_s26, %s2596_s28  ;;  %p2602_p4 = scmp.lt.s32.totalorder %s3299_s11, %s2596_s28 }
 0x37c   : > { %p2603_p5 = por %p2602_p4, %p2601_p2 }
 0x37e   : > { %p2604_p8 = pnand %p2603_p5, %p2597_p1 }
 0x380   : > { %2607 = shalt.err (!%p2604_p8)  }
 0x381   : > { %492 = dma.hbm_to_vmem [thread:$0]  %s4054_s25, 64, %s490_s26, [#allocation2], %s3201_s12, %s3201_s12, %s3202_s13 }
 0x382   : > { %s497_s27 = scalar_lea.vmem %s3268_s23, 163 [#allocation3]  ;;  %s4109_s19 = scalar_lea.hbm %s3266_s22, 1552 }
 0x383   : > { %s499_s20 = sshll.u32 %s497_s27, 4  ;;  %s507_s30 = scalar_lea.vmem %s3268_s23, 164 [#allocation3]  ;;  %s500_s20 = int_to_ptr.vmem [resolvable:$true] %s499_s20 }
 0x384   : > { %s509_s4 = sshll.u32 %s507_s30, 4  ;;  %s2633_s3 = scalar_lea.hbm %s3266_s22, 1200  ;;  %s510_s4 = int_to_ptr.vmem [resolvable:$true] %s509_s4 }
 0x385   : > { %p2610_p9 = scmp.ne.s32.totalorder %s4075_s21, %s2633_s3  ;;  %p2612_p10 = scmp.lt.u32.totalorder %s4075_s21, %s4544_s0 }
 0x386   : > { %p2613_p11 = scmp.lt.u32.totalorder %s3284_s29, %s2633_s3  ;;  %p2615_p3 = scmp.lt.u32.totalorder %s2633_s3, %s4075_s21 }
 0x388   : > { %p2614_p12 = por %p2613_p11, %p2612_p10 }
 0x38a   : > { %p2616_p13 = por %p2615_p3, %p2614_p12 }
 0x38c   : > { %p2617_p0 = pnand %p2616_p13, %p2610_p9 }
 0x38e   : > { %2620 = shalt.err (!%p2617_p0)  }
 0x38f   : > { %s2621_s25 = scalar_lea.vmem %s500_s20, 64  ;;  %p2626_p2 = scmp.lt.s32.totalorder %s500_s20, %s3296_s5 }
 0x390   : > { %p2622_p1 = scmp.ne.s32.totalorder %s500_s20, %s2621_s25  ;;  %p2627_p4 = scmp.lt.s32.totalorder %s3299_s11, %s2621_s25 }
 0x392   : > { %p2628_p5 = por %p2627_p4, %p2626_p2 }
 0x394   : > { %p2629_p8 = pnand %p2628_p5, %p2622_p1 }
 0x396   : > { %2632 = shalt.err (!%p2629_p8)  }
 0x397   : > { %502 = dma.hbm_to_vmem [thread:$0]  %s4075_s21, 64, %s500_s20, [#allocation2], %s3201_s12, %s3201_s12, %s3202_s13 }
 0x398   : > { %s4127_s26 = scalar_lea.hbm %s3266_s22, 1584  ;;  %s4130_s27 = scalar_lea.hbm %s3266_s22, 1616 }
 0x399   : > { %p2635_p9 = scmp.ne.s32.totalorder %s4109_s19, %s4130_s27  ;;  %p2637_p10 = scmp.lt.u32.totalorder %s4109_s19, %s4544_s0 }
 0x39a   : > { %p2638_p11 = scmp.lt.u32.totalorder %s3284_s29, %s4130_s27  ;;  %p2640_p3 = scmp.lt.u32.totalorder %s4130_s27, %s4109_s19 }
 0x39c   : > { %p2639_p12 = por %p2638_p11, %p2637_p10 }
 0x39e   : > { %p2641_p13 = por %p2640_p3, %p2639_p12 }
 0x3a0   : > { %p2642_p0 = pnand %p2641_p13, %p2635_p9 }
 0x3a2   : > { %2645 = shalt.err (!%p2642_p0)  }
 0x3a3   : > { %s2646_s21 = scalar_lea.vmem %s510_s4, 64  ;;  %p2651_p2 = scmp.lt.s32.totalorder %s510_s4, %s3296_s5 }
 0x3a4   : > { %p2647_p1 = scmp.ne.s32.totalorder %s510_s4, %s2646_s21  ;;  %p2652_p4 = scmp.lt.s32.totalorder %s3299_s11, %s2646_s21 }
 0x3a6   : > { %p2653_p5 = por %p2652_p4, %p2651_p2 }
 0x3a8   : > { %p2654_p8 = pnand %p2653_p5, %p2647_p1 }
 0x3aa   : > { %2657 = shalt.err (!%p2654_p8)  }
 0x3ab   : > { %512 = dma.hbm_to_vmem [thread:$0]  %s4109_s19, 64, %s510_s4, [#allocation2], %s3201_s12, %s3201_s12, %s3202_s13 }
 0x3ac   : > { %s517_s20 = scalar_lea.vmem %s3268_s23, 165 [#allocation3]  ;;  %s527_s28 = scalar_lea.vmem %s3268_s23, 166 [#allocation3] }
 0x3ad   : > { %s519_s2 = sshll.u32 %s517_s20, 4  ;;  %s529_s25 = sshll.u32 %s527_s28, 4  ;;  %s520_s2 = int_to_ptr.vmem [resolvable:$true] %s519_s2  ;;  %s530_s25 = int_to_ptr.vmem [resolvable:$true] %s529_s25 }
 0x3ae   : > { %s4151_s30 = scalar_lea.hbm %s3266_s22, 1648  ;;  %p2662_p10 = scmp.lt.u32.totalorder %s4127_s26, %s4544_s0 }
 0x3af   : > { %p2660_p9 = scmp.ne.s32.totalorder %s4127_s26, %s4151_s30  ;;  %p2663_p11 = scmp.lt.u32.totalorder %s3284_s29, %s4151_s30 }
 0x3b0   : > { %p2665_p3 = scmp.lt.u32.totalorder %s4151_s30, %s4127_s26 }
 0x3b1   : > { %p2664_p12 = por %p2663_p11, %p2662_p10 }
 0x3b3   : > { %p2666_p13 = por %p2665_p3, %p2664_p12 }
 0x3b5   : > { %p2667_p0 = pnand %p2666_p13, %p2660_p9 }
 0x3b7   : > { %2670 = shalt.err (!%p2667_p0)  }
 0x3b8   : > { %s2671_s19 = scalar_lea.vmem %s520_s2, 64  ;;  %p2676_p2 = scmp.lt.s32.totalorder %s520_s2, %s3296_s5 }
 0x3b9   : > { %p2672_p1 = scmp.ne.s32.totalorder %s520_s2, %s2671_s19  ;;  %p2677_p4 = scmp.lt.s32.totalorder %s3299_s11, %s2671_s19 }
 0x3bb   : > { %p2678_p5 = por %p2677_p4, %p2676_p2 }
 0x3bd   : > { %p2679_p8 = pnand %p2678_p5, %p2672_p1 }
 0x3bf   : > { %2682 = shalt.err (!%p2679_p8)  }
 0x3c0   : > { %522 = dma.hbm_to_vmem [thread:$0]  %s4127_s26, 64, %s520_s2, [#allocation2], %s3201_s12, %s3201_s12, %s3202_s13 }
 0x3c1   : > { %s2708_s4 = scalar_lea.hbm %s3266_s22, 1680  ;;  %p2687_p10 = scmp.lt.u32.totalorder %s4130_s27, %s4544_s0 }
 0x3c2   : > { %p2685_p9 = scmp.ne.s32.totalorder %s4130_s27, %s2708_s4  ;;  %p2688_p11 = scmp.lt.u32.totalorder %s3284_s29, %s2708_s4 }
 0x3c3   : > { %p2690_p3 = scmp.lt.u32.totalorder %s2708_s4, %s4130_s27 }
 0x3c4   : > { %p2689_p12 = por %p2688_p11, %p2687_p10 }
 0x3c6   : > { %p2691_p13 = por %p2690_p3, %p2689_p12 }
 0x3c8   : > { %p2692_p0 = pnand %p2691_p13, %p2685_p9 }
 0x3ca   : > { %2695 = shalt.err (!%p2692_p0)  }
 0x3cb   : > { %s2696_s3 = scalar_lea.vmem %s530_s25, 64  ;;  %p2701_p2 = scmp.lt.s32.totalorder %s530_s25, %s3296_s5 }
 0x3cc   : > { %p2697_p1 = scmp.ne.s32.totalorder %s530_s25, %s2696_s3  ;;  %p2702_p4 = scmp.lt.s32.totalorder %s3299_s11, %s2696_s3 }
 0x3ce   : > { %p2703_p5 = por %p2702_p4, %p2701_p2 }
 0x3d0   : > { %p2704_p8 = pnand %p2703_p5, %p2697_p1 }
 0x3d2   : > { %2707 = shalt.err (!%p2704_p8)  }
 0x3d3   : > { %532 = dma.hbm_to_vmem [thread:$0]  %s4130_s27, 64, %s530_s25, [#allocation2], %s3201_s12, %s3201_s12, %s3202_s13 }
 0x3d4   : > { %s537_s26 = scalar_lea.vmem %s3268_s23, 167 [#allocation3]  ;;  %s4185_s2 = scalar_lea.hbm %s3266_s22, 2064 }
 0x3d5   : > { %s539_s21 = sshll.u32 %s537_s26, 4  ;;  %s547_s19 = scalar_lea.vmem %s3268_s23, 192 [#allocation3]  ;;  %s540_s21 = int_to_ptr.vmem [resolvable:$true] %s539_s21 }
 0x3d6   : > { %s549_s4 = sshll.u32 %s547_s19, 4  ;;  %s2733_s20 = scalar_lea.hbm %s3266_s22, 1712  ;;  %s550_s4 = int_to_ptr.vmem [resolvable:$true] %s549_s4 }
 0x3d7   : > { %p2710_p9 = scmp.ne.s32.totalorder %s4151_s30, %s2733_s20  ;;  %p2712_p10 = scmp.lt.u32.totalorder %s4151_s30, %s4544_s0 }
 0x3d8   : > { %p2713_p11 = scmp.lt.u32.totalorder %s3284_s29, %s2733_s20  ;;  %p2715_p3 = scmp.lt.u32.totalorder %s2733_s20, %s4151_s30 }
 0x3da   : > { %p2714_p12 = por %p2713_p11, %p2712_p10 }
 0x3dc   : > { %p2716_p13 = por %p2715_p3, %p2714_p12 }
 0x3de   : > { %p2717_p0 = pnand %p2716_p13, %p2710_p9 }
 0x3e0   : > { %2720 = shalt.err (!%p2717_p0)  }
 0x3e1   : > { %s2721_s27 = scalar_lea.vmem %s540_s21, 64  ;;  %p2726_p2 = scmp.lt.s32.totalorder %s540_s21, %s3296_s5 }
 0x3e2   : > { %p2722_p1 = scmp.ne.s32.totalorder %s540_s21, %s2721_s27  ;;  %p2727_p4 = scmp.lt.s32.totalorder %s3299_s11, %s2721_s27 }
 0x3e4   : > { %p2728_p5 = por %p2727_p4, %p2726_p2 }
 0x3e6   : > { %p2729_p8 = pnand %p2728_p5, %p2722_p1 }
 0x3e8   : > { %2732 = shalt.err (!%p2729_p8)  }
 0x3e9   : > { %542 = dma.hbm_to_vmem [thread:$0]  %s4151_s30, 64, %s540_s21, [#allocation2], %s3201_s12, %s3201_s12, %s3202_s13 }
 0x3ea   : > { %s4203_s25 = scalar_lea.hbm %s3266_s22, 2096  ;;  %s4206_s26 = scalar_lea.hbm %s3266_s22, 2128 }
 0x3eb   : > { %p2735_p9 = scmp.ne.s32.totalorder %s4185_s2, %s4206_s26  ;;  %p2737_p10 = scmp.lt.u32.totalorder %s4185_s2, %s4544_s0 }
 0x3ec   : > { %p2738_p11 = scmp.lt.u32.totalorder %s3284_s29, %s4206_s26  ;;  %p2740_p3 = scmp.lt.u32.totalorder %s4206_s26, %s4185_s2 }
 0x3ee   : > { %p2739_p12 = por %p2738_p11, %p2737_p10 }
 0x3f0   : > { %p2741_p13 = por %p2740_p3, %p2739_p12 }
 0x3f2   : > { %p2742_p0 = pnand %p2741_p13, %p2735_p9 }
 0x3f4   : > { %2745 = shalt.err (!%p2742_p0)  }
 0x3f5   : > { %s2746_s30 = scalar_lea.vmem %s550_s4, 64  ;;  %p2751_p2 = scmp.lt.s32.totalorder %s550_s4, %s3296_s5 }
 0x3f6   : > { %p2747_p1 = scmp.ne.s32.totalorder %s550_s4, %s2746_s30  ;;  %p2752_p4 = scmp.lt.s32.totalorder %s3299_s11, %s2746_s30 }
 0x3f8   : > { %p2753_p5 = por %p2752_p4, %p2751_p2 }
 0x3fa   : > { %p2754_p8 = pnand %p2753_p5, %p2747_p1 }
 0x3fc   : > { %2757 = shalt.err (!%p2754_p8)  }
 0x3fd   : > { %552 = dma.hbm_to_vmem [thread:$0]  %s4185_s2, 64, %s550_s4, [#allocation2], %s3201_s12, %s3201_s12, %s3202_s13 }
 0x3fe   : > { %s557_s21 = scalar_lea.vmem %s3268_s23, 193 [#allocation3]  ;;  %s567_s3 = scalar_lea.vmem %s3268_s23, 194 [#allocation3] }
 0x3ff   : > { %s559_s28 = sshll.u32 %s557_s21, 4  ;;  %s569_s27 = sshll.u32 %s567_s3, 4  ;;  %s560_s28 = int_to_ptr.vmem [resolvable:$true] %s559_s28  ;;  %s570_s27 = int_to_ptr.vmem [resolvable:$true] %s569_s27 }
 0x400   : > { %s4227_s19 = scalar_lea.hbm %s3266_s22, 2160  ;;  %p2762_p10 = scmp.lt.u32.totalorder %s4203_s25, %s4544_s0 }
 0x401   : > { %p2760_p9 = scmp.ne.s32.totalorder %s4203_s25, %s4227_s19  ;;  %p2763_p11 = scmp.lt.u32.totalorder %s3284_s29, %s4227_s19 }
 0x402   : > { %p2765_p3 = scmp.lt.u32.totalorder %s4227_s19, %s4203_s25 }
 0x403   : > { %p2764_p12 = por %p2763_p11, %p2762_p10 }
 0x405   : > { %p2766_p13 = por %p2765_p3, %p2764_p12 }
 0x407   : > { %p2767_p0 = pnand %p2766_p13, %p2760_p9 }
 0x409   : > { %2770 = shalt.err (!%p2767_p0)  }
 0x40a   : > { %s2771_s2 = scalar_lea.vmem %s560_s28, 64  ;;  %p2776_p2 = scmp.lt.s32.totalorder %s560_s28, %s3296_s5 }
 0x40b   : > { %p2772_p1 = scmp.ne.s32.totalorder %s560_s28, %s2771_s2  ;;  %p2777_p4 = scmp.lt.s32.totalorder %s3299_s11, %s2771_s2 }
 0x40d   : > { %p2778_p5 = por %p2777_p4, %p2776_p2 }
 0x40f   : > { %p2779_p8 = pnand %p2778_p5, %p2772_p1 }
 0x411   : > { %2782 = shalt.err (!%p2779_p8)  }
 0x412   : > { %562 = dma.hbm_to_vmem [thread:$0]  %s4203_s25, 64, %s560_s28, [#allocation2], %s3201_s12, %s3201_s12, %s3202_s13 }
 0x413   : > { %s2808_s4 = scalar_lea.hbm %s3266_s22, 2192  ;;  %p2787_p10 = scmp.lt.u32.totalorder %s4206_s26, %s4544_s0 }
 0x414   : > { %p2785_p9 = scmp.ne.s32.totalorder %s4206_s26, %s2808_s4  ;;  %p2788_p11 = scmp.lt.u32.totalorder %s3284_s29, %s2808_s4 }
 0x415   : > { %p2790_p3 = scmp.lt.u32.totalorder %s2808_s4, %s4206_s26 }
 0x416   : > { %p2789_p12 = por %p2788_p11, %p2787_p10 }
 0x418   : > { %p2791_p13 = por %p2790_p3, %p2789_p12 }
 0x41a   : > { %p2792_p0 = pnand %p2791_p13, %p2785_p9 }
 0x41c   : > { %2795 = shalt.err (!%p2792_p0)  }
 0x41d   : > { %s2796_s20 = scalar_lea.vmem %s570_s27, 64  ;;  %p2801_p2 = scmp.lt.s32.totalorder %s570_s27, %s3296_s5 }
 0x41e   : > { %p2797_p1 = scmp.ne.s32.totalorder %s570_s27, %s2796_s20  ;;  %p2802_p4 = scmp.lt.s32.totalorder %s3299_s11, %s2796_s20 }
 0x420   : > { %p2803_p5 = por %p2802_p4, %p2801_p2 }
 0x422   : > { %p2804_p8 = pnand %p2803_p5, %p2797_p1 }
 0x424   : > { %2807 = shalt.err (!%p2804_p8)  }
 0x425   : > { %572 = dma.hbm_to_vmem [thread:$0]  %s4206_s26, 64, %s570_s27, [#allocation2], %s3201_s12, %s3201_s12, %s3202_s13 }
 0x426   : > { %s577_s25 = scalar_lea.vmem %s3268_s23, 195 [#allocation3]  ;;  %s4261_s28 = scalar_lea.hbm %s3266_s22, 2576 }
 0x427   : > { %s579_s30 = sshll.u32 %s577_s25, 4  ;;  %s587_s2 = scalar_lea.vmem %s3268_s23, 196 [#allocation3]  ;;  %s580_s30 = int_to_ptr.vmem [resolvable:$true] %s579_s30 }
 0x428   : > { %s589_s4 = sshll.u32 %s587_s2, 4  ;;  %s2833_s21 = scalar_lea.hbm %s3266_s22, 2224  ;;  %s590_s4 = int_to_ptr.vmem [resolvable:$true] %s589_s4 }
 0x429   : > { %p2810_p9 = scmp.ne.s32.totalorder %s4227_s19, %s2833_s21  ;;  %p2812_p10 = scmp.lt.u32.totalorder %s4227_s19, %s4544_s0 }
 0x42a   : > { %p2813_p11 = scmp.lt.u32.totalorder %s3284_s29, %s2833_s21  ;;  %p2815_p3 = scmp.lt.u32.totalorder %s2833_s21, %s4227_s19 }
 0x42c   : > { %p2814_p12 = por %p2813_p11, %p2812_p10 }
 0x42e   : > { %p2816_p13 = por %p2815_p3, %p2814_p12 }
 0x430   : > { %p2817_p0 = pnand %p2816_p13, %p2810_p9 }
 0x432   : > { %2820 = shalt.err (!%p2817_p0)  }
 0x433   : > { %s2821_s26 = scalar_lea.vmem %s580_s30, 64  ;;  %p2826_p2 = scmp.lt.s32.totalorder %s580_s30, %s3296_s5 }
 0x434   : > { %p2822_p1 = scmp.ne.s32.totalorder %s580_s30, %s2821_s26  ;;  %p2827_p4 = scmp.lt.s32.totalorder %s3299_s11, %s2821_s26 }
 0x436   : > { %p2828_p5 = por %p2827_p4, %p2826_p2 }
 0x438   : > { %p2829_p8 = pnand %p2828_p5, %p2822_p1 }
 0x43a   : > { %2832 = shalt.err (!%p2829_p8)  }
 0x43b   : > { %582 = dma.hbm_to_vmem [thread:$0]  %s4227_s19, 64, %s580_s30, [#allocation2], %s3201_s12, %s3201_s12, %s3202_s13 }
 0x43c   : > { %s4279_s27 = scalar_lea.hbm %s3266_s22, 2608  ;;  %s4282_s25 = scalar_lea.hbm %s3266_s22, 2640 }
 0x43d   : > { %p2835_p9 = scmp.ne.s32.totalorder %s4261_s28, %s4282_s25  ;;  %p2837_p10 = scmp.lt.u32.totalorder %s4261_s28, %s4544_s0 }
 0x43e   : > { %p2838_p11 = scmp.lt.u32.totalorder %s3284_s29, %s4282_s25  ;;  %p2840_p3 = scmp.lt.u32.totalorder %s4282_s25, %s4261_s28 }
 0x440   : > { %p2839_p12 = por %p2838_p11, %p2837_p10 }
 0x442   : > { %p2841_p13 = por %p2840_p3, %p2839_p12 }
 0x444   : > { %p2842_p0 = pnand %p2841_p13, %p2835_p9 }
 0x446   : > { %2845 = shalt.err (!%p2842_p0)  }
 0x447   : > { %s2846_s19 = scalar_lea.vmem %s590_s4, 64  ;;  %p2851_p2 = scmp.lt.s32.totalorder %s590_s4, %s3296_s5 }
 0x448   : > { %p2847_p1 = scmp.ne.s32.totalorder %s590_s4, %s2846_s19  ;;  %p2852_p4 = scmp.lt.s32.totalorder %s3299_s11, %s2846_s19 }
 0x44a   : > { %p2853_p5 = por %p2852_p4, %p2851_p2 }
 0x44c   : > { %p2854_p8 = pnand %p2853_p5, %p2847_p1 }
 0x44e   : > { %2857 = shalt.err (!%p2854_p8)  }
 0x44f   : > { %592 = dma.hbm_to_vmem [thread:$0]  %s4261_s28, 64, %s590_s4, [#allocation2], %s3201_s12, %s3201_s12, %s3202_s13 }
 0x450   : > { %s597_s30 = scalar_lea.vmem %s3268_s23, 197 [#allocation3]  ;;  %s607_s20 = scalar_lea.vmem %s3268_s23, 198 [#allocation3] }
 0x451   : > { %s599_s3 = sshll.u32 %s597_s30, 4  ;;  %s609_s26 = sshll.u32 %s607_s20, 4  ;;  %s600_s3 = int_to_ptr.vmem [resolvable:$true] %s599_s3  ;;  %s610_s26 = int_to_ptr.vmem [resolvable:$true] %s609_s26 }
 0x452   : > { %s4303_s2 = scalar_lea.hbm %s3266_s22, 2672  ;;  %p2862_p10 = scmp.lt.u32.totalorder %s4279_s27, %s4544_s0 }
 0x453   : > { %p2860_p9 = scmp.ne.s32.totalorder %s4279_s27, %s4303_s2  ;;  %p2863_p11 = scmp.lt.u32.totalorder %s3284_s29, %s4303_s2 }
 0x454   : > { %p2865_p3 = scmp.lt.u32.totalorder %s4303_s2, %s4279_s27 }
 0x455   : > { %p2864_p12 = por %p2863_p11, %p2862_p10 }
 0x457   : > { %p2866_p13 = por %p2865_p3, %p2864_p12 }
 0x459   : > { %p2867_p0 = pnand %p2866_p13, %p2860_p9 }
 0x45b   : > { %2870 = shalt.err (!%p2867_p0)  }
 0x45c   : > { %s2871_s28 = scalar_lea.vmem %s600_s3, 64  ;;  %p2876_p2 = scmp.lt.s32.totalorder %s600_s3, %s3296_s5 }
 0x45d   : > { %p2872_p1 = scmp.ne.s32.totalorder %s600_s3, %s2871_s28  ;;  %p2877_p4 = scmp.lt.s32.totalorder %s3299_s11, %s2871_s28 }
 0x45f   : > { %p2878_p5 = por %p2877_p4, %p2876_p2 }
 0x461   : > { %p2879_p8 = pnand %p2878_p5, %p2872_p1 }
 0x463   : > { %2882 = shalt.err (!%p2879_p8)  }
 0x464   : > { %602 = dma.hbm_to_vmem [thread:$0]  %s4279_s27, 64, %s600_s3, [#allocation2], %s3201_s12, %s3201_s12, %s3202_s13 }
 0x465   : > { %s2908_s4 = scalar_lea.hbm %s3266_s22, 2704  ;;  %p2887_p10 = scmp.lt.u32.totalorder %s4282_s25, %s4544_s0 }
 0x466   : > { %p2885_p9 = scmp.ne.s32.totalorder %s4282_s25, %s2908_s4  ;;  %p2888_p11 = scmp.lt.u32.totalorder %s3284_s29, %s2908_s4 }
 0x467   : > { %p2890_p3 = scmp.lt.u32.totalorder %s2908_s4, %s4282_s25 }
 0x468   : > { %p2889_p12 = por %p2888_p11, %p2887_p10 }
 0x46a   : > { %p2891_p13 = por %p2890_p3, %p2889_p12 }
 0x46c   : > { %p2892_p0 = pnand %p2891_p13, %p2885_p9 }
 0x46e   : > { %2895 = shalt.err (!%p2892_p0)  }
 0x46f   : > { %s2896_s21 = scalar_lea.vmem %s610_s26, 64  ;;  %p2901_p2 = scmp.lt.s32.totalorder %s610_s26, %s3296_s5 }
 0x470   : > { %p2897_p1 = scmp.ne.s32.totalorder %s610_s26, %s2896_s21  ;;  %p2902_p4 = scmp.lt.s32.totalorder %s3299_s11, %s2896_s21 }
 0x472   : > { %p2903_p5 = por %p2902_p4, %p2901_p2 }
 0x474   : > { %p2904_p8 = pnand %p2903_p5, %p2897_p1 }
 0x476   : > { %2907 = shalt.err (!%p2904_p8)  }
 0x477   : > { %612 = dma.hbm_to_vmem [thread:$0]  %s4282_s25, 64, %s610_s26, [#allocation2], %s3201_s12, %s3201_s12, %s3202_s13 }
 0x478   : > { %s617_s27 = scalar_lea.vmem %s3268_s23, 199 [#allocation3]  ;;  %s4337_s3 = scalar_lea.hbm %s3266_s22, 3088 }
 0x479   : > { %s619_s19 = sshll.u32 %s617_s27, 4  ;;  %s627_s28 = scalar_lea.vmem %s3268_s23, 224 [#allocation3]  ;;  %s620_s19 = int_to_ptr.vmem [resolvable:$true] %s619_s19 }
 0x47a   : > { %s629_s4 = sshll.u32 %s627_s28, 4  ;;  %s2933_s30 = scalar_lea.hbm %s3266_s22, 2736  ;;  %s630_s4 = int_to_ptr.vmem [resolvable:$true] %s629_s4 }
 0x47b   : > { %p2910_p9 = scmp.ne.s32.totalorder %s4303_s2, %s2933_s30  ;;  %p2912_p10 = scmp.lt.u32.totalorder %s4303_s2, %s4544_s0 }
 0x47c   : > { %p2913_p11 = scmp.lt.u32.totalorder %s3284_s29, %s2933_s30  ;;  %p2915_p3 = scmp.lt.u32.totalorder %s2933_s30, %s4303_s2 }
 0x47e   : > { %p2914_p12 = por %p2913_p11, %p2912_p10 }
 0x480   : > { %p2916_p13 = por %p2915_p3, %p2914_p12 }
 0x482   : > { %p2917_p0 = pnand %p2916_p13, %p2910_p9 }
 0x484   : > { %2920 = shalt.err (!%p2917_p0)  }
 0x485   : > { %s2921_s25 = scalar_lea.vmem %s620_s19, 64  ;;  %p2926_p2 = scmp.lt.s32.totalorder %s620_s19, %s3296_s5 }
 0x486   : > { %p2922_p1 = scmp.ne.s32.totalorder %s620_s19, %s2921_s25  ;;  %p2927_p4 = scmp.lt.s32.totalorder %s3299_s11, %s2921_s25 }
 0x488   : > { %p2928_p5 = por %p2927_p4, %p2926_p2 }
 0x48a   : > { %p2929_p8 = pnand %p2928_p5, %p2922_p1 }
 0x48c   : > { %2932 = shalt.err (!%p2929_p8)  }
 0x48d   : > { %622 = dma.hbm_to_vmem [thread:$0]  %s4303_s2, 64, %s620_s19, [#allocation2], %s3201_s12, %s3201_s12, %s3202_s13 }
 0x48e   : > { %s4355_s26 = scalar_lea.hbm %s3266_s22, 3120  ;;  %s4358_s27 = scalar_lea.hbm %s3266_s22, 3152 }
 0x48f   : > { %p2935_p9 = scmp.ne.s32.totalorder %s4337_s3, %s4358_s27  ;;  %p2937_p10 = scmp.lt.u32.totalorder %s4337_s3, %s4544_s0 }
 0x490   : > { %p2938_p11 = scmp.lt.u32.totalorder %s3284_s29, %s4358_s27  ;;  %p2940_p3 = scmp.lt.u32.totalorder %s4358_s27, %s4337_s3 }
 0x492   : > { %p2939_p12 = por %p2938_p11, %p2937_p10 }
 0x494   : > { %p2941_p13 = por %p2940_p3, %p2939_p12 }
 0x496   : > { %p2942_p0 = pnand %p2941_p13, %p2935_p9 }
 0x498   : > { %2945 = shalt.err (!%p2942_p0)  }
 0x499   : > { %s2946_s2 = scalar_lea.vmem %s630_s4, 64  ;;  %p2951_p2 = scmp.lt.s32.totalorder %s630_s4, %s3296_s5 }
 0x49a   : > { %p2947_p1 = scmp.ne.s32.totalorder %s630_s4, %s2946_s2  ;;  %p2952_p4 = scmp.lt.s32.totalorder %s3299_s11, %s2946_s2 }
 0x49c   : > { %p2953_p5 = por %p2952_p4, %p2951_p2 }
 0x49e   : > { %p2954_p8 = pnand %p2953_p5, %p2947_p1 }
 0x4a0   : > { %2957 = shalt.err (!%p2954_p8)  }
 0x4a1   : > { %632 = dma.hbm_to_vmem [thread:$0]  %s4337_s3, 64, %s630_s4, [#allocation2], %s3201_s12, %s3201_s12, %s3202_s13 }
 0x4a2   : > { %s637_s19 = scalar_lea.vmem %s3268_s23, 225 [#allocation3]  ;;  %s647_s21 = scalar_lea.vmem %s3268_s23, 226 [#allocation3] }
 0x4a3   : > { %s639_s20 = sshll.u32 %s637_s19, 4  ;;  %s649_s25 = sshll.u32 %s647_s21, 4  ;;  %s640_s20 = int_to_ptr.vmem [resolvable:$true] %s639_s20  ;;  %s650_s25 = int_to_ptr.vmem [resolvable:$true] %s649_s25 }
 0x4a4   : > { %s4379_s28 = scalar_lea.hbm %s3266_s22, 3184  ;;  %p2962_p10 = scmp.lt.u32.totalorder %s4355_s26, %s4544_s0 }
 0x4a5   : > { %p2960_p9 = scmp.ne.s32.totalorder %s4355_s26, %s4379_s28  ;;  %p2963_p11 = scmp.lt.u32.totalorder %s3284_s29, %s4379_s28 }
 0x4a6   : > { %p2965_p3 = scmp.lt.u32.totalorder %s4379_s28, %s4355_s26 }
 0x4a7   : > { %p2964_p12 = por %p2963_p11, %p2962_p10 }
 0x4a9   : > { %p2966_p13 = por %p2965_p3, %p2964_p12 }
 0x4ab   : > { %p2967_p0 = pnand %p2966_p13, %p2960_p9 }
 0x4ad   : > { %2970 = shalt.err (!%p2967_p0)  }
 0x4ae   : > { %s2971_s3 = scalar_lea.vmem %s640_s20, 64  ;;  %p2976_p2 = scmp.lt.s32.totalorder %s640_s20, %s3296_s5 }
 0x4af   : > { %p2972_p1 = scmp.ne.s32.totalorder %s640_s20, %s2971_s3  ;;  %p2977_p4 = scmp.lt.s32.totalorder %s3299_s11, %s2971_s3 }
 0x4b1   : > { %p2978_p5 = por %p2977_p4, %p2976_p2 }
 0x4b3   : > { %p2979_p8 = pnand %p2978_p5, %p2972_p1 }
 0x4b5   : > { %2982 = shalt.err (!%p2979_p8)  }
 0x4b6   : > { %642 = dma.hbm_to_vmem [thread:$0]  %s4355_s26, 64, %s640_s20, [#allocation2], %s3201_s12, %s3201_s12, %s3202_s13 }
 0x4b7   : > { %s3008_s4 = scalar_lea.hbm %s3266_s22, 3216  ;;  %p2987_p10 = scmp.lt.u32.totalorder %s4358_s27, %s4544_s0 }
 0x4b8   : > { %p2985_p9 = scmp.ne.s32.totalorder %s4358_s27, %s3008_s4  ;;  %p2988_p11 = scmp.lt.u32.totalorder %s3284_s29, %s3008_s4 }
 0x4b9   : > { %p2990_p3 = scmp.lt.u32.totalorder %s3008_s4, %s4358_s27 }
 0x4ba   : > { %p2989_p12 = por %p2988_p11, %p2987_p10 }
 0x4bc   : > { %p2991_p13 = por %p2990_p3, %p2989_p12 }
 0x4be   : > { %p2992_p0 = pnand %p2991_p13, %p2985_p9 }
 0x4c0   : > { %2995 = shalt.err (!%p2992_p0)  }
 0x4c1   : > { %s2996_s30 = scalar_lea.vmem %s650_s25, 64  ;;  %p3001_p2 = scmp.lt.s32.totalorder %s650_s25, %s3296_s5 }
 0x4c2   : > { %p2997_p1 = scmp.ne.s32.totalorder %s650_s25, %s2996_s30  ;;  %p3002_p4 = scmp.lt.s32.totalorder %s3299_s11, %s2996_s30 }
 0x4c4   : > { %p3003_p5 = por %p3002_p4, %p3001_p2 }
 0x4c6   : > { %p3004_p8 = pnand %p3003_p5, %p2997_p1 }
 0x4c8   : > { %3007 = shalt.err (!%p3004_p8)  }
 0x4c9   : > { %652 = dma.hbm_to_vmem [thread:$0]  %s4358_s27, 64, %s650_s25, [#allocation2], %s3201_s12, %s3201_s12, %s3202_s13 }
 0x4ca   : > { %s657_s26 = scalar_lea.vmem %s3268_s23, 227 [#allocation3]  ;;  %s4413_s20 = scalar_lea.hbm %s3266_s22, 3600 }
 0x4cb   : > { %s659_s2 = sshll.u32 %s657_s26, 4  ;;  %s667_s3 = scalar_lea.vmem %s3268_s23, 228 [#allocation3]  ;;  %s660_s2 = int_to_ptr.vmem [resolvable:$true] %s659_s2 }
 0x4cc   : > { %s669_s4 = sshll.u32 %s667_s3, 4  ;;  %s3033_s19 = scalar_lea.hbm %s3266_s22, 3248  ;;  %s670_s4 = int_to_ptr.vmem [resolvable:$true] %s669_s4 }
 0x4cd   : > { %p3010_p9 = scmp.ne.s32.totalorder %s4379_s28, %s3033_s19  ;;  %p3012_p10 = scmp.lt.u32.totalorder %s4379_s28, %s4544_s0 }
 0x4ce   : > { %p3013_p11 = scmp.lt.u32.totalorder %s3284_s29, %s3033_s19  ;;  %p3015_p3 = scmp.lt.u32.totalorder %s3033_s19, %s4379_s28 }
 0x4d0   : > { %p3014_p12 = por %p3013_p11, %p3012_p10 }
 0x4d2   : > { %p3016_p13 = por %p3015_p3, %p3014_p12 }
 0x4d4   : > { %p3017_p0 = pnand %p3016_p13, %p3010_p9 }
 0x4d6   : > { %3020 = shalt.err (!%p3017_p0)  }
 0x4d7   : > { %s3021_s27 = scalar_lea.vmem %s660_s2, 64  ;;  %p3026_p2 = scmp.lt.s32.totalorder %s660_s2, %s3296_s5 }
 0x4d8   : > { %p3022_p1 = scmp.ne.s32.totalorder %s660_s2, %s3021_s27  ;;  %p3027_p4 = scmp.lt.s32.totalorder %s3299_s11, %s3021_s27 }
 0x4da   : > { %p3028_p5 = por %p3027_p4, %p3026_p2 }
 0x4dc   : > { %p3029_p8 = pnand %p3028_p5, %p3022_p1 }
 0x4de   : > { %3032 = shalt.err (!%p3029_p8)  }
 0x4df   : > { %662 = dma.hbm_to_vmem [thread:$0]  %s4379_s28, 64, %s660_s2, [#allocation2], %s3201_s12, %s3201_s12, %s3202_s13 }
 0x4e0   : > { %s4431_s25 = scalar_lea.hbm %s3266_s22, 3632  ;;  %s4434_s26 = scalar_lea.hbm %s3266_s22, 3664 }
 0x4e1   : > { %p3035_p9 = scmp.ne.s32.totalorder %s4413_s20, %s4434_s26  ;;  %p3037_p10 = scmp.lt.u32.totalorder %s4413_s20, %s4544_s0 }
 0x4e2   : > { %p3038_p11 = scmp.lt.u32.totalorder %s3284_s29, %s4434_s26  ;;  %p3040_p3 = scmp.lt.u32.totalorder %s4434_s26, %s4413_s20 }
 0x4e4   : > { %p3039_p12 = por %p3038_p11, %p3037_p10 }
 0x4e6   : > { %p3041_p13 = por %p3040_p3, %p3039_p12 }
 0x4e8   : > { %p3042_p0 = pnand %p3041_p13, %p3035_p9 }
 0x4ea   : > { %3045 = shalt.err (!%p3042_p0)  }
 0x4eb   : > { %s3046_s28 = scalar_lea.vmem %s670_s4, 64  ;;  %p3051_p2 = scmp.lt.s32.totalorder %s670_s4, %s3296_s5 }
 0x4ec   : > { %p3047_p1 = scmp.ne.s32.totalorder %s670_s4, %s3046_s28  ;;  %p3052_p4 = scmp.lt.s32.totalorder %s3299_s11, %s3046_s28 }
 0x4ee   : > { %p3053_p5 = por %p3052_p4, %p3051_p2 }
 0x4f0   : > { %p3054_p8 = pnand %p3053_p5, %p3047_p1 }
 0x4f2   : > { %3057 = shalt.err (!%p3054_p8)  }
 0x4f3   : > { %672 = dma.hbm_to_vmem [thread:$0]  %s4413_s20, 64, %s670_s4, [#allocation2], %s3201_s12, %s3201_s12, %s3202_s13 }
 0x4f4   : > { %s677_s2 = scalar_lea.vmem %s3268_s23, 229 [#allocation3]  ;;  %s687_s30 = scalar_lea.vmem %s3268_s23, 230 [#allocation3] }
 0x4f5   : > { %s679_s21 = sshll.u32 %s677_s2, 4  ;;  %s689_s27 = sshll.u32 %s687_s30, 4  ;;  %s680_s21 = int_to_ptr.vmem [resolvable:$true] %s679_s21  ;;  %s690_s27 = int_to_ptr.vmem [resolvable:$true] %s689_s27 }
 0x4f6   : > { %s4455_s3 = scalar_lea.hbm %s3266_s22, 3696  ;;  %p3062_p10 = scmp.lt.u32.totalorder %s4431_s25, %s4544_s0 }
 0x4f7   : > { %p3060_p9 = scmp.ne.s32.totalorder %s4431_s25, %s4455_s3  ;;  %p3063_p11 = scmp.lt.u32.totalorder %s3284_s29, %s4455_s3 }
 0x4f8   : > { %p3065_p3 = scmp.lt.u32.totalorder %s4455_s3, %s4431_s25 }
 0x4f9   : > { %p3064_p12 = por %p3063_p11, %p3062_p10 }
 0x4fb   : > { %p3066_p13 = por %p3065_p3, %p3064_p12 }
 0x4fd   : > { %p3067_p0 = pnand %p3066_p13, %p3060_p9 }
 0x4ff   : > { %3070 = shalt.err (!%p3067_p0)  }
 0x500   : > { %s3071_s20 = scalar_lea.vmem %s680_s21, 64  ;;  %p3076_p2 = scmp.lt.s32.totalorder %s680_s21, %s3296_s5 }
 0x501   : > { %p3072_p1 = scmp.ne.s32.totalorder %s680_s21, %s3071_s20  ;;  %p3077_p4 = scmp.lt.s32.totalorder %s3299_s11, %s3071_s20 }
 0x503   : > { %p3078_p5 = por %p3077_p4, %p3076_p2 }
 0x505   : > { %p3079_p8 = pnand %p3078_p5, %p3072_p1 }
 0x507   : > { %3082 = shalt.err (!%p3079_p8)  }
 0x508   : > { %682 = dma.hbm_to_vmem [thread:$0]  %s4431_s25, 64, %s680_s21, [#allocation2], %s3201_s12, %s3201_s12, %s3202_s13 }
 0x509   : > { %s3108_s4 = scalar_lea.hbm %s3266_s22, 3728  ;;  %p3087_p10 = scmp.lt.u32.totalorder %s4434_s26, %s4544_s0 }
 0x50a   : > { %p3085_p9 = scmp.ne.s32.totalorder %s4434_s26, %s3108_s4  ;;  %p3088_p11 = scmp.lt.u32.totalorder %s3284_s29, %s3108_s4 }
 0x50b   : > { %p3090_p3 = scmp.lt.u32.totalorder %s3108_s4, %s4434_s26 }
 0x50c   : > { %p3089_p12 = por %p3088_p11, %p3087_p10 }
 0x50e   : > { %p3091_p13 = por %p3090_p3, %p3089_p12 }
 0x510   : > { %p3092_p0 = pnand %p3091_p13, %p3085_p9 }
 0x512   : > { %3095 = shalt.err (!%p3092_p0)  }
 0x513   : > { %s3096_s19 = scalar_lea.vmem %s690_s27, 64  ;;  %p3101_p2 = scmp.lt.s32.totalorder %s690_s27, %s3296_s5 }
 0x514   : > { %p3097_p1 = scmp.ne.s32.totalorder %s690_s27, %s3096_s19  ;;  %p3102_p4 = scmp.lt.s32.totalorder %s3299_s11, %s3096_s19 }
 0x516   : > { %p3103_p5 = por %p3102_p4, %p3101_p2 }
 0x518   : > { %p3104_p8 = pnand %p3103_p5, %p3097_p1 }
 0x51a   : > { %3107 = shalt.err (!%p3104_p8)  }
 0x51b   : > { %692 = dma.hbm_to_vmem [thread:$0]  %s4434_s26, 64, %s690_s27, [#allocation2], %s3201_s12, %s3201_s12, %s3202_s13 }
 0x51c   : > { %s697_s25 = scalar_lea.vmem %s3268_s23, 231 [#allocation3]  ;;  %s3133_s28 = scalar_lea.hbm %s3266_s22, 3760 }
 0x51d   : > { %s699_s21 = sshll.u32 %s697_s25, 4  ;;  %p3110_p9 = scmp.ne.s32.totalorder %s4455_s3, %s3133_s28  ;;  %s700_s21 = int_to_ptr.vmem [resolvable:$true] %s699_s21 }
 0x51e   : > { %p3112_p10 = scmp.lt.u32.totalorder %s4455_s3, %s4544_s0  ;;  %p3113_p11 = scmp.lt.u32.totalorder %s3284_s29, %s3133_s28 }
 0x51f   : > { %p3115_p3 = scmp.lt.u32.totalorder %s3133_s28, %s4455_s3 }
 0x520   : > { %p3114_p12 = por %p3113_p11, %p3112_p10 }
 0x522   : > { %p3116_p13 = por %p3115_p3, %p3114_p12 }
 0x524   : > { %p3117_p0 = pnand %p3116_p13, %p3110_p9 }
 0x526   : > { %3120 = shalt.err (!%p3117_p0)  }
 0x527   : > { %s3121_s2 = scalar_lea.vmem %s700_s21, 64  ;;  %p3126_p2 = scmp.lt.s32.totalorder %s700_s21, %s3296_s5 }
 0x528   : > { %p3122_p1 = scmp.ne.s32.totalorder %s700_s21, %s3121_s2  ;;  %p3127_p4 = scmp.lt.s32.totalorder %s3299_s11, %s3121_s2 }
 0x52a   : > { %p3128_p5 = por %p3127_p4, %p3126_p2 }
 0x52c   : > { %p3129_p8 = pnand %p3128_p5, %p3122_p1 }
 0x52e   : > { %3132 = shalt.err (!%p3129_p8)  }
 0x52f   : > { %702 = dma.hbm_to_vmem [thread:$0]  %s4455_s3, 64, %s700_s21, [#allocation2], %s3201_s12, %s3201_s12, %s3202_s13 }
 0x530   : > { %3178 = dma.done.wait [#allocation2], 4096 }
 0x531   : > { %3179 = vsyncadd [#allocation2], 4294963200  ;;  %s847_s29 = scalar_lea.hbm %s4545_s1, %s1427_s18  ;;  %s833_s26 = scalar_lea.sflag [#allocation4], %s56_s17 }
 0x532   : > { %s3134_s27 = scalar_lea.vmem %s3271_s24, 4096  ;;  %p4549_p3 = scmp.lt.s32.totalorder %s3271_s24, %s3296_s5 }
 0x533   : > { %p3135_p9 = scmp.ne.s32.totalorder %s3271_s24, %s3134_s27  ;;  %p3142_p12 = scmp.lt.s32.totalorder %s3299_s11, %s3134_s27 }
 0x535   : > { %p3136_p10 = pnand %p3135_p9, %p3252_p7  ;;  %p3143_p13 = por %p3142_p12, %p4549_p3 }
 0x537   : > { %p3137_p11 = pneg %p3136_p10 }
 0x539   : > { %p3144_p0 = pnand %p3143_p13, %p3137_p11 }
 0x53b   : > { %3147 = shalt.err (!%p3144_p0)
}
 0x53c   : > { %s3148_s8 = scalar_lea.hbm %s847_s29, 4096  ;;  %s3152_s17 = scalar_lea.hbm %s4545_s1, 8192 }
 0x53d   : > { %p3149_p1 = scmp.ne.s32.totalorder %s847_s29, %s3148_s8  ;;  %p3153_p5 = scmp.lt.u32.totalorder %s847_s29, %s4545_s1 }
 0x53e   : > { %p3154_p8 = scmp.lt.u32.totalorder %s3152_s17, %s3148_s8  ;;  %p3156_p10 = scmp.lt.u32.totalorder %s3148_s8, %s847_s29 }
 0x53f   : > { %p3150_p2 = pnand %p3149_p1, %p3252_p7 }
 0x540   : > { %p3155_p9 = por %p3154_p8, %p3153_p5 }
 0x541   : > { %p3151_p4 = pneg %p3150_p2 }
 0x542   : > { %p3157_p12 = por %p3156_p10, %p3155_p9 }
 0x544   : > { %p3158_p11 = pnand %p3157_p12, %p3151_p4 }
 0x546   : > { %3161 = shalt.err (!%p3158_p11)
}
 0x547   : > { %s3203_s5 = smov 512   ;;  %s3204_s11 = smov 32  }
 0x548   : > { %1492 = dma.vmem_to_hbm [thread:$0]  (%p3252_p7), %s3271_s24, 4096, %s847_s29, %s833_s26, %s3203_s5, %s3203_s5, %s3204_s11  }
 0x549 PF: > { %p1498_p3 = scmp.ge.s32.totalorder %s3198_s9, 1  ;;  %s863_s30 = sand.u32 1, %s3186_s6  }
 0x54a   : > { %s864_s19 = scalar_lea.sflag [#allocation4], %s863_s30 }
 0x54b   : > { %p1495_p13 = pnand %p1498_p3, %p3245_p6 }
 0x54d   : > { %3181 = dma.done.wait (!%p1495_p13), %s864_s19, 4096  }
 0x54e   : > { %3183 = vsyncadd (!%p1495_p13), %s864_s19, 4294963200  ;;  %s14_s9 = sadd.s32 1, %s3198_s9   ;;  %s4550_s6 = smov %s3190_s7 }
 0x54f   : > { %p11_p0 = scmp.ge.s32.totalorder %s14_s9, 3   ;;  %s4551_s7 = smov %s3250_s15 }
 0x550   : > { %s4552_s8 = smov %s4554_s10 }
 0x551   :  { %13 = sbr.rel (!%p11_p0) target bundleno = 3 (0x3), region = 171 }
 0x558   :  { %869 = vsyncpa [#allocation4], 1 }
 0x559   :  { %871 = vsyncpa [#allocation4 + $0x1], 1 }
 0x55a   :  { %872 = vsyncmov [#allocation2] }
 0x55d   :  { %s873_s14 = vpop.sfrf %872 }
 0x55e   :  { %p1426_p6 = scmp.ne.s32.totalorder %s873_s14, 0 }
 0x560   :  { %877 = shalt.err (%p1426_p6)  }

</bundles_post_ra>
